<compile_context>
chip_gen: v7x
topology: tpu7x:2x2x1
jax: 0.10.0
libtpu: 0.0.40
codegen_flags: <defaults>
</compile_context>

<pallas_src>
import jax
import jax.numpy as jnp
from jax import lax
from jax.experimental import pallas as pl
from jax.experimental.pallas import tpu as pltpu


# ----------------------------------------------------------------------------
# Pallas kernel: upsample -> conv1 -> relu -> conv2 -> +residual -> relu
# ----------------------------------------------------------------------------
def _sr_kernel(x_ref, rh_ref, rwt_ref, m1_ref, b1_ref, m2_ref, b2_ref,
               o_ref, up_ref):
    # x_ref  : (NB, H,  W*Cin)       f32  low-res input, channels in lanes
    # rh_ref : (Ho, H)               f32  bilinear row-interpolation matrix
    # rwt_ref: (W*Cin, Wo*Cin)       f32  kron(col-interp^T, I_Cin)
    # m1_ref : (3*Wo*Cin,  Wo*Cout)  bf16 conv1 banded weights, dy folded in K
    # b1_ref : (1, Wo*Cout)          f32
    # m2_ref : (3*Wo*Cout, Wo*Cout)  bf16 conv2 banded weights
    # b2_ref : (1, Wo*Cout)          f32
    # o_ref  : (NB, Ho, Wo*Cout)     f32
    # up_ref : (NB*Ho, Wo*Cout)      f32  VMEM scratch: upsampled slab (residual)
    f32 = jnp.float32
    NB, H, WC = x_ref.shape
    Ho = rh_ref.shape[0]
    WoC = rwt_ref.shape[1]
    M = NB * Ho

    # ---- fused bilinear upsample (f32: keeps the residual path exact) -----
    # Column interp first: lane-dense and batch-stacked (rows = NB*H, K = W*Cin).
    xc = jnp.dot(x_ref[...].reshape(NB * H, WC), rwt_ref[...],
                 preferred_element_type=f32)                     # (NB*H, Wo*Cin)
    # Row interp per image (tiny K = H matmuls; for integer scales this could
    # instead be two sublane rolls + a VPU lerp — negligible at these shapes).
    rh = rh_ref[...]
    up_ref[...] = jnp.concatenate(
        [jnp.dot(rh, xc[n * H:(n + 1) * H, :], preferred_element_type=f32)
         for n in range(NB)], axis=0)                            # (M, Wo*Cin)

    # Per-image boundary masks for the +-1-row taps (rows stacked as n*Ho + h).
    row = lax.broadcasted_iota(jnp.int32, (M, 1), 0) % Ho
    top = row == 0
    bot = row == Ho - 1

    def conv3x3(inp, m_ref, b_ref):
        # 3x3 "SAME" conv as ONE matmul: the +-1-row taps are sublane rolls
        # (XLU) masked at per-image boundaries (VPU); dy folded into K so all
        # three taps accumulate inside the MXU.  bf16 operands, f32 accumulate.
        prev = jnp.where(top, 0.0, pltpu.roll(inp, shift=1, axis=0))      # h-1
        nxt = jnp.where(bot, 0.0, pltpu.roll(inp, shift=M - 1, axis=0))   # h+1
        cat = jnp.concatenate([prev, inp, nxt], axis=-1).astype(jnp.bfloat16)
        return jnp.dot(cat, m_ref[...], preferred_element_type=f32) + b_ref[...]

    h = jnp.maximum(conv3x3(up_ref[...], m1_ref, b1_ref), 0.0)   # conv1 + relu
    y = conv3x3(h, m2_ref, b2_ref) + up_ref[...]                 # conv2 + residual
    o_ref[...] = jnp.maximum(y, 0.0).reshape(NB, Ho, WoC).astype(o_ref.dtype)


# ----------------------------------------------------------------------------
# pallas_call wrapper
# ----------------------------------------------------------------------------
def _pick_batch_tile(N, Ho):
    """Images per grid step: fill ~256 MXU rows but keep >=2 steps (v7x 2 TCs)."""
    nb = max(1, min(N, 256 // max(Ho, 1), max(1, N // 2)))
    while N % nb:
        nb -= 1
    return nb


def _vmem_limit_bytes():
    try:  # leave headroom: 64 MiB/core on v7x, 128 MiB on v5e/v6e
        cap = pltpu.get_tpu_info().vmem_capacity_bytes
    except Exception:
        cap = 64 * 1024 * 1024
    return int(min(cap * 3 // 4, 96 * 1024 * 1024))


def _sr_pallas(x_fold, rh, rwt, m1, b1t, m2, b2t):
    N, H, WC = x_fold.shape
    Ho = rh.shape[0]
    WoC = m1.shape[-1]
    NB = _pick_batch_tile(N, Ho)

    def const_spec(arr):
        zeros = (0,) * arr.ndim
        return pl.BlockSpec(arr.shape, lambda n: zeros)

    grid_spec = pltpu.PrefetchScalarGridSpec(
        num_scalar_prefetch=0,
        grid=(N // NB,),
        in_specs=[
            pl.BlockSpec((NB, H, WC), lambda n: (n, 0, 0)),
            const_spec(rh), const_spec(rwt),
            const_spec(m1), const_spec(b1t),
            const_spec(m2), const_spec(b2t),
        ],
        out_specs=pl.BlockSpec((NB, Ho, WoC), lambda n: (n, 0, 0)),
        scratch_shapes=[pltpu.VMEM((NB * Ho, WoC), jnp.float32)],
    )
    return pl.pallas_call(
        _sr_kernel,
        out_shape=jax.ShapeDtypeStruct((N, Ho, WoC), jnp.float32),
        grid_spec=grid_spec,
        compiler_params=pltpu.CompilerParams(
            dimension_semantics=("parallel",),   # batch steps across v7x's 2 TCs
            vmem_limit_bytes=_vmem_limit_bytes(),
        ),
    )(x_fold, rh, rwt, m1, b1t, m2, b2t)


# ----------------------------------------------------------------------------
# Host-side constant-operator builders (tiny, computed once per shape)
# ----------------------------------------------------------------------------
def _interp_matrix(out_size, in_size):
    """PyTorch bilinear (align_corners=False) interpolation matrix, (out, in)."""
    i = jnp.arange(out_size, dtype=jnp.float32)
    src = jnp.maximum((i + 0.5) * (in_size / out_size) - 0.5, 0.0)
    i0 = jnp.clip(jnp.floor(src).astype(jnp.int32), 0, in_size - 1)
    i1 = jnp.minimum(i0 + 1, in_size - 1)
    w1 = src - i0.astype(jnp.float32)
    w0 = 1.0 - w1
    rows = jnp.arange(out_size)
    R = jnp.zeros((out_size, in_size), jnp.float32)
    return R.at[rows, i0].add(w0).at[rows, i1].add(w1)


def _banded_conv_matrix_row(w_row, Wo):
    """One conv-kernel row (kW, Cin, Cout) -> block-banded (Wo*Cin, Wo*Cout)
    folding the (dx, ci) contraction ('SAME' zero padding along W)."""
    kW = w_row.shape[0]
    pad = (kW - 1) // 2
    mats = [jnp.kron(jnp.eye(Wo, k=pad - dx, dtype=jnp.float32), w_row[dx])
            for dx in range(kW)]
    return sum(mats[1:], mats[0])


def _conv_as_lane_matmul(w_hwio, Wo):
    """(3,3,Cin,Cout) conv -> (3*Wo*Cin, Wo*Cout) matrix with dy folded into K
    (K order matches the kernel's [row h-1, row h, row h+1] lane concat)."""
    return jnp.concatenate(
        [_banded_conv_matrix_row(w_hwio[dy], Wo) for dy in range(w_hwio.shape[0])],
        axis=0)


def interpolate_conv_super_resolution_folded(x_fold, params, scale_factor,
                                             in_channels):
    """Lane-folded entry point.  x_fold: (N, H, W*Cin), returns (N, Ho, Wo*Cout)."""
    w1_hwio, b1, w2_hwio, b2 = params          # HWIO weights, (Cout,) biases
    N, H, WCin = x_fold.shape
    Cin = in_channels
    W = WCin // Cin
    Cout = w1_hwio.shape[-1]
    assert w1_hwio.shape[2] == Cin
    assert Cin == Cout, "residual add requires in_channels == out_channels"
    Ho, Wo = int(H * scale_factor), int(W * scale_factor)   # floor, as in PyTorch

    rh = _interp_matrix(Ho, H)                                        # (Ho, H)
    rwt = jnp.kron(_interp_matrix(Wo, W).T,
                   jnp.eye(Cin, dtype=jnp.float32))                   # (W*Cin, Wo*Cin)
    m1 = _conv_as_lane_matmul(w1_hwio, Wo).astype(jnp.bfloat16)       # (3*Wo*Cin, Wo*Cout)
    m2 = _conv_as_lane_matmul(w2_hwio, Wo).astype(jnp.bfloat16)       # (3*Wo*Cout, Wo*Cout)
    b1t = jnp.tile(b1, Wo).reshape(1, Wo * Cout).astype(jnp.float32)
    b2t = jnp.tile(b2, Wo).reshape(1, Wo * Cout).astype(jnp.float32)
    return _sr_pallas(x_fold, rh, rwt, m1, b1t, m2, b2t)


def interpolate_conv_super_resolution(x_nchw, params, scale_factor):
    """NCHW forward.  x_nchw: (N, Cin, H, W) f32 -> (N, Cout, Ho, Wo).
    TODO(synk): if the surrounding model is NHWC, call the *_folded entry point
    directly and skip these two full-resolution HBM transposes."""
    N, Cin, H, W = x_nchw.shape
    Cout = params[0].shape[-1]
    Ho, Wo = int(H * scale_factor), int(W * scale_factor)
    x_fold = jnp.transpose(x_nchw, (0, 2, 3, 1)).reshape(N, H, W * Cin)
    out_fold = interpolate_conv_super_resolution_folded(
        x_fold, params, scale_factor, Cin)                         # (N, Ho, Wo*Cout)
    return jnp.transpose(out_fold.reshape(N, Ho, Wo, Cout), (0, 3, 1, 2))


# ----------------------------------------------------------------------------
# Pure-JAX reference (sanity check)
# ----------------------------------------------------------------------------
def _bilinear_upsample_nchw(x, scale_factor):
    N, C, H, W = x.shape
    Ho, Wo = int(H * scale_factor), int(W * scale_factor)

    def coords(out_size, in_size):
        i = jnp.arange(out_size, dtype=jnp.float32)
        src = jnp.maximum((i + 0.5) * (in_size / out_size) - 0.5, 0.0)
        i0 = jnp.clip(jnp.floor(src).astype(jnp.int32), 0, in_size - 1)
        i1 = jnp.minimum(i0 + 1, in_size - 1)
        w1 = src - i0.astype(jnp.float32)
        return i0, i1, 1.0 - w1, w1

    r0, r1, rw0, rw1 = coords(Ho, H)
    c0, c1, cw0, cw1 = coords(Wo, W)
    xr = (x[:, :, r0, :] * rw0[None, None, :, None]
          + x[:, :, r1, :] * rw1[None, None, :, None])
    return (xr[:, :, :, c0] * cw0[None, None, None, :]
            + xr[:, :, :, c1] * cw1[None, None, None, :])


def _reference(x_nchw, params, scale_factor):
    w1, b1, w2, b2 = params
    up = _bilinear_upsample_nchw(x_nchw, scale_factor)
    up_nhwc = jnp.transpose(up, (0, 2, 3, 1))
    dn = lax.conv_dimension_numbers(up_nhwc.shape, w1.shape,
                                    ("NHWC", "HWIO", "NHWC"))
    h = lax.conv_general_dilated(up_nhwc, w1, (1, 1), "SAME",
                                 dimension_numbers=dn,
                                 precision=lax.Precision.HIGHEST) + b1
    h = jnp.maximum(h, 0.0)
    y = lax.conv_general_dilated(h, w2, (1, 1), "SAME",
                                 dimension_numbers=dn,
                                 precision=lax.Precision.HIGHEST) + b2
    y = jnp.maximum(y + up_nhwc, 0.0)
    return jnp.transpose(y, (0, 3, 1, 2))


if __name__ == "__main__":
    # batch=8 (exercises batch-stacking and a 2-step grid), channels=8 so the
    # lane dim W*C = 128 is dense, spatial 16x16, scale=2 -> 32x32 output.
    N, Cin, Cout, H, W = 8, 8, 8, 16, 16
    scale_factor = 2

    key = jax.random.PRNGKey(0)
    k_x, k_w1, k_b1, k_w2, k_b2 = jax.random.split(key, 5)

    x = jax.random.normal(k_x, (N, Cin, H, W), dtype=jnp.float32)

    # Conv2d weights (Cout, Cin, 3, 3), converted to HWIO for the kernel.
    w1 = jax.random.normal(k_w1, (Cout, Cin, 3, 3), jnp.float32) * 0.1
    b1 = jax.random.normal(k_b1, (Cout,), jnp.float32) * 0.1
    w2 = jax.random.normal(k_w2, (Cout, Cout, 3, 3), jnp.float32) * 0.1
    b2 = jax.random.normal(k_b2, (Cout,), jnp.float32) * 0.1
    w1_hwio = jnp.transpose(w1, (2, 3, 1, 0))          # (3,3,Cin,Cout)
    w2_hwio = jnp.transpose(w2, (2, 3, 1, 0))          # (3,3,Cout,Cout)
    params = (w1_hwio, b1, w2_hwio, b2)

    fwd = jax.jit(interpolate_conv_super_resolution, static_argnums=2)
    out = jax.block_until_ready(fwd(x, params, scale_factor))

    ref = _reference(x, params, scale_factor)
    assert out.shape == (N, Cout, H * scale_factor, W * scale_factor)
    # Conv matmuls run in bf16 on the MXU (f32 accumulate) -> looser tolerance.
    assert jnp.allclose(out, ref, atol=4e-2, rtol=4e-2), "mismatch vs reference"
    print("KERNEL_OK")
</pallas_src>

<mosaic_0001>
module attributes {stable_mosaic.version = 11 : i64} {
  func.func private @main(%arg0: i32) attributes {dimension_semantics = [#tpu.dimension_semantics<core_parallel>], iteration_bounds = array<i64: 2>, tpu.core_type = #tpu.core_type<sc_scalar_subcore>, window_params = []} {
    return
  }
}

module attributes {stable_mosaic.version = 11 : i64} {
  func.func private @main(%arg0: i32) attributes {dimension_semantics = [#tpu.dimension_semantics<core_parallel>], iteration_bounds = array<i64: 2>, tpu.core_type = #tpu.core_type<sc_scalar_subcore>, window_params = []} {
    return
  }
}

module attributes {stable_mosaic.version = 11 : i64} {
  func.func @_sr_kernel(%arg0: i32, %arg1: memref<4x16x128xf32, #tpu.memory_space<vmem>>, %arg2: memref<32x16xf32, #tpu.memory_space<vmem>>, %arg3: memref<128x256xf32, #tpu.memory_space<vmem>>, %arg4: memref<768x256xbf16, #tpu.memory_space<vmem>>, %arg5: memref<1x256xf32, #tpu.memory_space<vmem>>, %arg6: memref<768x256xbf16, #tpu.memory_space<vmem>>, %arg7: memref<1x256xf32, #tpu.memory_space<vmem>>, %arg8: memref<4x32x256xf32, #tpu.memory_space<vmem>>, %arg9: memref<128x256xf32, #tpu.memory_space<vmem>>) attributes {dimension_semantics = [#tpu.dimension_semantics<parallel>], iteration_bounds = array<i64: 2>, scalar_prefetch = 0 : i64, scratch_operands = 1 : i64, tpu.core_type = #tpu.core_type<tc>, window_params = [{transform_indices = @transform_0, window_bounds = array<i64: 4, 16, 128>}, {pipeline_mode = #tpu.pipeline_mode<synchronous>, transform_indices = @transform_1, window_bounds = array<i64: 32, 16>}, {pipeline_mode = #tpu.pipeline_mode<synchronous>, transform_indices = @transform_2, window_bounds = array<i64: 128, 256>}, {pipeline_mode = #tpu.pipeline_mode<synchronous>, transform_indices = @transform_3, window_bounds = array<i64: 768, 256>}, {pipeline_mode = #tpu.pipeline_mode<synchronous>, transform_indices = @transform_4, window_bounds = array<i64: 1, 256>}, {pipeline_mode = #tpu.pipeline_mode<synchronous>, transform_indices = @transform_5, window_bounds = array<i64: 768, 256>}, {pipeline_mode = #tpu.pipeline_mode<synchronous>, transform_indices = @transform_6, window_bounds = array<i64: 1, 256>}, {transform_indices = @transform_7, window_bounds = array<i64: 4, 32, 256>}]} {
    %c0 = arith.constant 0 : index
    %c0_0 = arith.constant 0 : index
    %c0_1 = arith.constant 0 : index
    %0 = vector.load %arg1[%c0, %c0_0, %c0_1] : memref<4x16x128xf32, #tpu.memory_space<vmem>>, vector<4x16x128xf32>
    %1 = vector.shape_cast %0 : vector<4x16x128xf32> to vector<64x128xf32>
    %c0_2 = arith.constant 0 : index
    %c0_3 = arith.constant 0 : index
    %2 = vector.load %arg3[%c0_2, %c0_3] : memref<128x256xf32, #tpu.memory_space<vmem>>, vector<128x256xf32>
    %cst = arith.constant dense<0.000000e+00> : vector<64x256xf32>
    %3 = tpu.matmul %1, %2, %cst {dimension_numbers = #tpu.dot_dimension_numbers<[1], [0], [0], [1], [0, 0, 1, 1], [], []>} : vector<64x128xf32>, vector<128x256xf32>, vector<64x256xf32> -> vector<64x256xf32>
    %c0_4 = arith.constant 0 : index
    %c0_5 = arith.constant 0 : index
    %4 = vector.load %arg2[%c0_4, %c0_5] : memref<32x16xf32, #tpu.memory_space<vmem>>, vector<32x16xf32>
    %5 = vector.extract_strided_slice %3 {offsets = [0, 0], sizes = [16, 256], strides = [1, 1]} : vector<64x256xf32> to vector<16x256xf32>
    %cst_6 = arith.constant dense<0.000000e+00> : vector<32x256xf32>
    %6 = tpu.matmul %4, %5, %cst_6 {dimension_numbers = #tpu.dot_dimension_numbers<[1], [0], [0], [1], [0, 0, 1, 1], [], []>} : vector<32x16xf32>, vector<16x256xf32>, vector<32x256xf32> -> vector<32x256xf32>
    %7 = vector.extract_strided_slice %3 {offsets = [16, 0], sizes = [16, 256], strides = [1, 1]} : vector<64x256xf32> to vector<16x256xf32>
    %cst_7 = arith.constant dense<0.000000e+00> : vector<32x256xf32>
    %8 = tpu.matmul %4, %7, %cst_7 {dimension_numbers = #tpu.dot_dimension_numbers<[1], [0], [0], [1], [0, 0, 1, 1], [], []>} : vector<32x16xf32>, vector<16x256xf32>, vector<32x256xf32> -> vector<32x256xf32>
    %9 = vector.extract_strided_slice %3 {offsets = [32, 0], sizes = [16, 256], strides = [1, 1]} : vector<64x256xf32> to vector<16x256xf32>
    %cst_8 = arith.constant dense<0.000000e+00> : vector<32x256xf32>
    %10 = tpu.matmul %4, %9, %cst_8 {dimension_numbers = #tpu.dot_dimension_numbers<[1], [0], [0], [1], [0, 0, 1, 1], [], []>} : vector<32x16xf32>, vector<16x256xf32>, vector<32x256xf32> -> vector<32x256xf32>
    %11 = vector.extract_strided_slice %3 {offsets = [48, 0], sizes = [16, 256], strides = [1, 1]} : vector<64x256xf32> to vector<16x256xf32>
    %cst_9 = arith.constant dense<0.000000e+00> : vector<32x256xf32>
    %12 = tpu.matmul %4, %11, %cst_9 {dimension_numbers = #tpu.dot_dimension_numbers<[1], [0], [0], [1], [0, 0, 1, 1], [], []>} : vector<32x16xf32>, vector<16x256xf32>, vector<32x256xf32> -> vector<32x256xf32>
    %13 = tpu.concatenate %6, %8, %10, %12 in 0 : vector<32x256xf32>, vector<32x256xf32>, vector<32x256xf32>, vector<32x256xf32> -> vector<128x256xf32>
    %c0_10 = arith.constant 0 : index
    %c0_11 = arith.constant 0 : index
    %14 = vector.load %arg9[%c0_10, %c0_11] : memref<128x256xf32, #tpu.memory_space<vmem>>, vector<128x256xf32>
    tpu.vector_store %arg9[%c0_10, %c0_11], %13 {strides = array<i32>} : memref<128x256xf32, #tpu.memory_space<vmem>>, vector<128x256xf32>,
    %15 = tpu.iota {dimensions = array<i32: 0>} : vector<128x1xi32>
    %c32_i32 = arith.constant 32 : i32
    %c0_i32 = arith.constant 0 : i32
    %16 = arith.cmpi eq, %c32_i32, %c0_i32 : i32
    %c1_i32 = arith.constant 1 : i32
    %17 = arith.select %16, %c1_i32, %c32_i32 : i32
    %18 = vector.broadcast %17 : i32 to vector<128x1xi32>
    %19 = arith.remsi %15, %18 : vector<128x1xi32>
    %c0_i32_12 = arith.constant 0 : i32
    %20 = vector.broadcast %c0_i32_12 : i32 to vector<128x1xi32>
    %21 = arith.cmpi ne, %19, %20 : vector<128x1xi32>
    %c0_i32_13 = arith.constant 0 : i32
    %22 = vector.broadcast %c0_i32_13 : i32 to vector<128x1xi32>
    %23 = arith.cmpi slt, %19, %22 : vector<128x1xi32>
    %c0_i32_14 = arith.constant 0 : i32
    %24 = arith.cmpi slt, %17, %c0_i32_14 : i32
    %25 = vector.broadcast %24 : i1 to vector<128x1xi1>
    %26 = vector.broadcast %25 : vector<128x1xi1> to vector<128x1xi1>
    %27 = arith.xori %23, %26 : vector<128x1xi1>
    %28 = arith.andi %27, %21 : vector<128x1xi1>
    %29 = vector.broadcast %17 : i32 to vector<128x1xi32>
    %30 = arith.addi %19, %29 : vector<128x1xi32>
    %31 = arith.select %28, %30, %19 : vector<128x1xi1>, vector<128x1xi32>
    %c0_i32_15 = arith.constant 0 : i32
    %32 = vector.broadcast %c0_i32_15 : i32 to vector<128x1xi32>
    %33 = arith.cmpi eq, %31, %32 : vector<128x1xi32>
    %c31_i32 = arith.constant 31 : i32
    %34 = vector.broadcast %c31_i32 : i32 to vector<128x1xi32>
    %35 = arith.cmpi eq, %31, %34 : vector<128x1xi32>
    %c0_16 = arith.constant 0 : index
    %c0_17 = arith.constant 0 : index
    %36 = vector.load %arg9[%c0_16, %c0_17] : memref<128x256xf32, #tpu.memory_space<vmem>>, vector<128x256xf32>
    %c1_i32_18 = arith.constant 1 : i32
    %37 = tpu.dynamic_rotate %36 by %c1_i32_18 dim 0 : vector<128x256xf32>, i32 -> vector<128x256xf32>
    %cst_19 = arith.constant 0.000000e+00 : f32
    %38 = vector.shape_cast %33 : vector<128x1xi1> to vector<128x1xi1>
    %39 = vector.broadcast %38 : vector<128x1xi1> to vector<128x256xi1>
    %40 = vector.broadcast %cst_19 : f32 to vector<128x256xf32>
    %41 = arith.select %39, %40, %37 : vector<128x256xi1>, vector<128x256xf32>
    %c127_i32 = arith.constant 127 : i32
    %42 = tpu.dynamic_rotate %36 by %c127_i32 dim 0 : vector<128x256xf32>, i32 -> vector<128x256xf32>
    %cst_20 = arith.constant 0.000000e+00 : f32
    %43 = vector.shape_cast %35 : vector<128x1xi1> to vector<128x1xi1>
    %44 = vector.broadcast %43 : vector<128x1xi1> to vector<128x256xi1>
    %45 = vector.broadcast %cst_20 : f32 to vector<128x256xf32>
    %46 = arith.select %44, %45, %42 : vector<128x256xi1>, vector<128x256xf32>
    %47 = tpu.concatenate %41, %36, %46 in 1 : vector<128x256xf32>, vector<128x256xf32>, vector<128x256xf32> -> vector<128x768xf32>
    %48 = arith.truncf %47 : vector<128x768xf32> to vector<128x768xbf16>
    %c0_21 = arith.constant 0 : index
    %c0_22 = arith.constant 0 : index
    %49 = vector.load %arg4[%c0_21, %c0_22] : memref<768x256xbf16, #tpu.memory_space<vmem>>, vector<768x256xbf16>
    %cst_23 = arith.constant dense<0.000000e+00> : vector<128x256xf32>
    %50 = tpu.matmul %48, %49, %cst_23 {dimension_numbers = #tpu.dot_dimension_numbers<[1], [0], [0], [1], [0, 0, 1, 1], [], []>} : vector<128x768xbf16>, vector<768x256xbf16>, vector<128x256xf32> -> vector<128x256xf32>
    %c0_24 = arith.constant 0 : index
    %c0_25 = arith.constant 0 : index
    %51 = vector.load %arg5[%c0_24, %c0_25] : memref<1x256xf32, #tpu.memory_space<vmem>>, vector<1x256xf32>
    %52 = vector.broadcast %51 : vector<1x256xf32> to vector<128x256xf32>
    %53 = arith.addf %50, %52 : vector<128x256xf32>
    %cst_26 = arith.constant 0.000000e+00 : f32
    %54 = vector.broadcast %cst_26 : f32 to vector<128x256xf32>
    %55 = arith.maximumf %53, %54 : vector<128x256xf32>
    %c1_i32_27 = arith.constant 1 : i32
    %56 = tpu.dynamic_rotate %55 by %c1_i32_27 dim 0 : vector<128x256xf32>, i32 -> vector<128x256xf32>
    %cst_28 = arith.constant 0.000000e+00 : f32
    %57 = vector.shape_cast %33 : vector<128x1xi1> to vector<128x1xi1>
    %58 = vector.broadcast %57 : vector<128x1xi1> to vector<128x256xi1>
    %59 = vector.broadcast %cst_28 : f32 to vector<128x256xf32>
    %60 = arith.select %58, %59, %56 : vector<128x256xi1>, vector<128x256xf32>
    %c127_i32_29 = arith.constant 127 : i32
    %61 = tpu.dynamic_rotate %55 by %c127_i32_29 dim 0 : vector<128x256xf32>, i32 -> vector<128x256xf32>
    %cst_30 = arith.constant 0.000000e+00 : f32
    %62 = vector.shape_cast %35 : vector<128x1xi1> to vector<128x1xi1>
    %63 = vector.broadcast %62 : vector<128x1xi1> to vector<128x256xi1>
    %64 = vector.broadcast %cst_30 : f32 to vector<128x256xf32>
    %65 = arith.select %63, %64, %61 : vector<128x256xi1>, vector<128x256xf32>
    %66 = tpu.concatenate %60, %55, %65 in 1 : vector<128x256xf32>, vector<128x256xf32>, vector<128x256xf32> -> vector<128x768xf32>
    %67 = arith.truncf %66 : vector<128x768xf32> to vector<128x768xbf16>
    %c0_31 = arith.constant 0 : index
    %c0_32 = arith.constant 0 : index
    %68 = vector.load %arg6[%c0_31, %c0_32] : memref<768x256xbf16, #tpu.memory_space<vmem>>, vector<768x256xbf16>
    %cst_33 = arith.constant dense<0.000000e+00> : vector<128x256xf32>
    %69 = tpu.matmul %67, %68, %cst_33 {dimension_numbers = #tpu.dot_dimension_numbers<[1], [0], [0], [1], [0, 0, 1, 1], [], []>} : vector<128x768xbf16>, vector<768x256xbf16>, vector<128x256xf32> -> vector<128x256xf32>
    %c0_34 = arith.constant 0 : index
    %c0_35 = arith.constant 0 : index
    %70 = vector.load %arg7[%c0_34, %c0_35] : memref<1x256xf32, #tpu.memory_space<vmem>>, vector<1x256xf32>
    %71 = vector.broadcast %70 : vector<1x256xf32> to vector<128x256xf32>
    %72 = arith.addf %69, %71 : vector<128x256xf32>
    %c0_36 = arith.constant 0 : index
    %c0_37 = arith.constant 0 : index
    %73 = vector.load %arg9[%c0_36, %c0_37] : memref<128x256xf32, #tpu.memory_space<vmem>>, vector<128x256xf32>
    %74 = arith.addf %72, %73 : vector<128x256xf32>
    %cst_38 = arith.constant 0.000000e+00 : f32
    %75 = vector.broadcast %cst_38 : f32 to vector<128x256xf32>
    %76 = arith.maximumf %74, %75 : vector<128x256xf32>
    %77 = vector.shape_cast %76 : vector<128x256xf32> to vector<4x32x256xf32>
    %c0_39 = arith.constant 0 : index
    %c0_40 = arith.constant 0 : index
    %c0_41 = arith.constant 0 : index
    %78 = vector.load %arg8[%c0_39, %c0_40, %c0_41] : memref<4x32x256xf32, #tpu.memory_space<vmem>>, vector<4x32x256xf32>
    tpu.vector_store %arg8[%c0_39, %c0_40, %c0_41], %77 {strides = array<i32>} : memref<4x32x256xf32, #tpu.memory_space<vmem>>, vector<4x32x256xf32>,
    return
  }
  func.func @transform_0(%arg0: i32) -> (i32, i32, i32) {
    %c0_i32 = arith.constant 0 : i32
    %c0_i32_0 = arith.constant 0 : i32
    %c0_i32_1 = arith.constant 0 : i32
    return %arg0, %c0_i32, %c0_i32_0 : i32, i32, i32
  }
  func.func @transform_1(%arg0: i32) -> (i32, i32) {
    %c0_i32 = arith.constant 0 : i32
    %c0_i32_0 = arith.constant 0 : i32
    %c0_i32_1 = arith.constant 0 : i32
    return %c0_i32, %c0_i32_0 : i32, i32
  }
  func.func @transform_2(%arg0: i32) -> (i32, i32) {
    %c0_i32 = arith.constant 0 : i32
    %c0_i32_0 = arith.constant 0 : i32
    %c0_i32_1 = arith.constant 0 : i32
    return %c0_i32, %c0_i32_0 : i32, i32
  }
  func.func @transform_3(%arg0: i32) -> (i32, i32) {
    %c0_i32 = arith.constant 0 : i32
    %c0_i32_0 = arith.constant 0 : i32
    %c0_i32_1 = arith.constant 0 : i32
    return %c0_i32, %c0_i32_0 : i32, i32
  }
  func.func @transform_4(%arg0: i32) -> (i32, i32) {
    %c0_i32 = arith.constant 0 : i32
    %c0_i32_0 = arith.constant 0 : i32
    %c0_i32_1 = arith.constant 0 : i32
    return %c0_i32, %c0_i32_0 : i32, i32
  }
  func.func @transform_5(%arg0: i32) -> (i32, i32) {
    %c0_i32 = arith.constant 0 : i32
    %c0_i32_0 = arith.constant 0 : i32
    %c0_i32_1 = arith.constant 0 : i32
    return %c0_i32, %c0_i32_0 : i32, i32
  }
  func.func @transform_6(%arg0: i32) -> (i32, i32) {
    %c0_i32 = arith.constant 0 : i32
    %c0_i32_0 = arith.constant 0 : i32
    %c0_i32_1 = arith.constant 0 : i32
    return %c0_i32, %c0_i32_0 : i32, i32
  }
  func.func @transform_7(%arg0: i32) -> (i32, i32, i32) {
    %c0_i32 = arith.constant 0 : i32
    %c0_i32_0 = arith.constant 0 : i32
    %c0_i32_1 = arith.constant 0 : i32
    return %arg0, %c0_i32, %c0_i32_0 : i32, i32, i32
  }
}

</mosaic_0001>

<bundles_post_ra>
// kernel: tile.13
= control target key start
LH: loop header
LB: loop body
LE: loop exit
PB: predicated region body
PF: predicated region fallthrough
CT: control target
= control target key end

     0   :  { %s40_s0 = inlined_call_operand.vmem [shape: f32[8], index: 0, kind: input, shape index: {}]   ;;  %s41_s1 = inlined_call_operand.vmem [shape: f32[32,8], index: 1, kind: output, shape index: {}]  }
   0x1   :  { %v4_v0 = vld [vmem:[%s40_s0] ss:$0 sm:$0xff] }
   0x2   :  { %5 = vst [vmem:[%s41_s1] sm:$0xff] %v4_v0  ;;  %12 = vst [vmem:[%s41_s1 + $0x8] sm:$0xff] %v4_v0 }
   0x3   :  { %13 = vst [vmem:[%s41_s1 + $0x10] sm:$0xff] %v4_v0  ;;  %14 = vst [vmem:[%s41_s1 + $0x18] sm:$0xff] %v4_v0 }

// kernel: tile.14
= control target key start
LH: loop header
LB: loop body
LE: loop exit
PB: predicated region body
PF: predicated region fallthrough
CT: control target
= control target key end

     0   :  { %s7_s6 = smov 3  ;;  %s21_s9 = smov 3  ;;  %vm4_vm0 = vcmask 64512   ;;  %vm11_vm1 = vcmask 1048512   ;;  %vm18_vm2 = vcmask 982912   ;;  %vm25_vm3 = vcmask 917312   ;;  %s232_s0 = inlined_call_operand.vmem [shape: f32[32,8], index: 0, kind: input, shape index: {}]   ;;  %s233_s1 = inlined_call_operand.vmem [shape: f32[1,256], index: 1, kind: output, shape index: {}]  }
   0x1   :  { %v122_v0 = vld [vmem:[%s232_s0 + $0xf] ss:$16 sm:%s7_s6]   ;;  %s153_s10 = smov 120   ;;  %v124_v1 = vld [vmem:[%s232_s0 + $0xd] ss:$16 sm:%s21_s9]   ;;  %s14_s13 = smov 3 }
   0x2   :  { %9 = vrot.lane.b32.xlu0 %v122_v0, %s153_s10  ;;  %s154_s14 = smov 104   ;;  %v123_v2 = vld [vmem:[%s232_s0 + $0xe] ss:$16 sm:%s14_s13]   ;;  %s28_s17 = smov 3  ;;  %vm32_vm4 = vcmask 851712   ;;  %vm39_vm5 = vcmask 786112  }
   0x3   :  { %23 = vrot.lane.b32.xlu1 %v124_v1, %s154_s14  ;;  %v125_v3 = vld [vmem:[%s232_s0 + $0xc] ss:$16 sm:%s28_s17]   ;;  %s35_s20 = smov 3  ;;  %s42_s21 = smov 3  ;;  %vm46_vm6 = vcmask 720512   ;;  %vm53_vm7 = vcmask 654912  }
   0x4   :  { %s155_s22 = smov 112   ;;  %s156_s23 = smov 96   ;;  %v126_v4 = vld [vmem:[%s232_s0 + $0xb] ss:$16 sm:%s35_s20]   ;;  %v127_v5 = vld [vmem:[%s232_s0 + $0xa] ss:$16 sm:%s42_s21]  }
   0x5   :  { %s49_s28 = smov 3  ;;  %s56_s29 = smov 3  ;;  %vm60_vm8 = vcmask 589312   ;;  %vm67_vm9 = vcmask 523712   ;;  %vm74_vm10 = vcmask 458112   ;;  %vm81_vm11 = vcmask 392512  }
   0x6   :  { %16 = vrot.lane.b32.xlu0 %v123_v2, %s155_s22  ;;  %s157_s30 = smov 88   ;;  %s158_s2 = smov 80   ;;  %v128_v6 = vld [vmem:[%s232_s0 + $0x9] ss:$16 sm:%s49_s28]   ;;  %vm88_vm12 = vcmask 326912   ;;  %vm95_vm13 = vcmask 261312  }
   0x7   :  { %30 = vrot.lane.b32.xlu1 %v125_v3, %s156_s23  ;;  %v129_v7 = vld [vmem:[%s232_s0 + $0x8] ss:$16 sm:%s56_s29]   ;;  %s63_s7 = smov 3  ;;  %s70_s8 = smov 3  ;;  %vm102_vm14 = vcmask 195712   ;;  %vm109_vm15 = vcmask 130112  }
   0x8   :  { %s159_s9 = smov 72   ;;  %s160_s10 = smov 64   ;;  %v130_v8 = vld [vmem:[%s232_s0 + $0x7] ss:$16 sm:%s63_s7]   ;;  %v131_v9 = vld [vmem:[%s232_s0 + $0x6] ss:$16 sm:%s70_s8]  }
   0x9   :  { %s2_s13 = smov 3  ;;  %s77_s16 = smov 3 }
   0xa   :  { %37 = vrot.lane.b32.xlu0 %v126_v4, %s157_s30  ;;  %v3_v10 = vld [vmem:[%s232_s0] ss:$16 sm:%s2_s13]   ;;  %s84_s19 = smov 3  ;;  %s161_s20 = smov 56  }
   0xb   :  { %44 = vrot.lane.b32.xlu1 %v127_v5, %s158_s2  ;;  %5 = vst.msk [vmem:[#allocation0] ss:$8 sm:$0x3] %vm4_vm0, %v3_v10   ;;  %s162_s21 = smov 48   ;;  %v132_v11 = vld [vmem:[%s232_s0 + $0x5] ss:$16 sm:%s77_s16]  }
   0xc   :  { %v133_v12 = vld [vmem:[%s232_s0 + $0x4] ss:$16 sm:%s84_s19]   ;;  %s91_s26 = smov 3  ;;  %s98_s27 = smov 3 }
   0xd   :  { %s163_s28 = smov 40   ;;  %s164_s29 = smov 32   ;;  %v134_v13 = vld [vmem:[%s232_s0 + $0x3] ss:$16 sm:%s91_s26]   ;;  %v135_v14 = vld [vmem:[%s232_s0 + $0x2] ss:$16 sm:%s98_s27]  }
   0xe   :  { %51 = vrot.lane.b32.xlu0 %v128_v6, %s159_s9  ;;  %s105_s5 = smov 3  ;;  %s165_s6 = smov 24  }
   0xf   :  { %58 = vrot.lane.b32.xlu1 %v129_v7, %s160_s10  ;;  %s166_s7 = smov 16   ;;  %v136_v15 = vld [vmem:[%s232_s0 + $0x1] ss:$16 sm:%s105_s5]   ;;  %s167_s0 = smov 8  }
  0x12   :  { %65 = vrot.lane.b32.xlu0 %v130_v8, %s161_s20 }
  0x13   :  { %72 = vrot.lane.b32.xlu1 %v131_v9, %s162_s21 }
  0x16   :  { %79 = vrot.lane.b32.xlu0 %v132_v11, %s163_s28 }
  0x17   :  { %86 = vrot.lane.b32.xlu1 %v133_v12, %s164_s29 }
  0x1a   :  { %93 = vrot.lane.b32.xlu0 %v134_v13, %s165_s6 }
  0x1b   :  { %100 = vrot.lane.b32.xlu1 %v135_v14, %s166_s7 }
  0x1e   :  { %107 = vrot.lane.b32.xlu0 %v136_v15, %s167_s0 }
  0x74   :  { %v10_v16 = vpop.permute.xlu0 %9  }
  0x75   :  { %12 = vst.msk [vmem:[#allocation0] ss:$8 sm:$0x3] %vm11_vm1, %v10_v16   ;;  %v24_v17 = vpop.permute.xlu1 %23  }
  0x78   :  { %v17_v18 = vpop.permute.xlu0 %16  }
  0x79   :  { %19 = vst.msk [vmem:[#allocation0] ss:$8 sm:$0x3] %vm18_vm2, %v17_v18   ;;  %v31_v19 = vpop.permute.xlu1 %30  }
  0x7a   :  { %26 = vst.msk [vmem:[#allocation0] ss:$8 sm:$0x3] %vm25_vm3, %v24_v17  }
  0x7b   :  { %33 = vst.msk [vmem:[#allocation0] ss:$8 sm:$0x3] %vm32_vm4, %v31_v19  }
  0x7c   :  { %v38_v20 = vpop.permute.xlu0 %37  }
  0x7d   :  { %40 = vst.msk [vmem:[#allocation0] ss:$8 sm:$0x3] %vm39_vm5, %v38_v20   ;;  %v45_v21 = vpop.permute.xlu1 %44  }
  0x7e   :  { %47 = vst.msk [vmem:[#allocation0] ss:$8 sm:$0x3] %vm46_vm6, %v45_v21  }
  0x80   :  { %v52_v22 = vpop.permute.xlu0 %51  }
  0x81   :  { %54 = vst.msk [vmem:[#allocation0] ss:$8 sm:$0x3] %vm53_vm7, %v52_v22   ;;  %v59_v23 = vpop.permute.xlu1 %58  }
  0x82   :  { %61 = vst.msk [vmem:[#allocation0] ss:$8 sm:$0x3] %vm60_vm8, %v59_v23  }
  0x84   :  { %v66_v24 = vpop.permute.xlu0 %65  }
  0x85   :  { %68 = vst.msk [vmem:[#allocation0] ss:$8 sm:$0x3] %vm67_vm9, %v66_v24   ;;  %v73_v25 = vpop.permute.xlu1 %72  }
  0x86   :  { %75 = vst.msk [vmem:[#allocation0] ss:$8 sm:$0x3] %vm74_vm10, %v73_v25  }
  0x88   :  { %v80_v26 = vpop.permute.xlu0 %79  }
  0x89   :  { %82 = vst.msk [vmem:[#allocation0] ss:$8 sm:$0x3] %vm81_vm11, %v80_v26   ;;  %v87_v27 = vpop.permute.xlu1 %86  }
  0x8a   :  { %89 = vst.msk [vmem:[#allocation0] ss:$8 sm:$0x3] %vm88_vm12, %v87_v27  }
  0x8c   :  { %v94_v28 = vpop.permute.xlu0 %93  }
  0x8d   :  { %96 = vst.msk [vmem:[#allocation0] ss:$8 sm:$0x3] %vm95_vm13, %v94_v28   ;;  %v101_v29 = vpop.permute.xlu1 %100  }
  0x8e   :  { %103 = vst.msk [vmem:[#allocation0] ss:$8 sm:$0x3] %vm102_vm14, %v101_v29  }
  0x90   :  { %v108_v30 = vpop.permute.xlu0 %107  }
  0x91   :  { %110 = vst.msk [vmem:[#allocation0] ss:$8 sm:$0x3] %vm109_vm15, %v108_v30  }
  0x98   :  { %v114_v31 = vld [vmem:[#allocation0] sm:$0x1]  ;;  %v118_v32 = vld [vmem:[#allocation0 + $0x8] sm:$0x1] }
  0x99   :  { %116 = vst [vmem:[%s233_s1] sm:$0x1] %v114_v31  ;;  %137 = vst [vmem:[%s233_s1 + $0x1] sm:$0x1] %v118_v32 }

// kernel: interpolate_conv_super_resolution.1
= control target key start
LH: loop header
LB: loop body
LE: loop exit
PB: predicated region body
PF: predicated region fallthrough
CT: control target
= control target key end

     0   :  { %s4689_s24 = smov 0   ;;  %s7072_s0 = inlined_call_operand.vmem [shape: f32[8,16,128], index: 0, kind: input, shape index: {}]   ;;  %s7073_s1 = inlined_call_operand.vmem [shape: f32[32,16], index: 1, kind: input, shape index: {}]   ;;  %s7074_s2 = inlined_call_operand.vmem [shape: f32[128,256], index: 2, kind: input, shape index: {}]   ;;  %s7075_s3 = inlined_call_operand.vmem [shape: bf16[768,256], index: 3, kind: input, shape index: {}]   ;;  %s7076_s4 = inlined_call_operand.vmem [shape: f32[1,256], index: 4, kind: input, shape index: {}]   ;;  %s7077_s5 = inlined_call_operand.vmem [shape: bf16[768,256], index: 5, kind: input, shape index: {}]   ;;  %s7078_s6 = inlined_call_operand.vmem [shape: f32[1,256], index: 6, kind: input, shape index: {}]   ;;  %s7079_s7 = inlined_call_operand.vmem [shape: f32[8,32,256], index: 7, kind: output, shape index: {}]  }
   0x1 LB: > { %s3704_s25 = sadd.s32 4294967295, %s4645_s24   ;;  %p3708_p0 = scmp.ge.s32.totalorder %s4645_s24, 1  ;;  %s4645_s24 = sphi %s4689_s24, %s17_s24  }
   0x2   : > { %p239_p1 = scmp.lt.s32.totalorder %s4645_s24, 3 }
   0x4   : > { %p240_p2 = pnand %p3708_p0, %p239_p1 }
   0x6   : > { %243 = sbr.rel (%p240_p2) target bundleno = 1357 (0x54d), region = 48 }
   0xd   : > { %v296_v0 = vld [vmem:[%s7074_s2 + $0x8] sm:$0xff]  ;;  %v298_v1 = vld [vmem:[%s7074_s2 + $0x18] sm:$0xff]  ;;  %v295_v2 = vld [vmem:[%s7074_s2] sm:$0xff]  ;;  %v4647_v7 = vmov 0.0   ;;  %s3709_s28 = sshll.u32 %s3704_s25, 2  ;;  %vm444_vm0 = vcmask 130048  }
   0xe   : > { %v4063_v3 = vpack.c.bf16 %v298_v1, %v296_v0  ;;  %v297_v4 = vld [vmem:[%s7074_s2 + $0x10] sm:$0xff]  ;;  %v300_v5 = vld [vmem:[%s7074_s2 + $0x28] sm:$0xff]  ;;  %v302_v6 = vld [vmem:[%s7074_s2 + $0x38] sm:$0xff]  ;;  %391 = vmatprep.mubr.f32.mxu0 %v4647_v7  ;;  %521 = vmatprep.mubr.f32.mxu1 %v4647_v7  ;;  %p274_p3 = scmp.lt.s32.totalorder %s3709_s28, 7  ;;  %vm4648_vm4 = vmmov 1  }
   0xf   : > { %v4065_v8 = vpack.c.bf16 %v297_v4, %v295_v2  ;;  %v4067_v9 = vpack.c.bf16 %v302_v6, %v300_v5  ;;  %v299_v10 = vld [vmem:[%s7074_s2 + $0x20] sm:$0xff]  ;;  %v301_v11 = vld [vmem:[%s7074_s2 + $0x30] sm:$0xff]  ;;  %v304_v12 = vld [vmem:[%s7074_s2 + $0x48] sm:$0xff] }
  0x10   : > { %4064 = vmatprep.subr.bf16.mxu0 %v4063_v3  ;;  %v306_v13 = vld [vmem:[%s7074_s2 + $0x58] sm:$0xff]  ;;  %v4069_v14 = vpack.c.bf16 %v301_v11, %v299_v10  ;;  %v303_v16 = vld [vmem:[%s7074_s2 + $0x40] sm:$0xff]  ;;  %v305_v17 = vld [vmem:[%s7074_s2 + $0x50] sm:$0xff]  ;;  %s7630_s28 = smov (!%p274_p3, %s3709_s28), 7 }
  0x11   : > { %4066 = vmatpush1.bf16.msra.mxu0 %v4065_v8  ;;  %v4071_v15 = vpack.c.bf16 %v306_v13, %v304_v12  ;;  %v308_v18 = vld [vmem:[%s7074_s2 + $0x68] sm:$0xff]  ;;  %v310_v19 = vld [vmem:[%s7074_s2 + $0x78] sm:$0xff]  ;;  %v4073_v20 = vpack.c.bf16 %v305_v17, %v303_v16  ;;  %v307_v22 = vld [vmem:[%s7074_s2 + $0x60] sm:$0xff]  ;;  %s4053_s27 = sshll.u32 %s7630_s28, 4  ;;  %s4054_s17 = sshll.u32 %s7630_s28, 6 }
  0x12   : > { %4068 = vmatprep.subr.bf16.mxu0 %v4067_v9  ;;  %v4075_v21 = vpack.c.bf16 %v310_v19, %v308_v18  ;;  %v309_v23 = vld [vmem:[%s7074_s2 + $0x70] sm:$0xff]  ;;  %v312_v24 = vld [vmem:[%s7074_s2 + $0x88] sm:$0xff]  ;;  %v314_v25 = vld [vmem:[%s7074_s2 + $0x98] sm:$0xff]  ;;  %s278_s8 = scalar_lea.vmem %s7072_s0, %s4053_s27  ;;  %s6976_s20 = scalar_lea.vmem %s7079_s7, %s4054_s17 }
  0x13   : > { %v4077_v26 = vpack.c.bf16 %v309_v23, %v307_v22  ;;  %v311_v27 = vld [vmem:[%s7074_s2 + $0x80] sm:$0xff]  ;;  %v313_v28 = vld [vmem:[%s7074_s2 + $0x90] sm:$0xff]  ;;  %v316_v29 = vld [vmem:[%s7074_s2 + $0xa8] sm:$0xff]  ;;  %v4079_v30 = vpack.c.bf16 %v314_v25, %v312_v24 }
  0x14   : > { %v318_v31 = vld [vmem:[%s7074_s2 + $0xb8] sm:$0xff]  ;;  %v315_v32 = vld [vmem:[%s7074_s2 + $0xa0] sm:$0xff]  ;;  %v317_v33 = vld [vmem:[%s7074_s2 + $0xb0] sm:$0xff]  ;;  %v4081_v34 = vpack.c.bf16 %v313_v28, %v311_v27 }
  0x15   : > { %4070 = vmatpush1.bf16.msra.mxu0 %v4069_v14  ;;  %v320_v35 = vld [vmem:[%s7074_s2 + $0xc8] sm:$0xff]  ;;  %v322_v36 = vld [vmem:[%s7074_s2 + $0xd8] sm:$0xff]  ;;  %v4083_v37 = vpack.c.bf16 %v318_v31, %v316_v29  ;;  %v319_v38 = vld [vmem:[%s7074_s2 + $0xc0] sm:$0xff]  ;;  %v4085_v40 = vpack.c.bf16 %v317_v33, %v315_v32 }
  0x16   : > { %4072 = vmatprep.subr.bf16.mxu0 %v4071_v15  ;;  %v321_v39 = vld [vmem:[%s7074_s2 + $0xd0] sm:$0xff]  ;;  %v324_v41 = vld [vmem:[%s7074_s2 + $0xe8] sm:$0xff]  ;;  %v326_v42 = vld [vmem:[%s7074_s2 + $0xf8] sm:$0xff]  ;;  %v4087_v43 = vpack.c.bf16 %v322_v36, %v320_v35 }
  0x17   : > { %v323_v44 = vld [vmem:[%s7074_s2 + $0xe0] sm:$0xff]  ;;  %v325_v45 = vld [vmem:[%s7074_s2 + $0xf0] sm:$0xff]  ;;  %v4089_v46 = vpack.c.bf16 %v321_v39, %v319_v38  ;;  %v4091_v47 = vpack.c.bf16 %v326_v42, %v324_v41  ;;  %v288_v50 = vld [vmem:[%s278_s8 + $0x8] sm:$0xff] }
  0x18   : > { %v4093_v48 = vpack.c.bf16 %v325_v45, %v323_v44  ;;  %v287_v49 = vld [vmem:[%s278_s8] sm:$0xff]  ;;  %v289_v51 = vld [vmem:[%s278_s8 + $0x10] sm:$0xff]  ;;  %v290_v52 = vld [vmem:[%s278_s8 + $0x18] sm:$0xff] }
  0x19   : > { %4074 = vmatpush1.bf16.msra.mxu0 %v4073_v20  ;;  %v291_v53 = vld [vmem:[%s278_s8 + $0x20] sm:$0xff]  ;;  %v292_v54 = vld [vmem:[%s278_s8 + $0x28] sm:$0xff]  ;;  %v293_v55 = vld [vmem:[%s278_s8 + $0x30] sm:$0xff] }
  0x1a   : > { %4076 = vmatprep.subr.bf16.mxu0 %v4075_v21  ;;  %v294_v56 = vld [vmem:[%s278_s8 + $0x38] sm:$0xff]  ;;  %v440_v1 = vld [vmem:[%s7073_s1] sm:$0xff]  ;;  %v441_v5 = vld [vmem:[%s7073_s1 + $0x8] sm:$0xff] }
  0x1b   : > { %v442_v9 = vld [vmem:[%s7073_s1 + $0x10] sm:$0xff]  ;;  %v443_v14 = vld [vmem:[%s7073_s1 + $0x18] sm:$0xff]  ;;  %v4347_v22 = vld [vmem:[%s7075_s3 + $0x4] ss:$8 sps:$4 sm:$0xff]  }
  0x1c   : > { %v4345_v23 = vld [vmem:[%s7075_s3] ss:$8 sps:$4 sm:$0xff]   ;;  %v4350_v24 = vld [vmem:[%s7075_s3 + $0x14] ss:$8 sps:$4 sm:$0xff]   ;;  %v4353_v25 = vld [vmem:[%s7075_s3 + $0x24] ss:$8 sps:$4 sm:$0xff]  }
  0x1d   : > { %4078 = vmatpush1.bf16.msra.mxu0 %v4077_v26  ;;  %v4351_v26 = vld [vmem:[%s7075_s3 + $0x20] ss:$8 sps:$4 sm:$0xff]   ;;  %v4356_v27 = vld [vmem:[%s7075_s3 + $0x34] ss:$8 sps:$4 sm:$0xff]   ;;  %v4354_v28 = vld [vmem:[%s7075_s3 + $0x30] ss:$8 sps:$4 sm:$0xff]  }
  0x1e   : > { %4080 = vmatprep.subr.bf16.mxu0 %v4079_v30  ;;  %v4359_v29 = vld [vmem:[%s7075_s3 + $0x44] ss:$8 sps:$4 sm:$0xff]   ;;  %v4357_v30 = vld [vmem:[%s7075_s3 + $0x40] ss:$8 sps:$4 sm:$0xff]   ;;  %v4362_v31 = vld [vmem:[%s7075_s3 + $0x54] ss:$8 sps:$4 sm:$0xff]  }
  0x1f   : > { %v4360_v32 = vld [vmem:[%s7075_s3 + $0x50] ss:$8 sps:$4 sm:$0xff]   ;;  %v4365_v33 = vld [vmem:[%s7075_s3 + $0x64] ss:$8 sps:$4 sm:$0xff]   ;;  %v4368_v35 = vld [vmem:[%s7075_s3 + $0x74] ss:$8 sps:$4 sm:$0xff]  }
  0x20   : > { %v4366_v36 = vld [vmem:[%s7075_s3 + $0x70] ss:$8 sps:$4 sm:$0xff]   ;;  %v4369_v38 = vld [vmem:[%s7075_s3 + $0x80] ss:$8 sps:$4 sm:$0xff]   ;;  %v4374_v39 = vld [vmem:[%s7075_s3 + $0x94] ss:$8 sps:$4 sm:$0xff]  }
  0x21   : > { %4082 = vmatpush1.bf16.msra.mxu0 %v4081_v34  ;;  %v4363_v34 = vld [vmem:[%s7075_s3 + $0x60] ss:$8 sps:$4 sm:$0xff]   ;;  %v4377_v41 = vld [vmem:[%s7075_s3 + $0xa4] ss:$8 sps:$4 sm:$0xff]   ;;  %v4378_v44 = vld [vmem:[%s7075_s3 + $0xb0] ss:$8 sps:$4 sm:$0xff]  }
  0x22   : > { %4084 = vmatprep.subr.bf16.mxu0 %v4083_v37  ;;  %v4371_v37 = vld [vmem:[%s7075_s3 + $0x84] ss:$8 sps:$4 sm:$0xff]   ;;  %v4375_v42 = vld [vmem:[%s7075_s3 + $0xa0] ss:$8 sps:$4 sm:$0xff]  }
  0x23   : > { %v4383_v45 = vld [vmem:[%s7075_s3 + $0xc4] ss:$8 sps:$4 sm:$0xff]  }
  0x25   : > { %4086 = vmatpush1.bf16.msra.mxu0 %v4085_v40  ;;  %v4372_v40 = vld [vmem:[%s7075_s3 + $0x90] ss:$8 sps:$4 sm:$0xff]  }
  0x26   : > { %4088 = vmatprep.subr.bf16.mxu0 %v4087_v43  ;;  %v4380_v43 = vld [vmem:[%s7075_s3 + $0xb4] ss:$8 sps:$4 sm:$0xff]  }
  0x29   : > { %4090 = vmatpush1.bf16.msra.mxu0 %v4089_v46  ;;  %v4381_v46 = vld [vmem:[%s7075_s3 + $0xc0] ss:$8 sps:$4 sm:$0xff]  }
  0x2a   : > { %4092 = vmatprep.subr.bf16.mxu0 %v4091_v47  ;;  %v4386_v47 = vld [vmem:[%s7075_s3 + $0xd4] ss:$8 sps:$4 sm:$0xff]  }
  0x2d   : > { %4094 = vmatpush1.bf16.msra.mxu0 %v4093_v48  ;;  %v4384_v48 = vld [vmem:[%s7075_s3 + $0xd0] ss:$8 sps:$4 sm:$0xff]  }
  0x2e   : > { %2012 = vmatprep.subr.bf16.mxu0 %v4347_v22 }
  0x30   : > { %392 = vmatmul.mubr.f32.vlgmr.msra.gmra.mrb[0].mxu0 %v287_v49  ;;  %v4389_v49 = vld [vmem:[%s7075_s3 + $0xe4] ss:$8 sps:$4 sm:$0xff]  }
  0x31   : > { %397 = vmatprep.mubr.f32.mxu0 %v4647_v7  ;;  %2013 = vmatpush1.bf16.msra.mxu0 %v4345_v23 }
  0x32   : > { %2014 = vmatprep.subr.bf16.mxu0 %v4350_v24 }
  0x34   : > { %398 = vmatmul.mubr.f32.gmra.mrb[2].mxu0 %v288_v50  ;;  %v4387_v50 = vld [vmem:[%s7075_s3 + $0xe0] ss:$8 sps:$4 sm:$0xff]  }
  0x35   : > { %403 = vmatprep.mubr.f32.mxu0 %v4647_v7 }
  0x38   : > { %404 = vmatmul.mubr.f32.gmra.mrb[4].mxu0 %v289_v51  ;;  %v4392_v51 = vld [vmem:[%s7075_s3 + $0xf4] ss:$8 sps:$4 sm:$0xff]  }
  0x39   : > { %409 = vmatprep.mubr.f32.mxu0 %v4647_v7 }
  0x3c   : > { %410 = vmatmul.mubr.f32.gmra.mrb[6].mxu0 %v290_v52  ;;  %v4390_v52 = vld [vmem:[%s7075_s3 + $0xf0] ss:$8 sps:$4 sm:$0xff]  }
  0x3d   : > { %415 = vmatprep.mubr.f32.mxu0 %v4647_v7 }
  0x40   : > { %416 = vmatmul.mubr.f32.gmra.mrb[8].mxu0 %v291_v53  ;;  %v4395_v53 = vld [vmem:[%s7075_s3 + $0x104] ss:$8 sps:$4 sm:$0xff]  }
  0x41   : > { %421 = vmatprep.mubr.f32.mxu0 %v4647_v7 }
  0x44   : > { %422 = vmatmul.mubr.f32.gmra.mrb[10].mxu0 %v292_v54  ;;  %v845_v54 = vlaneseq }
  0x45   : > { %427 = vmatprep.mubr.f32.mxu0 %v4647_v7 }
  0x48   : > { %428 = vmatmul.mubr.f32.gmra.mrb[12].mxu0 %v293_v55 }
  0x49   : > { %433 = vmatprep.mubr.f32.mxu0 %v4647_v7 }
  0x4c   : > { %434 = vmatmul.mubr.f32.gmra.mrb[14].mxu0 %v294_v56  ;;  %v4954_v56 = vshrl.u32 %v845_v54, 7 }
  0x4e   : > { %vm1150_vm1 = vcmp.lt.s32.totalorder %v4954_v56, 1  ;;  %vm1279_vm2 = vcmp.lt.s32.totalorder %v4954_v56, 7 }
 0x103   : > { %v393_v57 = vpop.f32.mrb[0].mxu0 }
 0x104   : > { %v395_v58 = vpop.f32.mrb[1].mxu0 }
 0x107   : > { %v399_v59 = vpop.f32.mrb[2].mxu0 }
 0x108   : > { %v4097_v60 = vpack.c.bf16 %v399_v59, %v393_v57  ;;  %v401_v61 = vpop.f32.mrb[3].mxu0 }
 0x109   : > { %v4095_v62 = vpack.c.bf16 %v401_v61, %v395_v58 }
 0x10b   : > { %v405_v63 = vpop.f32.mrb[4].mxu0  ;;  %4096 = vmatprep.subr.bf16.mxu1 %v4095_v62 }
 0x10c   : > { %v407_v0 = vpop.f32.mrb[5].mxu0  ;;  %4098 = vmatpush1.bf16.msra.mxu1 %v4097_v60 }
 0x10f   : > { %v411_v2 = vpop.f32.mrb[6].mxu0  ;;  %3715 = vmatmul.mubr.msk.f32.vlgmr.msra.gmra.mrb[0].mxu1 %vm444_vm0, %v440_v1 }
 0x110   : > { %v4101_v3 = vpack.c.bf16 %v411_v2, %v405_v63  ;;  %v413_v4 = vpop.f32.mrb[7].mxu0  ;;  %527 = vmatprep.mubr.f32.mxu1 %v4647_v7 }
 0x111   : > { %v4099_v6 = vpack.c.bf16 %v413_v4, %v407_v0 }
 0x113   : > { %3716 = vmatmul.mubr.msk.f32.gmra.mrb[2].mxu1 %vm444_vm0, %v441_v5  ;;  %4100 = vmatprep.subr.bf16.mxu1 %v4099_v6  ;;  %v417_v8 = vpop.f32.mrb[8].mxu0 }
 0x114   : > { %4102 = vmatpush1.bf16.msra.mxu1 %v4101_v3  ;;  %533 = vmatprep.mubr.f32.mxu1 %v4647_v7  ;;  %v419_v10 = vpop.f32.mrb[9].mxu0 }
 0x117   : > { %3717 = vmatmul.mubr.msk.f32.gmra.mrb[4].mxu1 %vm444_vm0, %v442_v9  ;;  %v423_v11 = vpop.f32.mrb[10].mxu0 }
 0x118   : > { %v4105_v12 = vpack.c.bf16 %v423_v11, %v417_v8  ;;  %539 = vmatprep.mubr.f32.mxu1 %v4647_v7  ;;  %v425_v13 = vpop.f32.mrb[11].mxu0 }
 0x119   : > { %v4103_v15 = vpack.c.bf16 %v425_v13, %v419_v10 }
 0x11b   : > { %3718 = vmatmul.mubr.msk.f32.gmra.mrb[6].mxu1 %vm444_vm0, %v443_v14  ;;  %4104 = vmatprep.subr.bf16.mxu1 %v4103_v15  ;;  %v429_v16 = vpop.f32.mrb[12].mxu0 }
 0x11c   : > { %610 = vmatprep.mubr.f32.mxu1 %v4647_v7  ;;  %v431_v17 = vpop.f32.mrb[13].mxu0 }
 0x11f   : > { %3719 = vmatmul.mubr.msk.f32.vlgmr.msra.gmra.mrb[8].mxu1 %vm444_vm0, %v440_v1  ;;  %v435_v18 = vpop.f32.mrb[14].mxu0 }
 0x120   : > { %4106 = vmatpush1.bf16.msra.mxu1 %v4105_v12  ;;  %616 = vmatprep.mubr.f32.mxu1 %v4647_v7  ;;  %v4109_v19 = vpack.c.bf16 %v435_v18, %v429_v16  ;;  %v437_v20 = vpop.f32.mrb[15].mxu0 }
 0x121   : > { %v4107_v21 = vpack.c.bf16 %v437_v20, %v431_v17 }
 0x123   : > { %3720 = vmatmul.mubr.msk.f32.gmra.mrb[10].mxu1 %vm444_vm0, %v441_v5  ;;  %4108 = vmatprep.subr.bf16.mxu1 %v4107_v21 }
 0x124   : > { %622 = vmatprep.mubr.f32.mxu1 %v4647_v7 }
 0x127   : > { %3721 = vmatmul.mubr.msk.f32.gmra.mrb[12].mxu1 %vm444_vm0, %v442_v9 }
 0x128   : > { %628 = vmatprep.mubr.f32.mxu1 %v4647_v7 }
 0x12b   : > { %3722 = vmatmul.mubr.msk.f32.gmra.mrb[14].mxu1 %vm444_vm0, %v443_v14 }
 0x12c   : > { %699 = vmatprep.mubr.f32.mxu1 %v4647_v7 }
 0x12f   : > { %3723 = vmatmul.mubr.msk.f32.vlgmr.msra.gmra.mrb[16].mxu1 %vm444_vm0, %v440_v1 }
 0x130   : > { %4110 = vmatpush1.bf16.msra.mxu1 %v4109_v19  ;;  %705 = vmatprep.mubr.f32.mxu1 %v4647_v7 }
 0x133   : > { %3724 = vmatmul.mubr.msk.f32.gmra.mrb[18].mxu1 %vm444_vm0, %v441_v5 }
 0x134   : > { %711 = vmatprep.mubr.f32.mxu1 %v4647_v7 }
 0x137   : > { %3725 = vmatmul.mubr.msk.f32.gmra.mrb[20].mxu1 %vm444_vm0, %v442_v9 }
 0x138   : > { %717 = vmatprep.mubr.f32.mxu1 %v4647_v7 }
 0x13b   : > { %3726 = vmatmul.mubr.msk.f32.gmra.mrb[22].mxu1 %vm444_vm0, %v443_v14 }
 0x13c   : > { %788 = vmatprep.mubr.f32.mxu1 %v4647_v7 }
 0x13f   : > { %3727 = vmatmul.mubr.msk.f32.vlgmr.msra.gmra.mrb[24].mxu1 %vm444_vm0, %v440_v1 }
 0x140   : > { %794 = vmatprep.mubr.f32.mxu1 %v4647_v7 }
 0x143   : > { %3728 = vmatmul.mubr.msk.f32.gmra.mrb[26].mxu1 %vm444_vm0, %v441_v5 }
 0x144   : > { %800 = vmatprep.mubr.f32.mxu1 %v4647_v7 }
 0x147   : > { %3729 = vmatmul.mubr.msk.f32.gmra.mrb[28].mxu1 %vm444_vm0, %v442_v9 }
 0x148   : > { %806 = vmatprep.mubr.f32.mxu1 %v4647_v7  ;;  %v4348_v7 = vld [vmem:[%s7075_s3 + $0x10] ss:$8 sps:$4 sm:$0xff]  }
 0x149   : > { %2015 = vmatpush1.bf16.msra.mxu0 %v4348_v7 }
 0x14a   : > { %2016 = vmatprep.subr.bf16.mxu0 %v4353_v25 }
 0x14b   : > { %3730 = vmatmul.mubr.msk.f32.gmra.mrb[30].mxu1 %vm444_vm0, %v443_v14 }
 0x14d   : > { %2017 = vmatpush1.bf16.msra.mxu0 %v4351_v26 }
 0x14e   : > { %2018 = vmatprep.subr.bf16.mxu0 %v4356_v27 }
 0x151   : > { %2019 = vmatpush1.bf16.msra.mxu0 %v4354_v28 }
 0x152   : > { %2020 = vmatprep.subr.bf16.mxu0 %v4359_v29 }
 0x155   : > { %2021 = vmatpush1.bf16.msra.mxu0 %v4357_v30 }
 0x156   : > { %2022 = vmatprep.subr.bf16.mxu0 %v4362_v31 }
 0x159   : > { %2023 = vmatpush1.bf16.msra.mxu0 %v4360_v32 }
 0x15a   : > { %2024 = vmatprep.subr.bf16.mxu0 %v4365_v33 }
 0x15d   : > { %2025 = vmatpush1.bf16.msra.mxu0 %v4363_v34 }
 0x15e   : > { %2026 = vmatprep.subr.bf16.mxu0 %v4368_v35 }
 0x161   : > { %2027 = vmatpush1.bf16.msra.mxu0 %v4366_v36 }
 0x162   : > { %2028 = vmatprep.subr.bf16.mxu0 %v4371_v37 }
 0x165   : > { %2029 = vmatpush1.bf16.msra.mxu0 %v4369_v38 }
 0x166   : > { %2030 = vmatprep.subr.bf16.mxu0 %v4374_v39 }
 0x169   : > { %2031 = vmatpush1.bf16.msra.mxu0 %v4372_v40 }
 0x16a   : > { %2032 = vmatprep.subr.bf16.mxu0 %v4377_v41 }
 0x16d   : > { %2033 = vmatpush1.bf16.msra.mxu0 %v4375_v42 }
 0x16e   : > { %2034 = vmatprep.subr.bf16.mxu0 %v4380_v43 }
 0x171   : > { %2035 = vmatpush1.bf16.msra.mxu0 %v4378_v44 }
 0x172   : > { %2036 = vmatprep.subr.bf16.mxu0 %v4383_v45 }
 0x175   : > { %2037 = vmatpush1.bf16.msra.mxu0 %v4381_v46 }
 0x176   : > { %2038 = vmatprep.subr.bf16.mxu0 %v4386_v47 }
 0x179   : > { %2039 = vmatpush1.bf16.msra.mxu0 %v4384_v48 }
 0x17a   : > { %2040 = vmatprep.subr.bf16.mxu0 %v4389_v49 }
 0x17d   : > { %2041 = vmatpush1.bf16.msra.mxu0 %v4387_v50 }
 0x17e   : > { %2042 = vmatprep.subr.bf16.mxu0 %v4392_v51 }
 0x181   : > { %2043 = vmatpush1.bf16.msra.mxu0 %v4390_v52 }
 0x182   : > { %2125 = vmatprep.subr.bf16.mxu0 %v4395_v53 }
 0x1e2   : > { %v4952_v55 = vpop.f32.mrb[0].mxu1 }
 0x1e3   : > { %7235 = vst [vmem:[#allocation3_spill] sm:$0xff] %v4952_v55  ;;  %v4956_v57 = vpop.f32.mrb[1].mxu1  ;;  %v7083_v58 = vrot.slane %v4952_v55, 7  ;;  %v7080_v59 = vrot.slane %v4952_v55, 1 }
 0x1e4   : > { %7236 = vst [vmem:[#allocation4_spill] sm:$0xff] %v4956_v57  ;;  %v7082_v61 = vrot.slane %v4956_v57, 7  ;;  %v7081_v2 = vrot.slane %v4956_v57, 1 }
 0x1e6   : > { %v4960_v60 = vpop.f32.mrb[2].mxu1 }
 0x1e7   : > { %7237 = vst [vmem:[#allocation5_spill] sm:$0xff] %v4960_v60  ;;  %v1120_v62 = vrot.slane %v4960_v60, 7  ;;  %v1249_v63 = vrot.slane %v4960_v60, 1  ;;  %v4969_v1 = vpop.f32.mrb[3].mxu1 }
 0x1e8   : > { %7238 = vst [vmem:[#allocation6_spill] sm:$0xff] %v4969_v1  ;;  %v1121_v3 = vrot.slane %v4969_v1, 7  ;;  %v1250_v4 = vrot.slane %v4969_v1, 1 }
 0x1e9   : > { %v4980_v6 = vsel %vm1150_vm1, %v7083_v58, %v1120_v62  ;;  %v4986_v8 = vsel %vm1279_vm2, %v7080_v59, %v1249_v63 }
 0x1ea   : > { %7239 = vst [vmem:[#allocation7_spill] sm:$0xff] %v4986_v8  ;;  %v4988_v9 = vpop.f32.mrb[4].mxu1  ;;  %v4994_v10 = vsel %vm1150_vm1, %v7082_v61, %v1121_v3  ;;  %v5000_v11 = vsel %vm1279_vm2, %v7081_v2, %v1250_v4 }
 0x1eb   : > { %7240 = vst [vmem:[#allocation8_spill] sm:$0xff] %v4988_v9  ;;  %7241 = vst [vmem:[#allocation9_spill] sm:$0xff] %v5000_v11  ;;  %v1122_v12 = vrot.slane %v4988_v9, 7  ;;  %v1251_v13 = vrot.slane %v4988_v9, 1  ;;  %v5004_v14 = vpop.f32.mrb[5].mxu1 }
 0x1ec   : > { %7242 = vst [vmem:[#allocation10_spill] sm:$0xff] %v5004_v14  ;;  %v1123_v15 = vrot.slane %v5004_v14, 7  ;;  %v1252_v16 = vrot.slane %v5004_v14, 1 }
 0x1ed   : > { %v5010_v17 = vsel %vm1279_vm2, %v1249_v63, %v1251_v13  ;;  %v5014_v18 = vsel %vm1150_vm1, %v1120_v62, %v1122_v12 }
 0x1ee   : > { %7243 = vst [vmem:[#allocation11_spill] sm:$0xff] %v5010_v17  ;;  %v5018_v20 = vpop.f32.mrb[6].mxu1  ;;  %v5022_v21 = vsel %vm1150_vm1, %v1121_v3, %v1123_v15  ;;  %v5026_v22 = vsel %vm1279_vm2, %v1250_v4, %v1252_v16 }
 0x1ef   : > { %7244 = vst [vmem:[#allocation12_spill] sm:$0xff] %v5018_v20  ;;  %7245 = vst [vmem:[#allocation13_spill] sm:$0xff] %v5026_v22  ;;  %v1124_v23 = vrot.slane %v5018_v20, 7  ;;  %v1253_v24 = vrot.slane %v5018_v20, 1  ;;  %v5030_v7 = vpop.f32.mrb[7].mxu1 }
 0x1f0   : > { %7246 = vst [vmem:[#allocation14_spill] sm:$0xff] %v5030_v7  ;;  %v1125_v27 = vrot.slane %v5030_v7, 7  ;;  %v1254_v28 = vrot.slane %v5030_v7, 1 }
 0x1f1   : > { %v5042_v30 = vsel %vm1150_vm1, %v1122_v12, %v1124_v23  ;;  %v5046_v31 = vsel %vm1279_vm2, %v1251_v13, %v1253_v24 }
 0x1f2   : > { %7247 = vst [vmem:[#allocation15_spill] sm:$0xff] %v5046_v31  ;;  %v5048_v32 = vpop.f32.mrb[8].mxu1  ;;  %v5052_v33 = vsel %vm1150_vm1, %v1123_v15, %v1125_v27  ;;  %v5058_v35 = vsel %vm1279_vm2, %v1252_v16, %v1254_v28 }
 0x1f3   : > { %7248 = vst [vmem:[#allocation16_spill] sm:$0xff] %v5048_v32  ;;  %7249 = vst [vmem:[#allocation17_spill] sm:$0xff] %v5058_v35  ;;  %v1126_v36 = vrot.slane %v5048_v32, 7  ;;  %v1255_v37 = vrot.slane %v5048_v32, 1  ;;  %v5062_v38 = vpop.f32.mrb[9].mxu1 }
 0x1f4   : > { %7250 = vst [vmem:[#allocation18_spill] sm:$0xff] %v5062_v38  ;;  %v1127_v40 = vrot.slane %v5062_v38, 7  ;;  %v1256_v41 = vrot.slane %v5062_v38, 1 }
 0x1f5   : > { %v5070_v42 = vsel %vm1150_vm1, %v1124_v23, %v1126_v36  ;;  %v5074_v43 = vsel %vm1279_vm2, %v1253_v24, %v1255_v37 }
 0x1f6   : > { %7251 = vst [vmem:[#allocation19_spill] sm:$0xff] %v5074_v43  ;;  %v5076_v44 = vpop.f32.mrb[10].mxu1  ;;  %v5080_v45 = vsel %vm1150_vm1, %v1125_v27, %v1127_v40  ;;  %v5084_v46 = vsel %vm1279_vm2, %v1254_v28, %v1256_v41 }
 0x1f7   : > { %7252 = vst [vmem:[#allocation20_spill] sm:$0xff] %v5076_v44  ;;  %7253 = vst [vmem:[#allocation21_spill] sm:$0xff] %v5084_v46  ;;  %v1128_v48 = vrot.slane %v5076_v44, 7  ;;  %v1257_v49 = vrot.slane %v5076_v44, 1  ;;  %v5090_v50 = vpop.f32.mrb[11].mxu1 }
 0x1f8   : > { %7254 = vst [vmem:[#allocation22_spill] sm:$0xff] %v5090_v50  ;;  %v1129_v53 = vrot.slane %v5090_v50, 7  ;;  %v1258_v54 = vrot.slane %v5090_v50, 1 }
 0x1f9   : > { %v5102_v63 = vsel %vm1150_vm1, %v1126_v36, %v1128_v48  ;;  %v5106_v3 = vsel %vm1279_vm2, %v1255_v37, %v1257_v49 }
 0x1fa   : > { %7255 = vst [vmem:[#allocation23_spill] sm:$0xff] %v5106_v3  ;;  %v5108_v4 = vpop.f32.mrb[12].mxu1  ;;  %v5112_v12 = vsel %vm1150_vm1, %v1127_v40, %v1129_v53  ;;  %v5118_v15 = vsel %vm1279_vm2, %v1256_v41, %v1258_v54 }
 0x1fb   : > { %7256 = vst [vmem:[#allocation24_spill] sm:$0xff] %v5108_v4  ;;  %7257 = vst [vmem:[#allocation25_spill] sm:$0xff] %v5118_v15  ;;  %v1130_v16 = vrot.slane %v5108_v4, 7  ;;  %v1259_v23 = vrot.slane %v5108_v4, 1  ;;  %v5122_v24 = vpop.f32.mrb[13].mxu1 }
 0x1fc   : > { %7258 = vst [vmem:[#allocation26_spill] sm:$0xff] %v5122_v24  ;;  %v1131_v28 = vrot.slane %v5122_v24, 7  ;;  %v1260_v36 = vrot.slane %v5122_v24, 1 }
 0x1fd   : > { %v5130_v37 = vsel %vm1150_vm1, %v1128_v48, %v1130_v16  ;;  %v5134_v40 = vsel %vm1279_vm2, %v1257_v49, %v1259_v23 }
 0x1fe   : > { %7259 = vst [vmem:[#allocation27_spill] sm:$0xff] %v5134_v40  ;;  %v5136_v41 = vpop.f32.mrb[14].mxu1  ;;  %v5140_v47 = vsel %vm1150_vm1, %v1129_v53, %v1131_v28  ;;  %v5144_v52 = vsel %vm1279_vm2, %v1258_v54, %v1260_v36 }
 0x1ff   : > { %7260 = vst [vmem:[#allocation28_spill] sm:$0xff] %v5136_v41  ;;  %7261 = vst [vmem:[#allocation29_spill] sm:$0xff] %v5144_v52  ;;  %v1132_v48 = vrot.slane %v5136_v41, 7  ;;  %v1261_v26 = vrot.slane %v5136_v41, 1  ;;  %v5150_v51 = vpop.f32.mrb[15].mxu1 }
 0x200   : > { %7262 = vst [vmem:[#allocation30_spill] sm:$0xff] %v5150_v51  ;;  %v1133_v62 = vrot.slane %v5150_v51, 7  ;;  %v1262_v54 = vrot.slane %v5150_v51, 1 }
 0x201   : > { %v5162_v19 = vsel %vm1150_vm1, %v1130_v16, %v1132_v48  ;;  %v5166_v29 = vsel %vm1279_vm2, %v1259_v23, %v1261_v26 }
 0x202   : > { %7263 = vst [vmem:[#allocation31_spill] sm:$0xff] %v5166_v29  ;;  %v5168_v0 = vpop.f32.mrb[16].mxu1  ;;  %v5172_v53 = vsel %vm1150_vm1, %v1131_v28, %v1133_v62  ;;  %v5178_v25 = vsel %vm1279_vm2, %v1260_v36, %v1262_v54 }
 0x203   : > { %7264 = vst [vmem:[#allocation32_spill] sm:$0xff] %v5168_v0  ;;  %7265 = vst [vmem:[#allocation33_spill] sm:$0xff] %v5178_v25  ;;  %v1134_v16 = vrot.slane %v5168_v0, 7  ;;  %v1263_v5 = vrot.slane %v5168_v0, 1  ;;  %v5182_v13 = vpop.f32.mrb[17].mxu1 }
 0x204   : > { %7266 = vst [vmem:[#allocation34_spill] sm:$0xff] %v5182_v13  ;;  %v1135_v27 = vrot.slane %v5182_v13, 7  ;;  %v1264_v28 = vrot.slane %v5182_v13, 1 }
 0x205   : > { %v5190_v49 = vsel %vm1150_vm1, %v1132_v48, %v1134_v16  ;;  %v5194_v36 = vsel %vm1279_vm2, %v1261_v26, %v1263_v5 }
 0x206   : > { %7267 = vst [vmem:[#allocation35_spill] sm:$0xff] %v5194_v36  ;;  %v5196_v34 = vpop.f32.mrb[18].mxu1  ;;  %v5200_v39 = vsel %vm1150_vm1, %v1133_v62, %v1135_v27  ;;  %v5204_v23 = vsel %vm1279_vm2, %v1262_v54, %v1264_v28 }
 0x207   : > { %7268 = vst [vmem:[#allocation36_spill] sm:$0xff] %v5196_v34  ;;  %7269 = vst [vmem:[#allocation37_spill] sm:$0xff] %v5204_v23  ;;  %v1136_v48 = vrot.slane %v5196_v34, 7  ;;  %v1265_v2 = vrot.slane %v5196_v34, 1  ;;  %v5210_v61 = vpop.f32.mrb[19].mxu1 }
 0x208   : > { %7270 = vst [vmem:[#allocation38_spill] sm:$0xff] %v5210_v61  ;;  %v1137_v58 = vrot.slane %v5210_v61, 7  ;;  %v1266_v54 = vrot.slane %v5210_v61, 1 }
 0x209   : > { %v5222_v59 = vsel %vm1150_vm1, %v1134_v16, %v1136_v48  ;;  %v5226_v29 = vsel %vm1279_vm2, %v1263_v5, %v1265_v2 }
 0x20a   : > { %7271 = vst [vmem:[#allocation39_spill] sm:$0xff] %v5226_v29  ;;  %v5228_v36 = vpop.f32.mrb[20].mxu1  ;;  %v5232_v62 = vsel %vm1150_vm1, %v1135_v27, %v1137_v58  ;;  %v5238_v3 = vsel %vm1279_vm2, %v1264_v28, %v1266_v54 }
 0x20b   : > { %7272 = vst [vmem:[#allocation40_spill] sm:$0xff] %v5228_v36  ;;  %7273 = vst [vmem:[#allocation41_spill] sm:$0xff] %v5238_v3  ;;  %v1138_v16 = vrot.slane %v5228_v36, 7  ;;  %v1267_v25 = vrot.slane %v5228_v36, 1  ;;  %v5242_v23 = vpop.f32.mrb[21].mxu1 }
 0x20c   : > { %7274 = vst [vmem:[#allocation42_spill] sm:$0xff] %v5242_v23  ;;  %v1139_v40 = vrot.slane %v5242_v23, 7  ;;  %v1268_v27 = vrot.slane %v5242_v23, 1 }
 0x20d   : > { %v5250_v26 = vsel %vm1150_vm1, %v1136_v48, %v1138_v16  ;;  %v5254_v28 = vsel %vm1279_vm2, %v1265_v2, %v1267_v25 }
 0x20e   : > { %7275 = vst [vmem:[#allocation43_spill] sm:$0xff] %v5254_v28  ;;  %v5256_v15 = vpop.f32.mrb[22].mxu1  ;;  %v5260_v52 = vsel %vm1150_vm1, %v1137_v58, %v1139_v40  ;;  %v5264_v5 = vsel %vm1279_vm2, %v1266_v54, %v1268_v27 }
 0x20f   : > { %7276 = vst [vmem:[#allocation44_spill] sm:$0xff] %v5256_v15  ;;  %7277 = vst [vmem:[#allocation45_spill] sm:$0xff] %v5264_v5  ;;  %v1140_v48 = vrot.slane %v5256_v15, 7  ;;  %v1269_v43 = vrot.slane %v5256_v15, 1  ;;  %v5270_v35 = vpop.f32.mrb[23].mxu1 }
 0x210   : > { %7278 = vst [vmem:[#allocation46_spill] sm:$0xff] %v5270_v35  ;;  %v1141_v46 = vrot.slane %v5270_v35, 7  ;;  %v1270_v54 = vrot.slane %v5270_v35, 1 }
 0x211   : > { %v5282_v31 = vsel %vm1150_vm1, %v1138_v16, %v1140_v48  ;;  %v5286_v29 = vsel %vm1279_vm2, %v1267_v25, %v1269_v43 }
 0x212   : > { %7279 = vst [vmem:[#allocation47_spill] sm:$0xff] %v5286_v29  ;;  %v5288_v28 = vpop.f32.mrb[24].mxu1  ;;  %v5292_v58 = vsel %vm1150_vm1, %v1139_v40, %v1141_v46  ;;  %v5298_v8 = vsel %vm1279_vm2, %v1268_v27, %v1270_v54 }
 0x213   : > { %7280 = vst [vmem:[#allocation48_spill] sm:$0xff] %v5288_v28  ;;  %7281 = vst [vmem:[#allocation49_spill] sm:$0xff] %v5298_v8  ;;  %v1142_v16 = vrot.slane %v5288_v28, 7  ;;  %v1271_v3 = vrot.slane %v5288_v28, 1  ;;  %v5302_v5 = vpop.f32.mrb[25].mxu1 }
 0x214   : > { %7282 = vst [vmem:[#allocation50_spill] sm:$0xff] %v5302_v5  ;;  %v1143_v17 = vrot.slane %v5302_v5, 7  ;;  %v1272_v40 = vrot.slane %v5302_v5, 1 }
 0x215   : > { %v5310_v2 = vsel %vm1150_vm1, %v1140_v48, %v1142_v16  ;;  %v5314_v27 = vsel %vm1279_vm2, %v1269_v43, %v1271_v3  ;;  %v866_v43 = vand.u32 31, %v4954_v56 }
 0x216   : > { %7283 = vst [vmem:[#allocation51_spill] sm:$0xff] %v5314_v27  ;;  %v5316_v11 = vpop.f32.mrb[26].mxu1  ;;  %v5320_v22 = vsel %vm1150_vm1, %v1141_v46, %v1143_v17  ;;  %v5324_v25 = vsel %vm1279_vm2, %v1270_v54, %v1272_v40 }
 0x217   : > { %7284 = vst [vmem:[#allocation52_spill] sm:$0xff] %v5316_v11  ;;  %7285 = vst [vmem:[#allocation53_spill] sm:$0xff] %v5324_v25  ;;  %v1144_v48 = vrot.slane %v5316_v11, 7  ;;  %v1273_v15 = vrot.slane %v5316_v11, 1  ;;  %v5330_v23 = vpop.f32.mrb[27].mxu1  ;;  %vm5379_vm3 = vcmp.ne.s32.totalorder %v866_v43, 0 }
 0x218   : > { %7286 = vst [vmem:[#allocation54_spill] sm:$0xff] %v5330_v23  ;;  %v1145_v35 = vrot.slane %v5330_v23, 7  ;;  %v1274_v54 = vrot.slane %v5330_v23, 1  ;;  %vm5426_vm5 = vmpackc.low %vm4648_vm4, %vm5379_vm3 }
 0x219   : > { %v5342_v36 = vsel %vm1150_vm1, %v1142_v16, %v1144_v48  ;;  %v5346_v29 = vsel %vm1279_vm2, %v1271_v3, %v1273_v15 }
 0x21a   : > { %7287 = vst [vmem:[#allocation55_spill] sm:$0xff] %v5346_v29  ;;  %v5348_v27 = vpop.f32.mrb[28].mxu1  ;;  %v5353_v46 = vsel %vm1150_vm1, %v1143_v17, %v1145_v35  ;;  %v5359_v0 = vsel %vm1279_vm2, %v1272_v40, %v1274_v54 }
 0x21b   : > { %7288 = vst [vmem:[#allocation56_spill] sm:$0xff] %v5348_v27  ;;  %7289 = vst [vmem:[#allocation57_spill] sm:$0xff] %v5359_v0  ;;  %v1146_v16 = vrot.slane %v5348_v27, 7  ;;  %v1275_v3 = vrot.slane %v5348_v27, 1  ;;  %v5363_v25 = vpop.f32.mrb[29].mxu1 }
 0x21c   : > { %7290 = vst [vmem:[#allocation58_spill] sm:$0xff] %v5363_v25  ;;  %v1147_v11 = vrot.slane %v5363_v25, 7  ;;  %v1276_v17 = vrot.slane %v5363_v25, 1 }
 0x21d   : > { %v5371_v8 = vsel %vm1150_vm1, %v1144_v48, %v1146_v16  ;;  %v5375_v40 = vsel %vm1279_vm2, %v1273_v15, %v1275_v3  ;;  %v7297_v48 = vrot.slane %v4952_v55, 7 }
 0x21e   : > { %7291 = vst [vmem:[#allocation59_spill] sm:$0xff] %v5375_v40  ;;  %v5377_v5 = vpop.f32.mrb[30].mxu1  ;;  %v5385_v28 = vsel %vm1150_vm1, %v1145_v35, %v1147_v11  ;;  %v5389_v34 = vsel %vm1279_vm2, %v1274_v54, %v1276_v17  ;;  %v850_v40 = vadd.s32 32, %v4954_v56 }
 0x21f   : > { %7292 = vst [vmem:[#allocation60_spill] sm:$0xff] %v5377_v5  ;;  %7295 = vst [vmem:[#allocation61_spill] sm:$0xff] %v5389_v34  ;;  %v1148_v15 = vrot.slane %v5377_v5, 7  ;;  %v1277_v13 = vrot.slane %v5377_v5, 1  ;;  %v5395_v61 = vpop.f32.mrb[31].mxu1  ;;  %v7298_v34 = vrot.slane %v4956_v57, 7 }
 0x220   : > { %7296 = vst [vmem:[#allocation62_spill] sm:$0xff] %v5395_v61  ;;  %v1149_v4 = vrot.slane %v5395_v61, 7  ;;  %v1278_v54 = vrot.slane %v5395_v61, 1 }
 0x221   : > { %v1181_v29 = vsel %vm1150_vm1, %v1148_v15, %v7297_v48  ;;  %v5412_v43 = vsel %vm1150_vm1, %v1146_v16, %v1148_v15  ;;  %v5416_v35 = vsel %vm1279_vm2, %v1275_v3, %v1277_v13  ;;  %v4591_v48 = vld [vmem:[%s7077_s5 + $0x120] ss:$8 sps:$4 sm:$0xff]  }
 0x222   : > { %v3833_v0 = vpack.c.bf16 %v4980_v6, %v1181_v29  ;;  %v1182_v41 = vsel %vm1150_vm1, %v1149_v4, %v7298_v34  ;;  %v5432_v16 = vsel %vm1150_vm1, %v1147_v11, %v1149_v4  ;;  %v4393_v34 = vld [vmem:[%s7075_s3 + $0x100] ss:$8 sps:$4 sm:$0xff]   ;;  %v5444_v3 = vsel %vm1279_vm2, %v1276_v17, %v1278_v54  ;;  %v4398_v11 = vld [vmem:[%s7075_s3 + $0x114] ss:$8 sps:$4 sm:$0xff]   ;;  %v5930_v6 = vld [vmem:[%s7077_s5 + $0x290] ss:$8 sps:$4 sm:$0xff]  }
 0x223   : > { %v3829_v29 = vpack.c.bf16 %v4994_v10, %v1182_v41  ;;  %v7301_v4 = vrot.slane %v4956_v57, 1  ;;  %v7302_v41 = vrot.slane %v4952_v55, 1  ;;  %v894_v17 = vand.u32 31, %v850_v40  ;;  %v4401_v40 = vld [vmem:[%s7075_s3 + $0x124] ss:$8 sps:$4 sm:$0xff]  }
 0x225   : > { %v5453_v10 = vsel %vm1279_vm2, %v1278_v54, %v7301_v4  ;;  %v5459_v15 = vsel %vm1279_vm2, %v1277_v13, %v7302_v41  ;;  %3830 = vmatprep.mubr.msk.bf16.mxu0 %vm5426_vm5, %v3829_v29  ;;  %v7303_v54 = vpack.c.bf16 %v5052_v33, %v5022_v21  ;;  %v4396_v13 = vld [vmem:[%s7075_s3 + $0x110] ss:$8 sps:$4 sm:$0xff]   ;;  %vm4056_vm6 = vcmp.ne.s32.totalorder %v894_v17, 0  ;;  %v4404_v33 = vld [vmem:[%s7075_s3 + $0x134] ss:$8 sps:$4 sm:$0xff]  }
 0x226   : > { %3834 = vmatmul.mubr.msk.bf16.vlgmr.msra.gmra.mrb[16].mxu0 %vm5426_vm5, %v3833_v0  ;;  %v4399_v0 = vld [vmem:[%s7075_s3 + $0x120] ss:$8 sps:$4 sm:$0xff]   ;;  %vm5482_vm7 = vmpackc.low %vm4648_vm4, %vm4056_vm6  ;;  %v7306_v29 = vpack.c.bf16 %v5042_v30, %v5014_v18  ;;  %v4407_v4 = vld [vmem:[%s7075_s3 + $0x144] ss:$8 sps:$4 sm:$0xff]   ;;  %v854_v41 = vadd.s32 64, %v4954_v56  ;;  %v7309_v17 = vpack.c.bf16 %v5172_v53, %v5140_v47  ;;  %v7312_v53 = vpack.c.bf16 %v5162_v19, %v5130_v37 }
 0x227   : > { %2054 = vmatprep.mubr.bf16.mxu0 %v7303_v54  ;;  %2126 = vmatpush1.bf16.msra.mxu0 %v4393_v34  ;;  %v7307_v34 = vpack.c.bf16 %v5112_v12, %v5080_v45  ;;  %v4405_v18 = vld [vmem:[%s7075_s3 + $0x140] ss:$8 sps:$4 sm:$0xff]   ;;  %v4410_v30 = vld [vmem:[%s7075_s3 + $0x154] ss:$8 sps:$4 sm:$0xff]   ;;  %v7308_v12 = vpack.c.bf16 %v5102_v63, %v5070_v42  ;;  %v4408_v54 = vld [vmem:[%s7075_s3 + $0x150] ss:$8 sps:$4 sm:$0xff]  }
 0x228   : > { %2127 = vmatprep.subr.bf16.mxu0 %v4398_v11  ;;  %v4402_v11 = vld [vmem:[%s7075_s3 + $0x130] ss:$8 sps:$4 sm:$0xff]   ;;  %v922_v45 = vand.u32 31, %v854_v41  ;;  %v4411_v42 = vld [vmem:[%s7075_s3 + $0x160] ss:$8 sps:$4 sm:$0xff]   ;;  %v7319_v41 = vpack.c.bf16 %v5353_v46, %v5320_v22  ;;  %v7321_v46 = vpack.c.bf16 %v5432_v16, %v5385_v28  ;;  %v7323_v16 = vpack.c.bf16 %v4969_v1, %v4956_v57 }
 0x229   : > { %v4416_v63 = vld [vmem:[%s7075_s3 + $0x174] ss:$8 sps:$4 sm:$0xff]   ;;  %v4417_v19 = vld [vmem:[%s7075_s3 + $0x180] ss:$8 sps:$4 sm:$0xff]  }
 0x22a   : > { %vm4057_vm8 = vcmp.ne.s32.totalorder %v922_v45, 0  ;;  %v4434_v22 = vld [vmem:[%s7075_s3 + $0x1d4] ss:$8 sps:$4 sm:$0xff]   ;;  %v4432_v45 = vld [vmem:[%s7075_s3 + $0x1d0] ss:$8 sps:$4 sm:$0xff]  }
 0x22b   : > { %2128 = vmatpush1.bf16.msra.mxu0 %v4396_v13  ;;  %v4413_v13 = vld [vmem:[%s7075_s3 + $0x164] ss:$8 sps:$4 sm:$0xff]   ;;  %vm5528_vm9 = vmpackc.low %vm4648_vm4, %vm4057_vm8  ;;  %v4440_v28 = vld [vmem:[%s7075_s3 + $0x1f4] ss:$8 sps:$4 sm:$0xff]  }
 0x22c   : > { %2129 = vmatprep.subr.bf16.mxu0 %v4401_v40  ;;  %v7313_v40 = vpack.c.bf16 %v5232_v62, %v5200_v39  ;;  %v4422_v39 = vld [vmem:[%s7075_s3 + $0x194] ss:$8 sps:$4 sm:$0xff]   ;;  %v7314_v62 = vpack.c.bf16 %v5222_v59, %v5190_v49  ;;  %v4423_v59 = vld [vmem:[%s7075_s3 + $0x1a0] ss:$8 sps:$4 sm:$0xff]  }
 0x22d   : > { %v4428_v49 = vld [vmem:[%s7075_s3 + $0x1b4] ss:$8 sps:$4 sm:$0xff]   ;;  %v4603_v21 = vld [vmem:[%s7077_s5 + $0x160] ss:$8 sps:$4 sm:$0xff]  }
 0x22e   : > { %2055 = vmatmul.mubr.bf16.gmra.mrb[20].mxu0 %v7306_v29  ;;  %v858_v29 = vadd.s32 96, %v4954_v56  ;;  %v4615_v47 = vld [vmem:[%s7077_s5 + $0x1a0] ss:$8 sps:$4 sm:$0xff]  }
 0x22f   : > { %3838 = vmatprep.mubr.msk.bf16.mxu0 %vm5482_vm7, %v7307_v34  ;;  %2130 = vmatpush1.bf16.msra.mxu0 %v4399_v0  ;;  %v4414_v0 = vld [vmem:[%s7075_s3 + $0x170] ss:$8 sps:$4 sm:$0xff]   ;;  %v7315_v34 = vpack.c.bf16 %v5292_v58, %v5260_v52  ;;  %v7318_v58 = vpack.c.bf16 %v5282_v31, %v5250_v26  ;;  %v4429_v31 = vld [vmem:[%s7075_s3 + $0x1c0] ss:$8 sps:$4 sm:$0xff]   ;;  %v7320_v26 = vpack.c.bf16 %v5342_v36, %v5310_v2 }
 0x230   : > { %2131 = vmatprep.subr.bf16.mxu0 %v4404_v33  ;;  %v4419_v33 = vld [vmem:[%s7075_s3 + $0x184] ss:$8 sps:$4 sm:$0xff]   ;;  %v950_v37 = vand.u32 31, %v858_v29  ;;  %v4435_v36 = vld [vmem:[%s7075_s3 + $0x1e0] ss:$8 sps:$4 sm:$0xff]   ;;  %v7322_v2 = vpack.c.bf16 %v5412_v43, %v5371_v8  ;;  %v7327_v29 = vpack.c.bf16 %v5090_v50, %v5062_v38 }
 0x231   : > { %v4441_v8 = vld [vmem:[%s7075_s3 + $0x200] ss:$8 sps:$4 sm:$0xff]   ;;  %v4446_v43 = vld [vmem:[%s7075_s3 + $0x214] ss:$8 sps:$4 sm:$0xff]  }
 0x232   : > { %vm4058_vm10 = vcmp.ne.s32.totalorder %v950_v37, 0  ;;  %v4453_v37 = vld [vmem:[%s7075_s3 + $0x240] ss:$8 sps:$4 sm:$0xff]  }
 0x233   : > { %2132 = vmatpush1.bf16.msra.mxu0 %v4402_v11  ;;  %v4420_v11 = vld [vmem:[%s7075_s3 + $0x190] ss:$8 sps:$4 sm:$0xff]   ;;  %vm5574_vm11 = vmpackc.low %vm4648_vm4, %vm4058_vm10  ;;  %v4627_v52 = vld [vmem:[%s7077_s5 + $0x1e0] ss:$8 sps:$4 sm:$0xff]  }
 0x234   : > { %2133 = vmatprep.subr.bf16.mxu0 %v4407_v4  ;;  %v4425_v4 = vld [vmem:[%s7075_s3 + $0x1a4] ss:$8 sps:$4 sm:$0xff]  }
 0x236   : > { %3842 = vmatmul.mubr.msk.bf16.gmra.mrb[24].mxu0 %vm5482_vm7, %v7308_v12  ;;  %v4437_v12 = vld [vmem:[%s7075_s3 + $0x1e4] ss:$8 sps:$4 sm:$0xff]  }
 0x237   : > { %2074 = vmatprep.mubr.bf16.mxu0 %v7309_v17  ;;  %2134 = vmatpush1.bf16.msra.mxu0 %v4405_v18  ;;  %v4426_v18 = vld [vmem:[%s7075_s3 + $0x1b0] ss:$8 sps:$4 sm:$0xff]  }
 0x238   : > { %2135 = vmatprep.subr.bf16.mxu0 %v4410_v30  ;;  %v4431_v30 = vld [vmem:[%s7075_s3 + $0x1c4] ss:$8 sps:$4 sm:$0xff]   ;;  %v4438_v17 = vld [vmem:[%s7075_s3 + $0x1f0] ss:$8 sps:$4 sm:$0xff]  }
 0x23b   : > { %2136 = vmatpush1.bf16.msra.mxu0 %v4408_v54  ;;  %v4443_v54 = vld [vmem:[%s7075_s3 + $0x204] ss:$8 sps:$4 sm:$0xff]  }
 0x23c   : > { %2137 = vmatprep.subr.bf16.mxu0 %v4413_v13  ;;  %v7324_v13 = vpack.c.bf16 %v4960_v60, %v4952_v55 }
 0x23e   : > { %2075 = vmatmul.mubr.bf16.gmra.mrb[28].mxu0 %v7312_v53  ;;  %v4449_v53 = vld [vmem:[%s7075_s3 + $0x224] ss:$8 sps:$4 sm:$0xff]  }
 0x23f   : > { %3846 = vmatprep.mubr.msk.bf16.mxu0 %vm5528_vm9, %v7313_v40  ;;  %2138 = vmatpush1.bf16.msra.mxu0 %v4411_v42  ;;  %v7325_v42 = vpack.c.bf16 %v5030_v7, %v5004_v14  ;;  %v4447_v40 = vld [vmem:[%s7075_s3 + $0x220] ss:$8 sps:$4 sm:$0xff]  }
 0x240   : > { %2139 = vmatprep.subr.bf16.mxu0 %v4416_v63  ;;  %v4444_v63 = vld [vmem:[%s7075_s3 + $0x210] ss:$8 sps:$4 sm:$0xff]  }
 0x243   : > { %2140 = vmatpush1.bf16.msra.mxu0 %v4414_v0  ;;  %v4452_v0 = vld [vmem:[%s7075_s3 + $0x234] ss:$8 sps:$4 sm:$0xff]  }
 0x244   : > { %2141 = vmatprep.subr.bf16.mxu0 %v4419_v33  ;;  %v7326_v33 = vpack.c.bf16 %v5018_v20, %v4988_v9 }
 0x246   : > { %3850 = vmatmul.mubr.msk.bf16.gmra.mrb[32].mxu0 %vm5528_vm9, %v7314_v62  ;;  %v4458_v62 = vld [vmem:[%s7075_s3 + $0x254] ss:$8 sps:$4 sm:$0xff]  }
 0x247   : > { %2094 = vmatprep.mubr.bf16.mxu0 %v7315_v34  ;;  %2142 = vmatpush1.bf16.msra.mxu0 %v4417_v19  ;;  %v4450_v19 = vld [vmem:[%s7075_s3 + $0x230] ss:$8 sps:$4 sm:$0xff]   ;;  %v7328_v34 = vpack.c.bf16 %v5076_v44, %v5048_v32 }
 0x248   : > { %2143 = vmatprep.subr.bf16.mxu0 %v4422_v39  ;;  %v4455_v39 = vld [vmem:[%s7075_s3 + $0x244] ss:$8 sps:$4 sm:$0xff]  }
 0x24b   : > { %2144 = vmatpush1.bf16.msra.mxu0 %v4420_v11  ;;  %v7329_v11 = vpack.c.bf16 %v5150_v51, %v5122_v24 }
 0x24c   : > { %2145 = vmatprep.subr.bf16.mxu0 %v4425_v4  ;;  %v4456_v4 = vld [vmem:[%s7075_s3 + $0x250] ss:$8 sps:$4 sm:$0xff]  }
 0x24e   : > { %2095 = vmatmul.mubr.bf16.gmra.mrb[36].mxu0 %v7318_v58  ;;  %v4464_v58 = vld [vmem:[%s7075_s3 + $0x274] ss:$8 sps:$4 sm:$0xff]  }
 0x24f   : > { %3854 = vmatprep.mubr.msk.bf16.mxu0 %vm5574_vm11, %v7319_v41  ;;  %2146 = vmatpush1.bf16.msra.mxu0 %v4423_v59  ;;  %v4461_v59 = vld [vmem:[%s7075_s3 + $0x264] ss:$8 sps:$4 sm:$0xff]  }
 0x250   : > { %2147 = vmatprep.subr.bf16.mxu0 %v4428_v49  ;;  %v4459_v49 = vld [vmem:[%s7075_s3 + $0x260] ss:$8 sps:$4 sm:$0xff]  }
 0x251   : > { %v7330_v41 = vld [vmem:[#allocation28_spill] sm:$0xff] }
 0x253   : > { %2148 = vmatpush1.bf16.msra.mxu0 %v4426_v18  ;;  %v7331_v18 = vld [vmem:[#allocation24_spill] sm:$0xff] }
 0x254   : > { %2149 = vmatprep.subr.bf16.mxu0 %v4431_v30  ;;  %v7332_v30 = vpack.c.bf16 %v7330_v41, %v7331_v18 }
 0x256   : > { %3858 = vmatmul.mubr.msk.bf16.gmra.mrb[40].mxu0 %vm5574_vm11, %v7320_v26 }
 0x257   : > { %2114 = vmatprep.mubr.bf16.mxu0 %v7321_v46  ;;  %2150 = vmatpush1.bf16.msra.mxu0 %v4429_v31  ;;  %v7333_v31 = vld [vmem:[#allocation38_spill] sm:$0xff] }
 0x258   : > { %2151 = vmatprep.subr.bf16.mxu0 %v4434_v22  ;;  %v7334_v22 = vld [vmem:[#allocation34_spill] sm:$0xff] }
 0x259   : > { %v7335_v26 = vpack.c.bf16 %v7333_v31, %v7334_v22  ;;  %v4462_v46 = vld [vmem:[%s7075_s3 + $0x270] ss:$8 sps:$4 sm:$0xff]  }
 0x25b   : > { %2152 = vmatpush1.bf16.msra.mxu0 %v4432_v45  ;;  %v4467_v45 = vld [vmem:[%s7075_s3 + $0x284] ss:$8 sps:$4 sm:$0xff]  }
 0x25c   : > { %2153 = vmatprep.subr.bf16.mxu0 %v4437_v12  ;;  %v4465_v12 = vld [vmem:[%s7075_s3 + $0x280] ss:$8 sps:$4 sm:$0xff]  }
 0x25e   : > { %2115 = vmatmul.mubr.bf16.gmra.mrb[44].mxu0 %v7322_v2  ;;  %v7337_v2 = vld [vmem:[#allocation32_spill] sm:$0xff] }
 0x25f   : > { %2154 = vmatpush1.bf16.msra.mxu0 %v4435_v36  ;;  %2157 = vmatprep.mubr.bf16.mxu0 %v7323_v16  ;;  %v4470_v36 = vld [vmem:[%s7075_s3 + $0x294] ss:$8 sps:$4 sm:$0xff]  }
 0x260   : > { %2155 = vmatprep.subr.bf16.mxu0 %v4440_v28  ;;  %v7336_v28 = vld [vmem:[#allocation36_spill] sm:$0xff] }
 0x261   : > { %v7338_v16 = vpack.c.bf16 %v7336_v28, %v7337_v2 }
 0x263   : > { %2156 = vmatpush1.bf16.msra.mxu0 %v4438_v17  ;;  %v7339_v17 = vld [vmem:[#allocation46_spill] sm:$0xff] }
 0x264   : > { %2238 = vmatprep.subr.bf16.mxu0 %v4443_v54  ;;  %v7340_v54 = vld [vmem:[#allocation42_spill] sm:$0xff] }
 0x266   : > { %2158 = vmatmul.mubr.bf16.vlgmr.msra.gmra.mrb[16].mxu0 %v7324_v13  ;;  %v4473_v13 = vld [vmem:[%s7075_s3 + $0x2a4] ss:$8 sps:$4 sm:$0xff]  }
 0x267   : > { %2167 = vmatprep.mubr.bf16.mxu0 %v7325_v42  ;;  %2239 = vmatpush1.bf16.msra.mxu0 %v4441_v8  ;;  %v7341_v8 = vpack.c.bf16 %v7339_v17, %v7340_v54  ;;  %v4471_v42 = vld [vmem:[%s7075_s3 + $0x2a0] ss:$8 sps:$4 sm:$0xff]   ;;  %v4552_v17 = vld [vmem:[%s7077_s5 + $0x50] ss:$8 sps:$4 sm:$0xff]  }
 0x268   : > { %2240 = vmatprep.subr.bf16.mxu0 %v4446_v43  ;;  %v4468_v43 = vld [vmem:[%s7075_s3 + $0x290] ss:$8 sps:$4 sm:$0xff]  }
 0x26b   : > { %2241 = vmatpush1.bf16.msra.mxu0 %v4444_v63  ;;  %v4476_v63 = vld [vmem:[%s7075_s3 + $0x2b4] ss:$8 sps:$4 sm:$0xff]  }
 0x26c   : > { %2242 = vmatprep.subr.bf16.mxu0 %v4449_v53  ;;  %v7342_v53 = vld [vmem:[#allocation44_spill] sm:$0xff] }
 0x26e   : > { %2168 = vmatmul.mubr.bf16.gmra.mrb[20].mxu0 %v7326_v33  ;;  %v7345_v33 = vld [vmem:[#allocation54_spill] sm:$0xff] }
 0x26f   : > { %2177 = vmatprep.mubr.bf16.mxu0 %v7327_v29  ;;  %2243 = vmatpush1.bf16.msra.mxu0 %v4447_v40  ;;  %v7343_v40 = vld [vmem:[#allocation40_spill] sm:$0xff]  ;;  %v7346_v29 = vld [vmem:[#allocation50_spill] sm:$0xff] }
 0x270   : > { %2244 = vmatprep.subr.bf16.mxu0 %v4452_v0  ;;  %v7344_v0 = vpack.c.bf16 %v7342_v53, %v7343_v40 }
 0x273   : > { %2245 = vmatpush1.bf16.msra.mxu0 %v4450_v19  ;;  %v7347_v19 = vpack.c.bf16 %v7345_v33, %v7346_v29  ;;  %v7417_v33 = vmov 0 }
 0x274   : > { %2246 = vmatprep.subr.bf16.mxu0 %v4455_v39  ;;  %v4474_v39 = vld [vmem:[%s7075_s3 + $0x2b0] ss:$8 sps:$4 sm:$0xff]  }
 0x276   : > { %2178 = vmatmul.mubr.bf16.gmra.mrb[24].mxu0 %v7328_v34  ;;  %v4482_v34 = vld [vmem:[%s7075_s3 + $0x2d4] ss:$8 sps:$4 sm:$0xff]  }
 0x277   : > { %2187 = vmatprep.mubr.bf16.mxu0 %v7329_v11  ;;  %2247 = vmatpush1.bf16.msra.mxu0 %v4453_v37  ;;  %v4479_v37 = vld [vmem:[%s7075_s3 + $0x2c4] ss:$8 sps:$4 sm:$0xff]  }
 0x278   : > { %2248 = vmatprep.subr.bf16.mxu0 %v4458_v62  ;;  %v4477_v62 = vld [vmem:[%s7075_s3 + $0x2c0] ss:$8 sps:$4 sm:$0xff]  }
 0x279   : > { %v7348_v11 = vld [vmem:[#allocation52_spill] sm:$0xff] }
 0x27b   : > { %2249 = vmatpush1.bf16.msra.mxu0 %v4456_v4  ;;  %v7349_v4 = vld [vmem:[#allocation48_spill] sm:$0xff] }
 0x27c   : > { %2250 = vmatprep.subr.bf16.mxu0 %v4461_v59  ;;  %v7350_v59 = vpack.c.bf16 %v7348_v11, %v7349_v4  ;;  %v7420_v11 = vld [vmem:[#allocation59_spill] sm:$0xff]  ;;  %v4554_v4 = vld [vmem:[%s7077_s5 + $0x54] ss:$8 sps:$4 sm:$0xff]  }
 0x27e   : > { %2188 = vmatmul.mubr.bf16.gmra.mrb[28].mxu0 %v7332_v30  ;;  %v4485_v30 = vld [vmem:[%s7075_s3 + $0x2e4] ss:$8 sps:$4 sm:$0xff]  }
 0x27f   : > { %2197 = vmatprep.mubr.bf16.mxu0 %v7335_v26  ;;  %2251 = vmatpush1.bf16.msra.mxu0 %v4459_v49  ;;  %v7351_v49 = vpack.c.bf16 %v5395_v61, %v5363_v25  ;;  %v849_v26 = vadd.s32 24, %v4954_v56  ;;  %v7415_v25 = vld [vmem:[#allocation57_spill] sm:$0xff] }
 0x280   : > { %2252 = vmatprep.subr.bf16.mxu0 %v4464_v58  ;;  %v4480_v58 = vld [vmem:[%s7075_s3 + $0x2d0] ss:$8 sps:$4 sm:$0xff]  }
 0x283   : > { %2253 = vmatpush1.bf16.msra.mxu0 %v4462_v46  ;;  %v4483_v46 = vld [vmem:[%s7075_s3 + $0x2e0] ss:$8 sps:$4 sm:$0xff]  }
 0x284   : > { %2254 = vmatprep.subr.bf16.mxu0 %v4467_v45  ;;  %v4488_v45 = vld [vmem:[%s7075_s3 + $0x2f4] ss:$8 sps:$4 sm:$0xff]  }
 0x286   : > { %2198 = vmatmul.mubr.bf16.gmra.mrb[32].mxu0 %v7338_v16  ;;  %v7353_v16 = vld [vmem:[#allocation13_spill] sm:$0xff] }
 0x287   : > { %2207 = vmatprep.mubr.bf16.mxu0 %v7341_v8  ;;  %2255 = vmatpush1.bf16.msra.mxu0 %v4465_v12  ;;  %v887_v12 = vand.u32 31, %v849_v26  ;;  %v7354_v8 = vld [vmem:[#allocation9_spill] sm:$0xff]  ;;  %v853_v26 = vadd.s32 56, %v4954_v56 }
 0x288   : > { %2256 = vmatprep.subr.bf16.mxu0 %v4470_v36  ;;  %v7352_v36 = vpack.c.bf16 %v5377_v5, %v5348_v27  ;;  %v7414_v5 = vld [vmem:[#allocation61_spill] sm:$0xff] }
 0x289   : > { %vm4059_vm12 = vcmp.ne.s32.totalorder %v887_v12, 31  ;;  %v915_v12 = vand.u32 31, %v853_v26  ;;  %v7416_v27 = vpack.c.bf16 %v7414_v5, %v7415_v25  ;;  %v5976_v5 = vld [vmem:[%s7077_s5 + $0x2b4] ss:$8 sps:$4 sm:$0xff]   ;;  %v5981_v25 = vld [vmem:[%s7077_s5 + $0x2b0] ss:$8 sps:$4 sm:$0xff]  }
 0x28a   : > { %vm5782_vm13 = vmpackc.low %vm4059_vm12, %vm4648_vm4 }
 0x28b   : > { %2257 = vmatpush1.bf16.msra.mxu0 %v4468_v43  ;;  %v7355_v43 = vpack.c.bf16 %v7353_v16, %v7354_v8  ;;  %v7367_v16 = vld [vmem:[#allocation15_spill] sm:$0xff]  ;;  %vm4060_vm14 = vcmp.ne.s32.totalorder %v915_v12, 31 }
 0x28c   : > { %2258 = vmatprep.subr.bf16.mxu0 %v4473_v13  ;;  %v4486_v13 = vld [vmem:[%s7075_s3 + $0x2f0] ss:$8 sps:$4 sm:$0xff]   ;;  %vm5838_vm15 = vmpackc.low %vm4060_vm14, %vm4648_vm4  ;;  %v5866_v12 = vld [vmem:[%s7077_s5 + $0x264] ss:$8 sps:$4 sm:$0xff]  }
 0x28e   : > { %2208 = vmatmul.mubr.bf16.gmra.mrb[36].mxu0 %v7344_v0  ;;  %v7356_v0 = vmov 0 }
 0x28f   : > { %2217 = vmatprep.mubr.bf16.mxu0 %v7347_v19  ;;  %2259 = vmatpush1.bf16.msra.mxu0 %v4471_v42  ;;  %v4491_v42 = vld [vmem:[%s7077_s5 + $0x204] ss:$8 sps:$4 sm:$0xff]   ;;  %v7357_v0 = vsel %vm5782_vm13, 4294967295, %v7356_v0  ;;  %v4494_v19 = vld [vmem:[%s7077_s5 + $0x214] ss:$8 sps:$4 sm:$0xff]  }
 0x290   : > { %2260 = vmatprep.subr.bf16.mxu0 %v4476_v63  ;;  %v4489_v63 = vld [vmem:[%s7077_s5 + $0x200] ss:$8 sps:$4 sm:$0xff]   ;;  %7358 = vst [vmem:[#allocation13_spill] sm:$0xff] %v7357_v0 }
 0x293   : > { %2261 = vmatpush1.bf16.msra.mxu0 %v4474_v39  ;;  %v7359_v39 = vld [vmem:[#allocation11_spill] sm:$0xff] }
 0x294   : > { %2262 = vmatprep.subr.bf16.mxu0 %v4479_v37  ;;  %v7360_v37 = vld [vmem:[#allocation7_spill] sm:$0xff] }
 0x296   : > { %2218 = vmatmul.mubr.bf16.gmra.mrb[40].mxu0 %v7350_v59  ;;  %v7363_v59 = vld [vmem:[#allocation17_spill] sm:$0xff] }
 0x297   : > { %2227 = vmatprep.mubr.bf16.mxu0 %v7351_v49  ;;  %2263 = vmatpush1.bf16.msra.mxu0 %v4477_v62  ;;  %v7361_v62 = vpack.c.bf16 %v7359_v39, %v7360_v37  ;;  %v5835_v39 = vld [vmem:[%s7077_s5 + $0x240] ss:$8 sps:$4 sm:$0xff]   ;;  %v7375_v37 = vmov 0 }
 0x298   : > { %2264 = vmatprep.subr.bf16.mxu0 %v4482_v34  ;;  %v7362_v34 = vld [vmem:[#allocation21_spill] sm:$0xff]  ;;  %v7376_v37 = vsel %vm5838_vm15, 4294967295, %v7375_v37 }
 0x299   : > { %v7364_v49 = vpack.c.bf16 %v7362_v34, %v7363_v59  ;;  %7374 = vst [vmem:[#allocation21_spill] sm:$0xff] %v5835_v39  ;;  %7377 = vst [vmem:[#allocation17_spill] sm:$0xff] %v7376_v37  ;;  %v7379_v34 = vld [vmem:[#allocation27_spill] sm:$0xff] }
 0x29a   : > { %v7380_v59 = vld [vmem:[#allocation23_spill] sm:$0xff] }
 0x29b   : > { %2265 = vmatpush1.bf16.msra.mxu0 %v4480_v58  ;;  %v4492_v58 = vld [vmem:[%s7077_s5 + $0x210] ss:$8 sps:$4 sm:$0xff]  }
 0x29c   : > { %2266 = vmatprep.subr.bf16.mxu0 %v4485_v30  ;;  %v4497_v30 = vld [vmem:[%s7077_s5 + $0x224] ss:$8 sps:$4 sm:$0xff]  }
 0x29e   : > { %2228 = vmatmul.mubr.bf16.gmra.mrb[44].mxu0 %v7352_v36  ;;  %v7366_v36 = vld [vmem:[#allocation19_spill] sm:$0xff] }
 0x29f   : > { %2267 = vmatpush1.bf16.msra.mxu0 %v4483_v46  ;;  %2270 = vmatprep.mubr.bf16.mxu0 %v7355_v43  ;;  %v4495_v46 = vld [vmem:[%s7077_s5 + $0x220] ss:$8 sps:$4 sm:$0xff]   ;;  %v7368_v8 = vpack.c.bf16 %v7366_v36, %v7367_v16  ;;  %v7369_v43 = vld [vmem:[#allocation29_spill] sm:$0xff]  ;;  %v857_v36 = vadd.s32 88, %v4954_v56 }
 0x2a0   : > { %2268 = vmatprep.subr.bf16.mxu0 %v4488_v45  ;;  %v5810_v45 = vld [vmem:[%s7077_s5 + $0x234] ss:$8 sps:$4 sm:$0xff]   ;;  %7386 = vst [vmem:[#allocation29_spill] sm:$0xff] %v5866_v12  ;;  %v5873_v16 = vld [vmem:[%s7077_s5 + $0x260] ss:$8 sps:$4 sm:$0xff]  }
 0x2a1   : > { %7365 = vst [vmem:[#allocation9_spill] sm:$0xff] %v5810_v45 }
 0x2a3   : > { %2269 = vmatpush1.bf16.msra.mxu0 %v4486_v13  ;;  %v7370_v13 = vld [vmem:[#allocation25_spill] sm:$0xff] }
 0x2a4   : > { %3437 = vmatprep.subr.bf16.mxu0 %v4491_v42  ;;  %v7371_v42 = vpack.c.bf16 %v7369_v43, %v7370_v13  ;;  %7387 = vst [vmem:[#allocation25_spill] sm:$0xff] %v5873_v16  ;;  %v943_v43 = vand.u32 31, %v857_v36  ;;  %v7389_v13 = vld [vmem:[#allocation35_spill] sm:$0xff] }
 0x2a5   : > { %v5905_v36 = vld [vmem:[%s7077_s5 + $0x280] ss:$8 sps:$4 sm:$0xff]  }
 0x2a6   : > { %2271 = vmatmul.mubr.bf16.vlgmr.msra.gmra.mrb[16].mxu0 %v7361_v62  ;;  %v5846_v62 = vld [vmem:[%s7077_s5 + $0x254] ss:$8 sps:$4 sm:$0xff]   ;;  %vm4061_vm0 = vcmp.ne.s32.totalorder %v943_v43, 31  ;;  %v7402_v43 = vld [vmem:[#allocation43_spill] sm:$0xff] }
 0x2a7   : > { %3862 = vmatprep.mubr.msk.bf16.mxu0 %vm5782_vm13, %v7364_v49  ;;  %3438 = vmatpush1.bf16.msra.mxu0 %v4489_v63  ;;  %v5823_v63 = vld [vmem:[%s7077_s5 + $0x230] ss:$8 sps:$4 sm:$0xff]   ;;  %7378 = vst [vmem:[#allocation19_spill] sm:$0xff] %v5846_v62  ;;  %v7381_v49 = vpack.c.bf16 %v7379_v34, %v7380_v59  ;;  %vm5908_vm3 = vmpackc.low %vm4061_vm0, %vm4648_vm4 }
 0x2a8   : > { %3439 = vmatprep.subr.bf16.mxu0 %v4494_v19  ;;  %7372 = vst [vmem:[#allocation11_spill] sm:$0xff] %v5823_v63  ;;  %v5829_v19 = vld [vmem:[%s7077_s5 + $0x244] ss:$8 sps:$4 sm:$0xff]   ;;  %v7392_v59 = vld [vmem:[#allocation45_spill] sm:$0xff] }
 0x2a9   : > { %7373 = vst [vmem:[#allocation7_spill] sm:$0xff] %v5829_v19  ;;  %7408 = vst [vmem:[#allocation45_spill] sm:$0xff] %v5930_v6 }
 0x2ab   : > { %3440 = vmatpush1.bf16.msra.mxu0 %v4492_v58  ;;  %v7382_v58 = vld [vmem:[#allocation37_spill] sm:$0xff] }
 0x2ac   : > { %3441 = vmatprep.subr.bf16.mxu0 %v4497_v30  ;;  %v7383_v30 = vld [vmem:[#allocation33_spill] sm:$0xff] }
 0x2ad   : > { %v7384_v26 = vpack.c.bf16 %v7382_v58, %v7383_v30  ;;  %v5893_v30 = vld [vmem:[%s7077_s5 + $0x270] ss:$8 sps:$4 sm:$0xff]   ;;  %7397 = vst [vmem:[#allocation33_spill] sm:$0xff] %v5905_v36 }
 0x2ae   : > { %3866 = vmatmul.mubr.msk.bf16.gmra.mrb[20].mxu0 %vm5782_vm13, %v7368_v8  ;;  %v5879_v8 = vld [vmem:[%s7077_s5 + $0x274] ss:$8 sps:$4 sm:$0xff]   ;;  %7395 = vst [vmem:[#allocation23_spill] sm:$0xff] %v5893_v30 }
 0x2af   : > { %2290 = vmatprep.mubr.bf16.mxu0 %v7371_v42  ;;  %3442 = vmatpush1.bf16.msra.mxu0 %v4495_v46  ;;  %v5860_v46 = vld [vmem:[%s7077_s5 + $0x250] ss:$8 sps:$4 sm:$0xff]   ;;  %7388 = vst [vmem:[#allocation27_spill] sm:$0xff] %v5879_v8  ;;  %v7390_v42 = vld [vmem:[#allocation31_spill] sm:$0xff] }
 0x2b0   : > { %3443 = vmatprep.subr.bf16.mxu0 %v5810_v45  ;;  %7385 = vst [vmem:[#allocation15_spill] sm:$0xff] %v5860_v46  ;;  %v7391_v34 = vpack.c.bf16 %v7389_v13, %v7390_v42  ;;  %v7398_v13 = vmov 0  ;;  %v5916_v42 = vld [vmem:[%s7077_s5 + $0x294] ss:$8 sps:$4 sm:$0xff]  }
 0x2b1   : > { %v7399_v13 = vsel %vm5908_vm3, 4294967295, %v7398_v13  ;;  %7401 = vst [vmem:[#allocation31_spill] sm:$0xff] %v5916_v42 }
 0x2b2   : > { %7400 = vst [vmem:[#allocation35_spill] sm:$0xff] %v7399_v13 }
 0x2b3   : > { %3444 = vmatpush1.bf16.msra.mxu0 %v5823_v63 }
 0x2b4   : > { %3445 = vmatprep.subr.bf16.mxu0 %v5829_v19 }
 0x2b6   : > { %2291 = vmatmul.mubr.bf16.gmra.mrb[24].mxu0 %v7381_v49  ;;  %v7393_v49 = vld [vmem:[#allocation41_spill] sm:$0xff] }
 0x2b7   : > { %3870 = vmatprep.mubr.msk.bf16.mxu0 %vm5838_vm15, %v7384_v26  ;;  %3446 = vmatpush1.bf16.msra.mxu0 %v5835_v39  ;;  %v7394_v58 = vpack.c.bf16 %v7392_v59, %v7393_v49  ;;  %v5899_v26 = vld [vmem:[%s7077_s5 + $0x284] ss:$8 sps:$4 sm:$0xff]   ;;  %v7405_v49 = vld [vmem:[#allocation53_spill] sm:$0xff] }
 0x2b8   : > { %3447 = vmatprep.subr.bf16.mxu0 %v5846_v62  ;;  %7396 = vst [vmem:[#allocation37_spill] sm:$0xff] %v5899_v26  ;;  %7425 = vst [vmem:[#allocation53_spill] sm:$0xff] %v5976_v5 }
 0x2bb   : > { %3448 = vmatpush1.bf16.msra.mxu0 %v5860_v46 }
 0x2bc   : > { %3449 = vmatprep.subr.bf16.mxu0 %v5866_v12 }
 0x2be   : > { %3874 = vmatmul.mubr.msk.bf16.gmra.mrb[28].mxu0 %vm5838_vm15, %v7391_v34  ;;  %v7403_v34 = vld [vmem:[#allocation39_spill] sm:$0xff] }
 0x2bf   : > { %2310 = vmatprep.mubr.bf16.mxu0 %v7394_v58  ;;  %3450 = vmatpush1.bf16.msra.mxu0 %v5873_v16  ;;  %v7404_v59 = vpack.c.bf16 %v7402_v43, %v7403_v34  ;;  %v7406_v58 = vld [vmem:[#allocation49_spill] sm:$0xff]  ;;  %v5936_v43 = vld [vmem:[%s7077_s5 + $0x2a4] ss:$8 sps:$4 sm:$0xff]   ;;  %v861_v34 = vadd.s32 120, %v4954_v56 }
 0x2c0   : > { %3451 = vmatprep.subr.bf16.mxu0 %v5879_v8  ;;  %v7407_v23 = vpack.c.bf16 %v7405_v49, %v7406_v58  ;;  %7409 = vst [vmem:[#allocation41_spill] sm:$0xff] %v5936_v43  ;;  %v7411_v49 = vld [vmem:[#allocation51_spill] sm:$0xff]  ;;  %7426 = vst [vmem:[#allocation49_spill] sm:$0xff] %v5981_v25 }
 0x2c1   : > { %v7412_v58 = vld [vmem:[#allocation47_spill] sm:$0xff] }
 0x2c2   : > { %v7413_v61 = vpack.c.bf16 %v7411_v49, %v7412_v58  ;;  %v7423_v49 = vpack.c.bf16 %v5453_v10, %v5444_v3  ;;  %v4530_v3 = vld [vmem:[%s7077_s5 + $0x4] ss:$8 sps:$4 sm:$0xff]   ;;  %v4528_v10 = vld [vmem:[%s7077_s5] ss:$8 sps:$4 sm:$0xff]  }
 0x2c3   : > { %3452 = vmatpush1.bf16.msra.mxu0 %v5893_v30  ;;  %3211 = vmatprep.subr.bf16.mxu1 %v4530_v3  ;;  %v6024_v58 = vld [vmem:[%s7077_s5 + $0x2e4] ss:$8 sps:$4 sm:$0xff]   ;;  %v6042_v3 = vld [vmem:[%s7077_s5 + $0x2f4] ss:$8 sps:$4 sm:$0xff]  }
 0x2c4   : > { %3453 = vmatprep.subr.bf16.mxu0 %v5899_v26  ;;  %3212 = vmatpush1.bf16.msra.mxu1 %v4528_v10  ;;  %7431 = vst [vmem:[#allocation59_spill] sm:$0xff] %v6024_v58  ;;  %7433 = vst [vmem:[#allocation63_spill] sm:$0xff] %v6042_v3  ;;  %v6047_v10 = vld [vmem:[%s7077_s5 + $0x2f0] ss:$8 sps:$4 sm:$0xff]  }
 0x2c5   : > { %7434 = vst [vmem:[#allocation64_spill] sm:$0xff] %v6047_v10 }
 0x2c6   : > { %2311 = vmatmul.mubr.bf16.gmra.mrb[32].mxu0 %v7404_v59  ;;  %v971_v59 = vand.u32 31, %v861_v34  ;;  %v7421_v34 = vld [vmem:[#allocation55_spill] sm:$0xff] }
 0x2c7   : > { %3878 = vmatprep.mubr.msk.bf16.mxu0 %vm5908_vm3, %v7407_v23  ;;  %3454 = vmatpush1.bf16.msra.mxu0 %v5905_v36  ;;  %v5943_v23 = vld [vmem:[%s7077_s5 + $0x2a0] ss:$8 sps:$4 sm:$0xff]   ;;  %v7422_v29 = vpack.c.bf16 %v7420_v11, %v7421_v34  ;;  %v4536_v11 = vld [vmem:[%s7077_s5 + $0x14] ss:$8 sps:$4 sm:$0xff]  }
 0x2c8   : > { %3455 = vmatprep.subr.bf16.mxu0 %v5916_v42  ;;  %7410 = vst [vmem:[#allocation43_spill] sm:$0xff] %v5943_v23  ;;  %vm4062_vm6 = vcmp.ne.s32.totalorder %v971_v59, 31  ;;  %v4534_v59 = vld [vmem:[%s7077_s5 + $0x10] ss:$8 sps:$4 sm:$0xff]   ;;  %3213 = vmatprep.subr.bf16.mxu1 %v4536_v11  ;;  %v6029_v34 = vld [vmem:[%s7077_s5 + $0x2e0] ss:$8 sps:$4 sm:$0xff]  }
 0x2c9   : > { %vm5956_vm8 = vmpackc.low %vm4062_vm6, %vm4648_vm4  ;;  %3214 = vmatpush1.bf16.msra.mxu1 %v4534_v59  ;;  %7432 = vst [vmem:[#allocation55_spill] sm:$0xff] %v6029_v34  ;;  %v4548_v11 = vld [vmem:[%s7077_s5 + $0x34] ss:$8 sps:$4 sm:$0xff]   ;;  %v4546_v59 = vld [vmem:[%s7077_s5 + $0x30] ss:$8 sps:$4 sm:$0xff]  }
 0x2ca   : > { %v7418_v33 = vsel %vm5956_vm8, 4294967295, %v7417_v33 }
 0x2cb   : > { %3456 = vmatpush1.bf16.msra.mxu0 %v5930_v6  ;;  %7419 = vst [vmem:[#allocation39_spill] sm:$0xff] %v7418_v33 }
 0x2cc   : > { %3457 = vmatprep.subr.bf16.mxu0 %v5936_v43 }
 0x2ce   : > { %3882 = vmatmul.mubr.msk.bf16.gmra.mrb[36].mxu0 %vm5908_vm3, %v7413_v61  ;;  %v7424_v61 = vpack.c.bf16 %v5459_v15, %v5416_v35  ;;  %v5993_v35 = vld [vmem:[%s7077_s5 + $0x2c0] ss:$8 sps:$4 sm:$0xff]   ;;  %v6006_v15 = vld [vmem:[%s7077_s5 + $0x2d4] ss:$8 sps:$4 sm:$0xff]  }
 0x2cf   : > { %2330 = vmatprep.mubr.bf16.mxu0 %v7416_v27  ;;  %3458 = vmatpush1.bf16.msra.mxu0 %v5943_v23  ;;  %v5988_v27 = vld [vmem:[%s7077_s5 + $0x2c4] ss:$8 sps:$4 sm:$0xff]   ;;  %7428 = vst [vmem:[#allocation47_spill] sm:$0xff] %v5993_v35  ;;  %7429 = vst [vmem:[#allocation61_spill] sm:$0xff] %v6006_v15 }
 0x2d0   : > { %3459 = vmatprep.subr.bf16.mxu0 %v5976_v5  ;;  %7427 = vst [vmem:[#allocation51_spill] sm:$0xff] %v5988_v27 }
 0x2d3   : > { %3460 = vmatpush1.bf16.msra.mxu0 %v5981_v25 }
 0x2d4   : > { %3461 = vmatprep.subr.bf16.mxu0 %v5988_v27 }
 0x2d6   : > { %2331 = vmatmul.mubr.bf16.gmra.mrb[40].mxu0 %v7422_v29  ;;  %v6011_v29 = vld [vmem:[%s7077_s5 + $0x2d0] ss:$8 sps:$4 sm:$0xff]  }
 0x2d7   : > { %3886 = vmatprep.mubr.msk.bf16.mxu0 %vm5956_vm8, %v7423_v49  ;;  %3462 = vmatpush1.bf16.msra.mxu0 %v5993_v35  ;;  %7430 = vst [vmem:[#allocation57_spill] sm:$0xff] %v6011_v29  ;;  %v4542_v49 = vld [vmem:[%s7077_s5 + $0x24] ss:$8 sps:$4 sm:$0xff]  }
 0x2d8   : > { %3463 = vmatprep.subr.bf16.mxu0 %v6006_v15  ;;  %3215 = vmatprep.subr.bf16.mxu1 %v4542_v49  ;;  %v4551_v49 = vld [vmem:[%s7077_s5 + $0x44] ss:$8 sps:$4 sm:$0xff]  }
 0x2db   : > { %3464 = vmatpush1.bf16.msra.mxu0 %v6011_v29 }
 0x2dc   : > { %3465 = vmatprep.subr.bf16.mxu0 %v6024_v58 }
 0x2de   : > { %3890 = vmatmul.mubr.msk.bf16.gmra.mrb[44].mxu0 %vm5956_vm8, %v7424_v61  ;;  %v4540_v61 = vld [vmem:[%s7077_s5 + $0x20] ss:$8 sps:$4 sm:$0xff]  }
 0x2df   : > { %3466 = vmatpush1.bf16.msra.mxu0 %v6029_v34  ;;  %3216 = vmatpush1.bf16.msra.mxu1 %v4540_v61  ;;  %v4549_v61 = vld [vmem:[%s7077_s5 + $0x40] ss:$8 sps:$4 sm:$0xff]  }
 0x2e0   : > { %3467 = vmatprep.subr.bf16.mxu0 %v6042_v3  ;;  %3217 = vmatprep.subr.bf16.mxu1 %v4548_v11  ;;  %v4557_v11 = vld [vmem:[%s7077_s5 + $0x64] ss:$8 sps:$4 sm:$0xff]  }
 0x2e3   : > { %3468 = vmatpush1.bf16.msra.mxu0 %v6047_v10  ;;  %3218 = vmatpush1.bf16.msra.mxu1 %v4546_v59  ;;  %v4555_v59 = vld [vmem:[%s7077_s5 + $0x60] ss:$8 sps:$4 sm:$0xff]  }
 0x2e4   : > { %3219 = vmatprep.subr.bf16.mxu1 %v4551_v49  ;;  %v4560_v49 = vld [vmem:[%s7077_s5 + $0x74] ss:$8 sps:$4 sm:$0xff]  }
 0x2e7   : > { %3220 = vmatpush1.bf16.msra.mxu1 %v4549_v61  ;;  %v4558_v61 = vld [vmem:[%s7077_s5 + $0x70] ss:$8 sps:$4 sm:$0xff]  }
 0x2e8   : > { %3221 = vmatprep.subr.bf16.mxu1 %v4554_v4  ;;  %v4561_v4 = vld [vmem:[%s7077_s5 + $0x80] ss:$8 sps:$4 sm:$0xff]  }
 0x2eb   : > { %3222 = vmatpush1.bf16.msra.mxu1 %v4552_v17  ;;  %v4563_v17 = vld [vmem:[%s7077_s5 + $0x84] ss:$8 sps:$4 sm:$0xff]  }
 0x2ec   : > { %3223 = vmatprep.subr.bf16.mxu1 %v4557_v11  ;;  %v4566_v11 = vld [vmem:[%s7077_s5 + $0x94] ss:$8 sps:$4 sm:$0xff]  }
 0x2ef   : > { %3224 = vmatpush1.bf16.msra.mxu1 %v4555_v59  ;;  %v4564_v59 = vld [vmem:[%s7077_s5 + $0x90] ss:$8 sps:$4 sm:$0xff]  }
 0x2f0   : > { %3225 = vmatprep.subr.bf16.mxu1 %v4560_v49  ;;  %v4569_v49 = vld [vmem:[%s7077_s5 + $0xa4] ss:$8 sps:$4 sm:$0xff]  }
 0x2f3   : > { %3226 = vmatpush1.bf16.msra.mxu1 %v4558_v61  ;;  %v4567_v61 = vld [vmem:[%s7077_s5 + $0xa0] ss:$8 sps:$4 sm:$0xff]  }
 0x2f4   : > { %3227 = vmatprep.subr.bf16.mxu1 %v4563_v17  ;;  %v4572_v17 = vld [vmem:[%s7077_s5 + $0xb4] ss:$8 sps:$4 sm:$0xff]  }
 0x2f7   : > { %3228 = vmatpush1.bf16.msra.mxu1 %v4561_v4  ;;  %v4570_v4 = vld [vmem:[%s7077_s5 + $0xb0] ss:$8 sps:$4 sm:$0xff]  }
 0x2f8   : > { %3229 = vmatprep.subr.bf16.mxu1 %v4566_v11  ;;  %v4575_v11 = vld [vmem:[%s7077_s5 + $0xc4] ss:$8 sps:$4 sm:$0xff]  }
 0x2fb   : > { %3230 = vmatpush1.bf16.msra.mxu1 %v4564_v59  ;;  %v4573_v59 = vld [vmem:[%s7077_s5 + $0xc0] ss:$8 sps:$4 sm:$0xff]  }
 0x2fc   : > { %3231 = vmatprep.subr.bf16.mxu1 %v4569_v49  ;;  %v4578_v49 = vld [vmem:[%s7077_s5 + $0xd4] ss:$8 sps:$4 sm:$0xff]  }
 0x2ff   : > { %3232 = vmatpush1.bf16.msra.mxu1 %v4567_v61  ;;  %v4576_v61 = vld [vmem:[%s7077_s5 + $0xd0] ss:$8 sps:$4 sm:$0xff]  }
 0x300   : > { %3233 = vmatprep.subr.bf16.mxu1 %v4572_v17  ;;  %v4581_v17 = vld [vmem:[%s7077_s5 + $0xe4] ss:$8 sps:$4 sm:$0xff]  }
 0x303   : > { %3234 = vmatpush1.bf16.msra.mxu1 %v4570_v4  ;;  %v4579_v4 = vld [vmem:[%s7077_s5 + $0xe0] ss:$8 sps:$4 sm:$0xff]  }
 0x304   : > { %3235 = vmatprep.subr.bf16.mxu1 %v4575_v11  ;;  %v4582_v11 = vld [vmem:[%s7077_s5 + $0xf0] ss:$8 sps:$4 sm:$0xff]  }
 0x307   : > { %3236 = vmatpush1.bf16.msra.mxu1 %v4573_v59  ;;  %v4584_v59 = vld [vmem:[%s7077_s5 + $0xf4] ss:$8 sps:$4 sm:$0xff]  }
 0x308   : > { %3237 = vmatprep.subr.bf16.mxu1 %v4578_v49  ;;  %v4587_v49 = vld [vmem:[%s7077_s5 + $0x104] ss:$8 sps:$4 sm:$0xff]  }
 0x30b   : > { %3238 = vmatpush1.bf16.msra.mxu1 %v4576_v61  ;;  %v7145_v61 = vsub.s32 0, %v4954_v56 }
 0x30c   : > { %3239 = vmatprep.subr.bf16.mxu1 %v4581_v17  ;;  %v1520_v17 = vld [vmem:[%s7076_s4] sm:$0x3] }
 0x30d   : > { %v6139_v53 = vrot.slane %v1520_v17, %v7145_v61 }
 0x30f   : > { %3240 = vmatpush1.bf16.msra.mxu1 %v4579_v4  ;;  %v7146_v4 = vsub.s32 1, %v4954_v56 }
 0x310   : > { %3241 = vmatprep.subr.bf16.mxu1 %v4584_v59 }
 0x313   : > { %3242 = vmatpush1.bf16.msra.mxu1 %v4582_v11  ;;  %v6143_v11 = vrot.slane %v1520_v17, %v7146_v4 }
 0x314   : > { %3324 = vmatprep.subr.bf16.mxu1 %v4587_v49 }
 0x379   : > { %v2272_v59 = vpop.f32.mrb[16].mxu0 }
 0x37a   : > { %v4143_v54 = vadd.f32 %v2272_v59, %v6139_v53  ;;  %v2274_v49 = vpop.f32.mrb[17].mxu0 }
 0x37b   : > { %v4144_v40 = vadd.f32 %v2274_v49, %v6143_v11  ;;  %v2276_v31 = vpop.f32.mrb[18].mxu0 }
 0x37c   : > { %v6147_v28 = vmax.f32 %v4143_v54, 0.0  ;;  %v4145_v22 = vadd.f32 %v2276_v31, %v6139_v53  ;;  %v2278_v2 = vpop.f32.mrb[19].mxu0 }
 0x37d   : > { %v6150_v51 = vmax.f32 %v4144_v40, 0.0  ;;  %v4146_v61 = vadd.f32 %v2278_v2, %v6143_v11 }
 0x37e   : > { %v6153_v41 = vmax.f32 %v4145_v22, 0.0  ;;  %v7435_v4 = vrot.slane %v6147_v28, 7  ;;  %v7436_v18 = vrot.slane %v6147_v28, 1 }
 0x37f   : > { %v6157_v59 = vmax.f32 %v4146_v61, 0.0  ;;  %v7437_v32 = vrot.slane %v6150_v51, 1  ;;  %v7438_v7 = vrot.slane %v6150_v51, 7 }
 0x380   : > { %v2385_v54 = vrot.slane %v6153_v41, 7  ;;  %v2481_v24 = vrot.slane %v6153_v41, 1 }
 0x381   : > { %v2386_v22 = vrot.slane %v6157_v59, 7  ;;  %v2482_v2 = vrot.slane %v6157_v59, 1  ;;  %v2282_v17 = vpop.f32.mrb[20].mxu0 }
 0x382   : > { %v6173_v49 = vsel %vm1150_vm1, %v7435_v4, %v2385_v54  ;;  %v2539_v31 = vsel %vm1279_vm2, %v7436_v18, %v2481_v24  ;;  %v4147_v40 = vadd.f32 %v2282_v17, %v6139_v53  ;;  %v2284_v50 = vpop.f32.mrb[21].mxu0 }
 0x383   : > { %v4148_v44 = vadd.f32 %v2284_v50, %v6143_v11  ;;  %v2286_v38 = vpop.f32.mrb[22].mxu0  ;;  %v2540_v61 = vsel %vm1279_vm2, %v7437_v32, %v2482_v2  ;;  %v6189_v4 = vsel %vm1150_vm1, %v7438_v7, %v2386_v22 }
 0x384   : > { %v6191_v20 = vmax.f32 %v4147_v40, 0.0  ;;  %v4149_v18 = vadd.f32 %v2286_v38, %v6139_v53  ;;  %v2288_v17 = vpop.f32.mrb[23].mxu0 }
 0x385   : > { %v6194_v14 = vmax.f32 %v4148_v44, 0.0  ;;  %v4150_v50 = vadd.f32 %v2288_v17, %v6143_v11 }
 0x386   : > { %v2387_v9 = vrot.slane %v6191_v20, 7  ;;  %v2483_v1 = vrot.slane %v6191_v20, 1  ;;  %v6199_v32 = vmax.f32 %v4149_v18, 0.0 }
 0x387   : > { %v2388_v60 = vrot.slane %v6194_v14, 7  ;;  %v2484_v7 = vrot.slane %v6194_v14, 1  ;;  %v6203_v57 = vmax.f32 %v4150_v50, 0.0 }
 0x388   : > { %v2537_v38 = vsel %vm1279_vm2, %v2481_v24, %v2483_v1  ;;  %v2389_v44 = vrot.slane %v6199_v32, 7  ;;  %v2485_v40 = vrot.slane %v6199_v32, 1  ;;  %v6211_v17 = vsel %vm1150_vm1, %v2385_v54, %v2387_v9 }
 0x389   : > { %v2579_v55 = vpack.c.bf16 %v2537_v38, %v2539_v31  ;;  %v2390_v18 = vrot.slane %v6203_v57, 7  ;;  %v2486_v33 = vrot.slane %v6203_v57, 1  ;;  %v2292_v13 = vpop.f32.mrb[24].mxu0  ;;  %v2538_v50 = vsel %vm1279_vm2, %v2482_v2, %v2484_v7 }
 0x38a   : > { %v6219_v24 = vsel %vm1279_vm2, %v2483_v1, %v2485_v40  ;;  %v4151_v37 = vadd.f32 %v2292_v13, %v6139_v53  ;;  %v2294_v10 = vpop.f32.mrb[25].mxu0  ;;  %v2580_v3 = vpack.c.bf16 %v2538_v50, %v2540_v61  ;;  %v6224_v54 = vsel %vm1150_vm1, %v2386_v22, %v2388_v60 }
 0x38b   : > { %7439 = vst [vmem:[#allocation65_spill] sm:$0xff] %v6219_v24  ;;  %v4152_v31 = vadd.f32 %v2294_v10, %v6143_v11  ;;  %v2296_v38 = vpop.f32.mrb[26].mxu0  ;;  %v6229_v0 = vsel %vm1150_vm1, %v2388_v60, %v2390_v18  ;;  %v6233_v2 = vsel %vm1150_vm1, %v2387_v9, %v2389_v44 }
 0x38c   : > { %v6237_v13 = vmax.f32 %v4151_v37, 0.0  ;;  %v4153_v61 = vadd.f32 %v2296_v38, %v6139_v53  ;;  %v2298_v22 = vpop.f32.mrb[27].mxu0  ;;  %3469 = vmatprep.mubr.bf16.mxu0 %v2580_v3  ;;  %v6251_v37 = vsel %vm1279_vm2, %v2484_v7, %v2486_v33 }
 0x38d   : > { %v6244_v50 = vmax.f32 %v4152_v31, 0.0  ;;  %v4154_v9 = vadd.f32 %v2298_v22, %v6143_v11  ;;  %3470 = vmatmul.mubr.bf16.vlgmr.msra.gmra.mrb[48].mxu0 %v2579_v55  ;;  %7442 = vst [vmem:[#allocation68_spill] sm:$0xff] %v6251_v37 }
 0x38e   : > { %7440 = vst [vmem:[#allocation66_spill] sm:$0xff] %v6237_v13  ;;  %v2391_v3 = vrot.slane %v6237_v13, 7  ;;  %v2487_v38 = vrot.slane %v6237_v13, 1  ;;  %v6255_v10 = vmax.f32 %v4153_v61, 0.0 }
 0x38f   : > { %7441 = vst [vmem:[#allocation67_spill] sm:$0xff] %v6244_v50  ;;  %v2392_v60 = vrot.slane %v6244_v50, 7  ;;  %v2488_v31 = vrot.slane %v6244_v50, 1  ;;  %v6259_v34 = vmax.f32 %v4154_v9, 0.0 }
 0x390   : > { %7443 = vst [vmem:[#allocation69_spill] sm:$0xff] %v6255_v10  ;;  %v6263_v55 = vsel %vm1279_vm2, %v2485_v40, %v2487_v38  ;;  %v2393_v22 = vrot.slane %v6255_v10, 7  ;;  %v2489_v7 = vrot.slane %v6255_v10, 1  ;;  %v6269_v1 = vsel %vm1150_vm1, %v2389_v44, %v2391_v3 }
 0x391   : > { %7444 = vst [vmem:[#allocation70_spill] sm:$0xff] %v6263_v55  ;;  %v2394_v58 = vrot.slane %v6259_v34, 7  ;;  %v2490_v9 = vrot.slane %v6259_v34, 1  ;;  %v2302_v29 = vpop.f32.mrb[28].mxu0  ;;  %v6277_v40 = vsel %vm1150_vm1, %v2390_v18, %v2392_v60 }
 0x392   : > { %v4155_v15 = vadd.f32 %v2302_v29, %v6139_v53  ;;  %v2304_v35 = vpop.f32.mrb[29].mxu0  ;;  %v6282_v27 = vsel %vm1150_vm1, %v2391_v3, %v2393_v22  ;;  %v6297_v3 = vsel %vm1279_vm2, %v2486_v33, %v2488_v31  ;;  %v6315_v33 = vsel %vm1279_vm2, %v2487_v38, %v2489_v7 }
 0x393   : > { %v4156_v24 = vadd.f32 %v2304_v35, %v6143_v11  ;;  %v2306_v55 = vpop.f32.mrb[30].mxu0  ;;  %v6291_v18 = vsel %vm1150_vm1, %v2392_v60, %v2394_v58  ;;  %7445 = vst [vmem:[#allocation71_spill] sm:$0xff] %v6297_v3  ;;  %v6311_v29 = vsel %vm1279_vm2, %v2488_v31, %v2490_v9  ;;  %7449 = vst [vmem:[#allocation75_spill] sm:$0xff] %v6315_v33 }
 0x394   : > { %v6299_v25 = vmax.f32 %v4155_v15, 0.0  ;;  %v4157_v44 = vadd.f32 %v2306_v55, %v6139_v53  ;;  %v2308_v5 = vpop.f32.mrb[31].mxu0  ;;  %7448 = vst [vmem:[#allocation74_spill] sm:$0xff] %v6311_v29 }
 0x395   : > { %v6306_v60 = vmax.f32 %v4156_v24, 0.0  ;;  %v4158_v23 = vadd.f32 %v2308_v5, %v6143_v11 }
 0x396   : > { %7446 = vst [vmem:[#allocation72_spill] sm:$0xff] %v6299_v25  ;;  %v2395_v15 = vrot.slane %v6299_v25, 7  ;;  %v2491_v55 = vrot.slane %v6299_v25, 1  ;;  %v6319_v35 = vmax.f32 %v4157_v44, 0.0 }
 0x397   : > { %7447 = vst [vmem:[#allocation73_spill] sm:$0xff] %v6306_v60  ;;  %v2396_v61 = vrot.slane %v6306_v60, 7  ;;  %v2492_v24 = vrot.slane %v6306_v60, 1  ;;  %v6323_v37 = vmax.f32 %v4158_v23, 0.0 }
 0x398   : > { %7450 = vst [vmem:[#allocation76_spill] sm:$0xff] %v6319_v35  ;;  %v2397_v5 = vrot.slane %v6319_v35, 7  ;;  %v2493_v31 = vrot.slane %v6319_v35, 1  ;;  %v6329_v38 = vsel %vm1150_vm1, %v2393_v22, %v2395_v15  ;;  %v6352_v30 = vsel %vm1279_vm2, %v2489_v7, %v2491_v55 }
 0x399   : > { %7451 = vst [vmem:[#allocation77_spill] sm:$0xff] %v6323_v37  ;;  %v2398_v44 = vrot.slane %v6323_v37, 7  ;;  %v2494_v43 = vrot.slane %v6323_v37, 1  ;;  %v2312_v6 = vpop.f32.mrb[32].mxu0  ;;  %v6337_v23 = vsel %vm1150_vm1, %v2394_v58, %v2396_v61  ;;  %v6348_v3 = vsel %vm1279_vm2, %v2490_v9, %v2492_v24  ;;  %7453 = vst [vmem:[#allocation79_spill] sm:$0xff] %v6352_v30 }
 0x39a   : > { %v4159_v36 = vadd.f32 %v2312_v6, %v6139_v53  ;;  %v2314_v26 = vpop.f32.mrb[33].mxu0  ;;  %v6344_v22 = vsel %vm1150_vm1, %v2395_v15, %v2397_v5  ;;  %7452 = vst [vmem:[#allocation78_spill] sm:$0xff] %v6348_v3 }
 0x39b   : > { %v4160_v58 = vadd.f32 %v2314_v26, %v6143_v11  ;;  %v2316_v8 = vpop.f32.mrb[34].mxu0  ;;  %v6357_v42 = vsel %vm1150_vm1, %v2396_v61, %v2398_v44  ;;  %v6375_v6 = vsel %vm1279_vm2, %v2492_v24, %v2494_v43 }
 0x39c   : > { %v6363_v16 = vmax.f32 %v4159_v36, 0.0  ;;  %v4161_v9 = vadd.f32 %v2316_v8, %v6139_v53  ;;  %v2318_v25 = vpop.f32.mrb[35].mxu0  ;;  %7456 = vst [vmem:[#allocation82_spill] sm:$0xff] %v6375_v6  ;;  %v6379_v36 = vsel %vm1279_vm2, %v2491_v55, %v2493_v31 }
 0x39d   : > { %v6370_v35 = vmax.f32 %v4160_v58, 0.0  ;;  %v4162_v61 = vadd.f32 %v2318_v25, %v6143_v11  ;;  %7457 = vst [vmem:[#allocation83_spill] sm:$0xff] %v6379_v36 }
 0x39e   : > { %7454 = vst [vmem:[#allocation80_spill] sm:$0xff] %v6363_v16  ;;  %v2399_v8 = vrot.slane %v6363_v16, 7  ;;  %v2495_v15 = vrot.slane %v6363_v16, 1  ;;  %v6383_v7 = vmax.f32 %v4161_v9, 0.0 }
 0x39f   : > { %7455 = vst [vmem:[#allocation81_spill] sm:$0xff] %v6370_v35  ;;  %v2400_v26 = vrot.slane %v6370_v35, 7  ;;  %v2496_v58 = vrot.slane %v6370_v35, 1  ;;  %v6387_v33 = vmax.f32 %v4162_v61, 0.0 }
 0x3a0   : > { %7458 = vst [vmem:[#allocation84_spill] sm:$0xff] %v6383_v7  ;;  %v2401_v25 = vrot.slane %v6383_v7, 7  ;;  %v2497_v24 = vrot.slane %v6383_v7, 1  ;;  %v6393_v55 = vsel %vm1150_vm1, %v2397_v5, %v2399_v8  ;;  %v6416_v16 = vsel %vm1279_vm2, %v2493_v31, %v2495_v15 }
 0x3a1   : > { %7459 = vst [vmem:[#allocation85_spill] sm:$0xff] %v6387_v33  ;;  %v2402_v9 = vrot.slane %v6387_v33, 7  ;;  %v2498_v29 = vrot.slane %v6387_v33, 1  ;;  %v2322_v3 = vpop.f32.mrb[36].mxu0  ;;  %v6401_v61 = vsel %vm1150_vm1, %v2398_v44, %v2400_v26  ;;  %v6412_v30 = vsel %vm1279_vm2, %v2494_v43, %v2496_v58  ;;  %7461 = vst [vmem:[#allocation87_spill] sm:$0xff] %v6416_v16 }
 0x3a2   : > { %v4163_v46 = vadd.f32 %v2322_v3, %v6139_v53  ;;  %v2324_v62 = vpop.f32.mrb[37].mxu0  ;;  %v6408_v5 = vsel %vm1150_vm1, %v2399_v8, %v2401_v25  ;;  %7460 = vst [vmem:[#allocation86_spill] sm:$0xff] %v6412_v30 }
 0x3a3   : > { %v4164_v44 = vadd.f32 %v2324_v62, %v6143_v11  ;;  %v2326_v7 = vpop.f32.mrb[38].mxu0  ;;  %v6421_v12 = vsel %vm1150_vm1, %v2400_v26, %v2402_v9  ;;  %v6439_v3 = vsel %vm1279_vm2, %v2496_v58, %v2498_v29 }
 0x3a4   : > { %v6427_v35 = vmax.f32 %v4163_v46, 0.0  ;;  %v4165_v43 = vadd.f32 %v2326_v7, %v6139_v53  ;;  %v2328_v33 = vpop.f32.mrb[39].mxu0  ;;  %7464 = vst [vmem:[#allocation90_spill] sm:$0xff] %v6439_v3  ;;  %v6443_v46 = vsel %vm1279_vm2, %v2495_v15, %v2497_v24 }
 0x3a5   : > { %v6434_v39 = vmax.f32 %v4164_v44, 0.0  ;;  %v4166_v26 = vadd.f32 %v2328_v33, %v6143_v11  ;;  %7465 = vst [vmem:[#allocation91_spill] sm:$0xff] %v6443_v46 }
 0x3a6   : > { %7462 = vst [vmem:[#allocation88_spill] sm:$0xff] %v6427_v35  ;;  %v2403_v7 = vrot.slane %v6427_v35, 7  ;;  %v2499_v8 = vrot.slane %v6427_v35, 1  ;;  %v6447_v31 = vmax.f32 %v4165_v43, 0.0 }
 0x3a7   : > { %7463 = vst [vmem:[#allocation89_spill] sm:$0xff] %v6434_v39  ;;  %v2404_v62 = vrot.slane %v6434_v39, 7  ;;  %v2500_v44 = vrot.slane %v6434_v39, 1  ;;  %v6451_v36 = vmax.f32 %v4166_v26, 0.0 }
 0x3a8   : > { %7466 = vst [vmem:[#allocation92_spill] sm:$0xff] %v6447_v31  ;;  %v2405_v33 = vrot.slane %v6447_v31, 7  ;;  %v2501_v58 = vrot.slane %v6447_v31, 1  ;;  %v6457_v15 = vsel %vm1150_vm1, %v2401_v25, %v2403_v7  ;;  %v6480_v35 = vsel %vm1279_vm2, %v2497_v24, %v2499_v8 }
 0x3a9   : > { %7467 = vst [vmem:[#allocation93_spill] sm:$0xff] %v6451_v36  ;;  %v2406_v43 = vrot.slane %v6451_v36, 7  ;;  %v2502_v6 = vrot.slane %v6451_v36, 1  ;;  %v2332_v30 = vpop.f32.mrb[40].mxu0  ;;  %v6465_v26 = vsel %vm1150_vm1, %v2402_v9, %v2404_v62  ;;  %v6476_v16 = vsel %vm1279_vm2, %v2498_v29, %v2500_v44  ;;  %7469 = vst [vmem:[#allocation95_spill] sm:$0xff] %v6480_v35 }
 0x3aa   : > { %v4167_v37 = vadd.f32 %v2332_v30, %v6139_v53  ;;  %v2334_v13 = vpop.f32.mrb[41].mxu0  ;;  %v6472_v25 = vsel %vm1150_vm1, %v2403_v7, %v2405_v33  ;;  %7468 = vst [vmem:[#allocation94_spill] sm:$0xff] %v6476_v16 }
 0x3ab   : > { %v4168_v9 = vadd.f32 %v2334_v13, %v6143_v11  ;;  %v2336_v31 = vpop.f32.mrb[42].mxu0  ;;  %v6485_v60 = vsel %vm1150_vm1, %v2404_v62, %v2406_v43  ;;  %v6503_v30 = vsel %vm1279_vm2, %v2500_v44, %v2502_v6 }
 0x3ac   : > { %v6491_v39 = vmax.f32 %v4167_v37, 0.0  ;;  %v4169_v29 = vadd.f32 %v2336_v31, %v6139_v53  ;;  %v2338_v36 = vpop.f32.mrb[43].mxu0  ;;  %7472 = vst [vmem:[#allocation98_spill] sm:$0xff] %v6503_v30  ;;  %v6507_v37 = vsel %vm1279_vm2, %v2499_v8, %v2501_v58  ;;  %v7480_v30 = vrot.slane %v6147_v28, 7 }
 0x3ad   : > { %v6498_v10 = vmax.f32 %v4168_v9, 0.0  ;;  %v4170_v62 = vadd.f32 %v2338_v36, %v6143_v11  ;;  %7473 = vst [vmem:[#allocation99_spill] sm:$0xff] %v6507_v37 }
 0x3ae   : > { %7470 = vst [vmem:[#allocation96_spill] sm:$0xff] %v6491_v39  ;;  %v2407_v31 = vrot.slane %v6491_v39, 7  ;;  %v2503_v7 = vrot.slane %v6491_v39, 1  ;;  %v6511_v24 = vmax.f32 %v4169_v29, 0.0 }
 0x3af   : > { %7471 = vst [vmem:[#allocation97_spill] sm:$0xff] %v6498_v10  ;;  %v2408_v13 = vrot.slane %v6498_v10, 7  ;;  %v2504_v9 = vrot.slane %v6498_v10, 1  ;;  %v6515_v46 = vmax.f32 %v4170_v62, 0.0 }
 0x3b0   : > { %7474 = vst [vmem:[#allocation100_spill] sm:$0xff] %v6511_v24  ;;  %v2409_v36 = vrot.slane %v6511_v24, 7  ;;  %v2505_v44 = vrot.slane %v6511_v24, 1  ;;  %v6521_v8 = vsel %vm1150_vm1, %v2405_v33, %v2407_v31  ;;  %v6544_v39 = vsel %vm1279_vm2, %v2501_v58, %v2503_v7 }
 0x3b1   : > { %7475 = vst [vmem:[#allocation101_spill] sm:$0xff] %v6515_v46  ;;  %v2410_v29 = vrot.slane %v6515_v46, 7  ;;  %v2506_v3 = vrot.slane %v6515_v46, 1  ;;  %v2342_v16 = vpop.f32.mrb[44].mxu0  ;;  %v6529_v62 = vsel %vm1150_vm1, %v2406_v43, %v2408_v13  ;;  %v6540_v35 = vsel %vm1279_vm2, %v2502_v6, %v2504_v9  ;;  %7477 = vst [vmem:[#allocation103_spill] sm:$0xff] %v6544_v39 }
 0x3b2   : > { %v4171_v63 = vadd.f32 %v2342_v16, %v6139_v53  ;;  %v2344_v45 = vpop.f32.mrb[45].mxu0  ;;  %v6536_v33 = vsel %vm1150_vm1, %v2407_v31, %v2409_v36  ;;  %7476 = vst [vmem:[#allocation102_spill] sm:$0xff] %v6540_v35 }
 0x3b3   : > { %v4172_v43 = vadd.f32 %v2344_v45, %v6143_v11  ;;  %v2346_v24 = vpop.f32.mrb[46].mxu0  ;;  %v6549_v19 = vsel %vm1150_vm1, %v2408_v13, %v2410_v29  ;;  %v6567_v16 = vsel %vm1279_vm2, %v2504_v9, %v2506_v3 }
 0x3b4   : > { %v6555_v10 = vmax.f32 %v4171_v63, 0.0  ;;  %v4173_v6 = vadd.f32 %v2346_v24, %v6139_v53  ;;  %v2348_v46 = vpop.f32.mrb[47].mxu0  ;;  %v6571_v63 = vsel %vm1279_vm2, %v2503_v7, %v2505_v44 }
 0x3b5   : > { %v6562_v50 = vmax.f32 %v4172_v43, 0.0  ;;  %v4174_v13 = vadd.f32 %v2348_v46, %v6143_v11 }
 0x3b6   : > { %7478 = vst [vmem:[#allocation104_spill] sm:$0xff] %v6555_v10  ;;  %v2411_v53 = vrot.slane %v6555_v10, 7  ;;  %v2507_v24 = vrot.slane %v6555_v10, 1  ;;  %v6575_v31 = vmax.f32 %v4173_v6, 0.0 }
 0x3b7   : > { %v2412_v45 = vrot.slane %v6562_v50, 7  ;;  %v2508_v43 = vrot.slane %v6562_v50, 1  ;;  %v6579_v58 = vmax.f32 %v4174_v13, 0.0  ;;  %v7481_v13 = vrot.slane %v6150_v51, 7 }
 0x3b8   : > { %7479 = vst [vmem:[#allocation105_spill] sm:$0xff] %v6575_v31  ;;  %v2413_v11 = vrot.slane %v6575_v31, 7  ;;  %v2509_v46 = vrot.slane %v6575_v31, 1  ;;  %v6585_v7 = vsel %vm1150_vm1, %v2409_v36, %v2411_v53 }
 0x3b9   : > { %v2414_v6 = vrot.slane %v6579_v58, 7  ;;  %v2510_v37 = vrot.slane %v6579_v58, 1  ;;  %v6593_v39 = vsel %vm1150_vm1, %v2410_v29, %v2412_v45  ;;  %v6607_v9 = vsel %vm1279_vm2, %v2506_v3, %v2508_v43 }
 0x3ba   : > { %v2445_v36 = vsel %vm1150_vm1, %v2413_v11, %v7480_v30  ;;  %v6603_v35 = vsel %vm1150_vm1, %v2411_v53, %v2413_v11  ;;  %v6611_v29 = vsel %vm1279_vm2, %v2505_v44, %v2507_v24  ;;  %v4585_v44 = vld [vmem:[%s7077_s5 + $0x100] ss:$8 sps:$4 sm:$0xff]  }
 0x3bb   : > { %v3993_v10 = vpack.c.bf16 %v6173_v49, %v2445_v36  ;;  %v2446_v31 = vsel %vm1150_vm1, %v2414_v6, %v7481_v13  ;;  %v6620_v30 = vsel %vm1150_vm1, %v2412_v45, %v2414_v6  ;;  %v2617_v53 = vpack.c.bf16 %v6603_v35, %v6585_v7  ;;  %v4590_v45 = vld [vmem:[%s7077_s5 + $0x114] ss:$8 sps:$4 sm:$0xff]  }
 0x3bc   : > { %v3989_v3 = vpack.c.bf16 %v6189_v4, %v2446_v31  ;;  %v2618_v49 = vpack.c.bf16 %v6620_v30, %v6593_v39  ;;  %v6639_v4 = vsel %vm1279_vm2, %v2508_v43, %v2510_v37  ;;  %v7482_v31 = vrot.slane %v6150_v51, 1  ;;  %v4632_v39 = vld [vmem:[%s7077_s5 + $0x1f4] ss:$8 sps:$4 sm:$0xff]   ;;  %v4633_v30 = vld [vmem:[%s7077_s5 + $0x204] ss:$8 sps:$4 sm:$0xff]  }
 0x3bd   : > { %v6649_v36 = vsel %vm1279_vm2, %v2507_v24, %v2509_v46  ;;  %v7483_v13 = vrot.slane %v6147_v28, 1  ;;  %v7484_v24 = vpack.c.bf16 %v6229_v0, %v6224_v54  ;;  %v4596_v0 = vld [vmem:[%s7077_s5 + $0x134] ss:$8 sps:$4 sm:$0xff]   ;;  %v7485_v54 = vpack.c.bf16 %v6233_v2, %v6211_v17  ;;  %v4597_v17 = vld [vmem:[%s7077_s5 + $0x140] ss:$8 sps:$4 sm:$0xff]  }
 0x3be   : > { %v6645_v6 = vsel %vm1279_vm2, %v2510_v37, %v7482_v31  ;;  %3990 = vmatprep.mubr.msk.bf16.mxu1 %vm5426_vm5, %v3989_v3  ;;  %v4593_v3 = vld [vmem:[%s7077_s5 + $0x124] ss:$8 sps:$4 sm:$0xff]   ;;  %v4602_v2 = vld [vmem:[%s7077_s5 + $0x154] ss:$8 sps:$4 sm:$0xff]   ;;  %v7497_v35 = vpack.c.bf16 %v6153_v41, %v6147_v28  ;;  %v7498_v7 = vpack.c.bf16 %v6203_v57, %v6194_v14  ;;  %v7499_v14 = vpack.c.bf16 %v6199_v32, %v6191_v20 }
 0x3bf   : > { %v6655_v11 = vsel %vm1279_vm2, %v2509_v46, %v7483_v13  ;;  %v4045_v43 = vpack.c.bf16 %v6645_v6, %v6639_v4  ;;  %3994 = vmatmul.mubr.msk.bf16.vlgmr.msra.gmra.mrb[32].mxu1 %vm5426_vm5, %v3993_v10  ;;  %v4588_v46 = vld [vmem:[%s7077_s5 + $0x110] ss:$8 sps:$4 sm:$0xff]   ;;  %v7486_v10 = vpack.c.bf16 %v6291_v18, %v6277_v40  ;;  %v4599_v13 = vld [vmem:[%s7077_s5 + $0x144] ss:$8 sps:$4 sm:$0xff]   ;;  %v7487_v40 = vpack.c.bf16 %v6282_v27, %v6269_v1 }
 0x3c0   : > { %v4049_v37 = vpack.c.bf16 %v6655_v11, %v6649_v36  ;;  %3253 = vmatprep.mubr.bf16.mxu1 %v7484_v24  ;;  %3325 = vmatpush1.bf16.msra.mxu1 %v4585_v44  ;;  %v4594_v44 = vld [vmem:[%s7077_s5 + $0x130] ss:$8 sps:$4 sm:$0xff]   ;;  %v7488_v18 = vpack.c.bf16 %v6357_v42, %v6337_v23  ;;  %v4605_v31 = vld [vmem:[%s7077_s5 + $0x164] ss:$8 sps:$4 sm:$0xff]   ;;  %v4608_v42 = vld [vmem:[%s7077_s5 + $0x174] ss:$8 sps:$4 sm:$0xff]   ;;  %v7489_v27 = vpack.c.bf16 %v6344_v22, %v6329_v38 }
 0x3c1   : > { %3326 = vmatprep.subr.bf16.mxu1 %v4590_v45  ;;  %v4600_v45 = vld [vmem:[%s7077_s5 + $0x150] ss:$8 sps:$4 sm:$0xff]   ;;  %v7490_v1 = vpack.c.bf16 %v6421_v12, %v6401_v61  ;;  %v4611_v24 = vld [vmem:[%s7077_s5 + $0x184] ss:$8 sps:$4 sm:$0xff]   ;;  %v4609_v38 = vld [vmem:[%s7077_s5 + $0x180] ss:$8 sps:$4 sm:$0xff]   ;;  %v7491_v22 = vpack.c.bf16 %v6408_v5, %v6393_v55  ;;  %v7492_v61 = vpack.c.bf16 %v6485_v60, %v6465_v26  ;;  %v7493_v55 = vpack.c.bf16 %v6472_v25, %v6457_v15 }
 0x3c2   : > { %v4606_v23 = vld [vmem:[%s7077_s5 + $0x170] ss:$8 sps:$4 sm:$0xff]   ;;  %v4614_v12 = vld [vmem:[%s7077_s5 + $0x194] ss:$8 sps:$4 sm:$0xff]   ;;  %v7494_v5 = vpack.c.bf16 %v6549_v19, %v6529_v62  ;;  %v4621_v15 = vld [vmem:[%s7077_s5 + $0x1c0] ss:$8 sps:$4 sm:$0xff]   ;;  %v7495_v25 = vpack.c.bf16 %v6536_v33, %v6521_v8  ;;  %v7496_v8 = vpack.c.bf16 %v6157_v59, %v6150_v51 }
 0x3c3   : > { %v4620_v60 = vld [vmem:[%s7077_s5 + $0x1b4] ss:$8 sps:$4 sm:$0xff]   ;;  %v4618_v26 = vld [vmem:[%s7077_s5 + $0x1b0] ss:$8 sps:$4 sm:$0xff]   ;;  %v4634_v51 = vld [vmem:[%s7077_s5 + $0x200] ss:$8 sps:$4 sm:$0xff]  }
 0x3c4   : > { %3327 = vmatpush1.bf16.msra.mxu1 %v4588_v46  ;;  %v4612_v46 = vld [vmem:[%s7077_s5 + $0x190] ss:$8 sps:$4 sm:$0xff]   ;;  %v4626_v19 = vld [vmem:[%s7077_s5 + $0x1d4] ss:$8 sps:$4 sm:$0xff]   ;;  %v4637_v57 = vld [vmem:[%s7077_s5 + $0x224] ss:$8 sps:$4 sm:$0xff]  }
 0x3c5   : > { %3328 = vmatprep.subr.bf16.mxu1 %v4593_v3  ;;  %v4617_v3 = vld [vmem:[%s7077_s5 + $0x1a4] ss:$8 sps:$4 sm:$0xff]   ;;  %v4624_v62 = vld [vmem:[%s7077_s5 + $0x1d0] ss:$8 sps:$4 sm:$0xff]   ;;  %v4635_v59 = vld [vmem:[%s7077_s5 + $0x214] ss:$8 sps:$4 sm:$0xff]  }
 0x3c6   : > { %v4630_v33 = vld [vmem:[%s7077_s5 + $0x1f0] ss:$8 sps:$4 sm:$0xff]   ;;  %v7500_v41 = vld [vmem:[#allocation67_spill] sm:$0xff] }
 0x3c7   : > { %3254 = vmatmul.mubr.bf16.gmra.mrb[36].mxu1 %v7485_v54  ;;  %v7501_v28 = vpack.c.bf16 %v6259_v34, %v7500_v41  ;;  %v7502_v54 = vld [vmem:[#allocation9_spill] sm:$0xff] }
 0x3c8   : > { %3998 = vmatprep.mubr.msk.bf16.mxu1 %vm5482_vm7, %v7486_v10  ;;  %3329 = vmatpush1.bf16.msra.mxu1 %v4591_v48  ;;  %v4623_v48 = vld [vmem:[%s7077_s5 + $0x1c4] ss:$8 sps:$4 sm:$0xff]   ;;  %v7508_v20 = vld [vmem:[#allocation77_spill] sm:$0xff] }
 0x3c9   : > { %3330 = vmatprep.subr.bf16.mxu1 %v4596_v0  ;;  %v4629_v0 = vld [vmem:[%s7077_s5 + $0x1e4] ss:$8 sps:$4 sm:$0xff]   ;;  %v7509_v32 = vld [vmem:[#allocation73_spill] sm:$0xff] }
 0x3ca   : > { %v7503_v10 = vld [vmem:[#allocation11_spill] sm:$0xff]  ;;  %v7511_v34 = vld [vmem:[#allocation21_spill] sm:$0xff] }
 0x3cb   : > { %v7550_v41 = vld [vmem:[#allocation61_spill] sm:$0xff] }
 0x3cc   : > { %3331 = vmatpush1.bf16.msra.mxu1 %v4594_v44  ;;  %v7504_v44 = vld [vmem:[#allocation7_spill] sm:$0xff] }
 0x3cd   : > { %3332 = vmatprep.subr.bf16.mxu1 %v4599_v13  ;;  %v7505_v13 = vld [vmem:[#allocation69_spill] sm:$0xff] }
 0x3cf   : > { %4002 = vmatmul.mubr.msk.bf16.gmra.mrb[40].mxu1 %vm5482_vm7, %v7487_v40  ;;  %v7510_v40 = vpack.c.bf16 %v7508_v20, %v7509_v32  ;;  %v7600_v32 = vld [vmem:[#allocation6_spill] sm:$0xff] }
 0x3d0   : > { %3273 = vmatprep.mubr.bf16.mxu1 %v7488_v18  ;;  %3333 = vmatpush1.bf16.msra.mxu1 %v4597_v17  ;;  %v7506_v17 = vld [vmem:[#allocation66_spill] sm:$0xff]  ;;  %v7512_v18 = vld [vmem:[#allocation19_spill] sm:$0xff] }
 0x3d1   : > { %3334 = vmatprep.subr.bf16.mxu1 %v4602_v2  ;;  %v7507_v2 = vpack.c.bf16 %v7505_v13, %v7506_v17  ;;  %v7556_v13 = vld [vmem:[#allocation55_spill] sm:$0xff] }
 0x3d2   : > { %v7557_v17 = vld [vmem:[#allocation71_spill] sm:$0xff] }
 0x3d4   : > { %3335 = vmatpush1.bf16.msra.mxu1 %v4600_v45  ;;  %v7513_v45 = vld [vmem:[#allocation15_spill] sm:$0xff] }
 0x3d5   : > { %3336 = vmatprep.subr.bf16.mxu1 %v4605_v31  ;;  %v7514_v31 = vld [vmem:[#allocation29_spill] sm:$0xff] }
 0x3d7   : > { %3274 = vmatmul.mubr.bf16.gmra.mrb[44].mxu1 %v7489_v27 }
 0x3d8   : > { %4006 = vmatprep.mubr.msk.bf16.mxu1 %vm5528_vm9, %v7490_v1  ;;  %3337 = vmatpush1.bf16.msra.mxu1 %v4603_v21  ;;  %v7515_v21 = vld [vmem:[#allocation76_spill] sm:$0xff]  ;;  %v7518_v1 = vld [vmem:[#allocation85_spill] sm:$0xff] }
 0x3d9   : > { %3338 = vmatprep.subr.bf16.mxu1 %v4608_v42  ;;  %v7516_v42 = vld [vmem:[#allocation72_spill] sm:$0xff] }
 0x3da   : > { %v7517_v27 = vpack.c.bf16 %v7515_v21, %v7516_v42  ;;  %v7569_v42 = vld [vmem:[#allocation79_spill] sm:$0xff] }
 0x3dc   : > { %3339 = vmatpush1.bf16.msra.mxu1 %v4606_v23  ;;  %v7519_v23 = vld [vmem:[#allocation81_spill] sm:$0xff] }
 0x3dd   : > { %3340 = vmatprep.subr.bf16.mxu1 %v4611_v24  ;;  %v7520_v24 = vpack.c.bf16 %v7518_v1, %v7519_v23  ;;  %v7572_v23 = vld [vmem:[#allocation86_spill] sm:$0xff] }
 0x3df   : > { %4010 = vmatmul.mubr.msk.bf16.gmra.mrb[48].mxu1 %vm5528_vm9, %v7491_v22  ;;  %v7523_v22 = vld [vmem:[#allocation23_spill] sm:$0xff] }
 0x3e0   : > { %3293 = vmatprep.mubr.bf16.mxu1 %v7492_v61  ;;  %3341 = vmatpush1.bf16.msra.mxu1 %v4609_v38  ;;  %v7521_v38 = vld [vmem:[#allocation25_spill] sm:$0xff] }
 0x3e1   : > { %3342 = vmatprep.subr.bf16.mxu1 %v4614_v12  ;;  %v7522_v12 = vld [vmem:[#allocation27_spill] sm:$0xff]  ;;  %v7524_v61 = vld [vmem:[#allocation37_spill] sm:$0xff] }
 0x3e4   : > { %3343 = vmatpush1.bf16.msra.mxu1 %v4612_v46  ;;  %v7525_v46 = vld [vmem:[#allocation84_spill] sm:$0xff] }
 0x3e5   : > { %3344 = vmatprep.subr.bf16.mxu1 %v4617_v3  ;;  %v7526_v3 = vld [vmem:[#allocation80_spill] sm:$0xff] }
 0x3e7   : > { %3294 = vmatmul.mubr.bf16.gmra.mrb[52].mxu1 %v7493_v55  ;;  %v7529_v55 = vld [vmem:[#allocation89_spill] sm:$0xff] }
 0x3e8   : > { %4014 = vmatprep.mubr.msk.bf16.mxu1 %vm5574_vm11, %v7494_v5  ;;  %3345 = vmatpush1.bf16.msra.mxu1 %v4615_v47  ;;  %v7527_v47 = vpack.c.bf16 %v7525_v46, %v7526_v3  ;;  %v7579_v3 = vld [vmem:[#allocation94_spill] sm:$0xff] }
 0x3e9   : > { %3346 = vmatprep.subr.bf16.mxu1 %v4620_v60  ;;  %v7528_v60 = vld [vmem:[#allocation93_spill] sm:$0xff] }
 0x3ea   : > { %v7530_v5 = vpack.c.bf16 %v7528_v60, %v7529_v55  ;;  %v7582_v55 = vld [vmem:[#allocation95_spill] sm:$0xff] }
 0x3ec   : > { %3347 = vmatpush1.bf16.msra.mxu1 %v4618_v26  ;;  %v7531_v26 = vld [vmem:[#allocation33_spill] sm:$0xff] }
 0x3ed   : > { %3348 = vmatprep.subr.bf16.mxu1 %v4623_v48  ;;  %v7532_v48 = vld [vmem:[#allocation31_spill] sm:$0xff] }
 0x3ef   : > { %4018 = vmatmul.mubr.msk.bf16.gmra.mrb[56].mxu1 %vm5574_vm11, %v7495_v25  ;;  %v7535_v25 = vld [vmem:[#allocation92_spill] sm:$0xff] }
 0x3f0   : > { %3313 = vmatprep.mubr.bf16.mxu1 %v2618_v49  ;;  %3349 = vmatpush1.bf16.msra.mxu1 %v4621_v15  ;;  %v4638_v49 = vld [vmem:[%s7077_s5 + $0x220] ss:$8 sps:$4 sm:$0xff]   ;;  %v7533_v15 = vld [vmem:[#allocation45_spill] sm:$0xff] }
 0x3f1   : > { %3350 = vmatprep.subr.bf16.mxu1 %v4626_v19  ;;  %v7534_v19 = vld [vmem:[#allocation41_spill] sm:$0xff] }
 0x3f4   : > { %3351 = vmatpush1.bf16.msra.mxu1 %v4624_v62  ;;  %v7536_v62 = vld [vmem:[#allocation88_spill] sm:$0xff] }
 0x3f5   : > { %3352 = vmatprep.subr.bf16.mxu1 %v4629_v0  ;;  %v7537_v0 = vpack.c.bf16 %v7535_v25, %v7536_v62  ;;  %v7589_v62 = vld [vmem:[#allocation103_spill] sm:$0xff] }
 0x3f7   : > { %3314 = vmatmul.mubr.bf16.gmra.mrb[60].mxu1 %v2617_v53  ;;  %v4636_v53 = vld [vmem:[%s7077_s5 + $0x210] ss:$8 sps:$4 sm:$0xff]  }
 0x3f8   : > { %3353 = vmatpush1.bf16.msra.mxu1 %v4627_v52  ;;  %3356 = vmatprep.mubr.bf16.mxu1 %v7496_v8  ;;  %v7538_v52 = vld [vmem:[#allocation101_spill] sm:$0xff] }
 0x3f9   : > { %3354 = vmatprep.subr.bf16.mxu1 %v4632_v39  ;;  %v7539_v39 = vld [vmem:[#allocation97_spill] sm:$0xff] }
 0x3fa   : > { %v7540_v8 = vpack.c.bf16 %v7538_v52, %v7539_v39 }
 0x3fc   : > { %3355 = vmatpush1.bf16.msra.mxu1 %v4630_v33  ;;  %v7541_v33 = vld [vmem:[#allocation43_spill] sm:$0xff] }
 0x3fd   : > { %4111 = vmatprep.subr.bf16.mxu1 %v4633_v30  ;;  %v7542_v30 = vld [vmem:[#allocation53_spill] sm:$0xff] }
 0x3ff   : > { %3357 = vmatmul.mubr.bf16.vlgmr.msra.gmra.mrb[32].mxu1 %v7497_v35  ;;  %v7543_v35 = vld [vmem:[#allocation49_spill] sm:$0xff] }
 0x400   : > { %3366 = vmatprep.mubr.bf16.mxu1 %v7498_v7  ;;  %4127 = vmatpush1.bf16.msra.mxu1 %v4634_v51  ;;  %v7544_v7 = vld [vmem:[#allocation51_spill] sm:$0xff]  ;;  %v7545_v51 = vld [vmem:[#allocation100_spill] sm:$0xff] }
 0x401   : > { %4112 = vmatprep.subr.bf16.mxu1 %v4635_v59  ;;  %v7546_v59 = vld [vmem:[#allocation96_spill] sm:$0xff] }
 0x404   : > { %4128 = vmatpush1.bf16.msra.mxu1 %v4636_v53  ;;  %v7547_v53 = vpack.c.bf16 %v7545_v51, %v7546_v59 }
 0x405   : > { %4113 = vmatprep.subr.bf16.mxu1 %v4637_v57  ;;  %v7548_v57 = vpack.c.bf16 %v6579_v58, %v6562_v50  ;;  %v7561_v50 = vld [vmem:[#allocation63_spill] sm:$0xff]  ;;  %v7562_v58 = vld [vmem:[#allocation64_spill] sm:$0xff] }
 0x407   : > { %3367 = vmatmul.mubr.bf16.gmra.mrb[36].mxu1 %v7499_v14  ;;  %v7549_v14 = vld [vmem:[#allocation47_spill] sm:$0xff] }
 0x408   : > { %3376 = vmatprep.mubr.bf16.mxu1 %v7501_v28  ;;  %4129 = vmatpush1.bf16.msra.mxu1 %v4638_v49  ;;  %v7551_v28 = vld [vmem:[#allocation57_spill] sm:$0xff]  ;;  %v7552_v49 = vld [vmem:[#allocation59_spill] sm:$0xff] }
 0x409   : > { %4114 = vmatprep.subr.bf16.mxu1 %v7502_v54  ;;  %v7553_v54 = vld [vmem:[#allocation105_spill] sm:$0xff] }
 0x40c   : > { %4130 = vmatpush1.bf16.msra.mxu1 %v7503_v10  ;;  %v7554_v10 = vld [vmem:[#allocation104_spill] sm:$0xff] }
 0x40d   : > { %4115 = vmatprep.subr.bf16.mxu1 %v7504_v44  ;;  %v7555_v44 = vpack.c.bf16 %v7553_v54, %v7554_v10  ;;  %v7598_v54 = vld [vmem:[#allocation4_spill] sm:$0xff] }
 0x40f   : > { %3377 = vmatmul.mubr.bf16.gmra.mrb[40].mxu1 %v7507_v2  ;;  %v7558_v2 = vld [vmem:[#allocation68_spill] sm:$0xff] }
 0x410   : > { %3386 = vmatprep.mubr.bf16.mxu1 %v7510_v40  ;;  %4131 = vmatpush1.bf16.msra.mxu1 %v7511_v34  ;;  %v7559_v20 = vpack.c.bf16 %v7557_v17, %v7558_v2  ;;  %v7563_v40 = vld [vmem:[#allocation70_spill] sm:$0xff]  ;;  %v7564_v34 = vld [vmem:[#allocation65_spill] sm:$0xff] }
 0x411   : > { %4116 = vmatprep.subr.bf16.mxu1 %v7512_v18  ;;  %v7565_v18 = vpack.c.bf16 %v7563_v40, %v7564_v34  ;;  %v7599_v17 = vld [vmem:[#allocation5_spill] sm:$0xff] }
 0x414   : > { %4132 = vmatpush1.bf16.msra.mxu1 %v7513_v45  ;;  %v7566_v45 = vld [vmem:[#allocation78_spill] sm:$0xff] }
 0x415   : > { %4117 = vmatprep.subr.bf16.mxu1 %v7514_v31  ;;  %v7567_v31 = vld [vmem:[#allocation74_spill] sm:$0xff] }
 0x416   : > { %v7568_v21 = vpack.c.bf16 %v7566_v45, %v7567_v31 }
 0x417   : > { %3387 = vmatmul.mubr.bf16.gmra.mrb[44].mxu1 %v7517_v27  ;;  %v7570_v27 = vld [vmem:[#allocation75_spill] sm:$0xff] }
 0x418   : > { %3396 = vmatprep.mubr.bf16.mxu1 %v7520_v24  ;;  %4133 = vmatpush1.bf16.msra.mxu1 %v7521_v38  ;;  %v7571_v1 = vpack.c.bf16 %v7569_v42, %v7570_v27  ;;  %v7573_v24 = vld [vmem:[#allocation82_spill] sm:$0xff]  ;;  %v7601_v42 = vld [vmem:[#allocation8_spill] sm:$0xff] }
 0x419   : > { %4118 = vmatprep.subr.bf16.mxu1 %v7522_v12  ;;  %v7574_v38 = vpack.c.bf16 %v7572_v23, %v7573_v24  ;;  %v7602_v24 = vld [vmem:[#allocation10_spill] sm:$0xff] }
 0x41c   : > { %4134 = vmatpush1.bf16.msra.mxu1 %v7523_v22  ;;  %v7576_v22 = vld [vmem:[#allocation87_spill] sm:$0xff] }
 0x41d   : > { %4119 = vmatprep.subr.bf16.mxu1 %v7524_v61  ;;  %v7577_v61 = vld [vmem:[#allocation83_spill] sm:$0xff] }
 0x41e   : > { %v7578_v46 = vpack.c.bf16 %v7576_v22, %v7577_v61  ;;  %v7603_v61 = vld [vmem:[#allocation12_spill] sm:$0xff] }
 0x41f   : > { %3397 = vmatmul.mubr.bf16.gmra.mrb[48].mxu1 %v7527_v47  ;;  %v7580_v47 = vld [vmem:[#allocation90_spill] sm:$0xff] }
 0x420   : > { %3406 = vmatprep.mubr.bf16.mxu1 %v7530_v5  ;;  %4135 = vmatpush1.bf16.msra.mxu1 %v7531_v26  ;;  %v7581_v60 = vpack.c.bf16 %v7579_v3, %v7580_v47  ;;  %v7583_v5 = vld [vmem:[#allocation91_spill] sm:$0xff]  ;;  %v7604_v47 = vld [vmem:[#allocation14_spill] sm:$0xff] }
 0x421   : > { %4120 = vmatprep.subr.bf16.mxu1 %v7532_v48  ;;  %v7584_v26 = vpack.c.bf16 %v7582_v55, %v7583_v5  ;;  %v7585_v48 = vld [vmem:[#allocation102_spill] sm:$0xff] }
 0x424   : > { %4136 = vmatpush1.bf16.msra.mxu1 %v7533_v15  ;;  %v7586_v15 = vld [vmem:[#allocation98_spill] sm:$0xff] }
 0x425   : > { %4121 = vmatprep.subr.bf16.mxu1 %v7534_v19  ;;  %v7587_v19 = vpack.c.bf16 %v7585_v48, %v7586_v15 }
 0x427   : > { %3407 = vmatmul.mubr.bf16.gmra.mrb[52].mxu1 %v7537_v0  ;;  %v7590_v0 = vld [vmem:[#allocation99_spill] sm:$0xff] }
 0x428   : > { %3416 = vmatprep.mubr.bf16.mxu1 %v7540_v8  ;;  %4137 = vmatpush1.bf16.msra.mxu1 %v7541_v33  ;;  %v7591_v52 = vpack.c.bf16 %v7589_v62, %v7590_v0  ;;  %v7592_v8 = vpack.c.bf16 %v6607_v9, %v6567_v16  ;;  %v2719_v16 = vld [vmem:[%s7078_s6] sm:$0x3]  ;;  %v7595_v9 = vsub.s32 0, %v4954_v56  ;;  %v7605_v62 = vld [vmem:[#allocation16_spill] sm:$0xff] }
 0x429   : > { %4122 = vmatprep.subr.bf16.mxu1 %v7542_v30 }
 0x42c   : > { %4138 = vmatpush1.bf16.msra.mxu1 %v7543_v35 }
 0x42d   : > { %4123 = vmatprep.subr.bf16.mxu1 %v7544_v7  ;;  %v7593_v7 = vpack.c.bf16 %v6611_v29, %v6571_v63  ;;  %v6961_v63 = vrot.slane %v2719_v16, %v7595_v9  ;;  %v7596_v29 = vsub.s32 1, %v4954_v56  ;;  %v7608_v9 = vld [vmem:[#allocation22_spill] sm:$0xff] }
 0x42f   : > { %3417 = vmatmul.mubr.bf16.gmra.mrb[56].mxu1 %v7547_v53  ;;  %v6965_v4 = vrot.slane %v2719_v16, %v7596_v29 }
 0x430   : > { %3426 = vmatprep.mubr.bf16.mxu1 %v7548_v57  ;;  %4139 = vmatpush1.bf16.msra.mxu1 %v7549_v14 }
 0x431   : > { %4124 = vmatprep.subr.bf16.mxu1 %v7550_v41 }
 0x434   : > { %4140 = vmatpush1.bf16.msra.mxu1 %v7551_v28  ;;  %v7597_v28 = vld [vmem:[#allocation3_spill] sm:$0xff] }
 0x435   : > { %4125 = vmatprep.subr.bf16.mxu1 %v7552_v49 }
 0x437   : > { %3427 = vmatmul.mubr.bf16.gmra.mrb[60].mxu1 %v7555_v44 }
 0x438   : > { %4141 = vmatpush1.bf16.msra.mxu1 %v7556_v13  ;;  %4022 = vmatprep.mubr.msk.bf16.mxu1 %vm5782_vm13, %v7559_v20 }
 0x439   : > { %4126 = vmatprep.subr.bf16.mxu1 %v7561_v50 }
 0x43c   : > { %4142 = vmatpush1.bf16.msra.mxu1 %v7562_v58 }
 0x43f   : > { %4026 = vmatmul.mubr.msk.bf16.vlgmr.msra.gmra.mrb[36].mxu1 %vm5782_vm13, %v7565_v18 }
 0x440   : > { %3489 = vmatprep.mubr.bf16.mxu1 %v7568_v21 }
 0x447   : > { %3490 = vmatmul.mubr.bf16.gmra.mrb[40].mxu1 %v7571_v1 }
 0x448   : > { %4030 = vmatprep.mubr.msk.bf16.mxu1 %vm5838_vm15, %v7574_v38 }
 0x44f   : > { %4034 = vmatmul.mubr.msk.bf16.gmra.mrb[44].mxu1 %vm5838_vm15, %v7578_v46 }
 0x450   : > { %3509 = vmatprep.mubr.bf16.mxu1 %v7581_v60 }
 0x457   : > { %3510 = vmatmul.mubr.bf16.gmra.mrb[48].mxu1 %v7584_v26 }
 0x458   : > { %4038 = vmatprep.mubr.msk.bf16.mxu1 %vm5908_vm3, %v7587_v19 }
 0x45f   : > { %4042 = vmatmul.mubr.msk.bf16.gmra.mrb[52].mxu1 %vm5908_vm3, %v7591_v52 }
 0x460   : > { %v3471_v39 = vpop.f32.mrb[48].mxu0  ;;  %3529 = vmatprep.mubr.bf16.mxu1 %v7592_v8  ;;  %v7606_v8 = vld [vmem:[#allocation18_spill] sm:$0xff] }
 0x461   : > { %v3473_v33 = vpop.f32.mrb[49].mxu0 }
 0x462   : > { %v3475_v30 = vpop.f32.mrb[50].mxu0 }
 0x463   : > { %v3477_v35 = vpop.f32.mrb[51].mxu0 }
 0x467   : > { %3530 = vmatmul.mubr.bf16.gmra.mrb[56].mxu1 %v7593_v7  ;;  %v7607_v7 = vld [vmem:[#allocation20_spill] sm:$0xff] }
 0x468   : > { %4046 = vmatprep.mubr.msk.bf16.mxu1 %vm5956_vm8, %v4045_v43 }
 0x46f   : > { %4050 = vmatmul.mubr.msk.bf16.gmra.mrb[60].mxu1 %vm5956_vm8, %v4049_v37 }
 0x4d2   : > { %v3358_v6 = vpop.f32.mrb[32].mxu1 }
 0x4d3   : > { %v4175_v43 = vadd.f32 %v3358_v6, %v6961_v63  ;;  %v3360_v59 = vpop.f32.mrb[33].mxu1 }
 0x4d4   : > { %v4177_v11 = vadd.f32 %v3360_v59, %v6965_v4  ;;  %v3362_v36 = vpop.f32.mrb[34].mxu1 }
 0x4d5   : > { %v4176_v37 = vadd.f32 %v4175_v43, %v3471_v39  ;;  %v4179_v53 = vadd.f32 %v3362_v36, %v6961_v63  ;;  %v3364_v57 = vpop.f32.mrb[35].mxu1 }
 0x4d6   : > { %v4178_v14 = vadd.f32 %v4177_v11, %v3473_v33  ;;  %v4181_v41 = vadd.f32 %v3364_v57, %v6965_v4  ;;  %v7609_v57 = vld [vmem:[#allocation24_spill] sm:$0xff] }
 0x4d7   : > { %v3550_v49 = vadd.f32 %v4176_v37, %v7597_v28  ;;  %v4180_v56 = vadd.f32 %v4179_v53, %v3475_v30 }
 0x4d8   : > { %v3551_v10 = vadd.f32 %v4178_v14, %v7598_v54  ;;  %v4182_v44 = vadd.f32 %v4181_v41, %v3477_v35 }
 0x4d9   : > { %v3582_v13 = vmax.f32 %v3550_v49, 0.0  ;;  %v3552_v2 = vadd.f32 %v4180_v56, %v7599_v17  ;;  %v7610_v49 = vld [vmem:[#allocation26_spill] sm:$0xff] }
 0x4da   : > { %v3583_v20 = vmax.f32 %v3551_v10, 0.0  ;;  %v3553_v50 = vadd.f32 %v4182_v44, %v7600_v32  ;;  %v7611_v44 = vld [vmem:[#allocation28_spill] sm:$0xff] }
 0x4db   : > { %3614 = vst [vmem:[%s6976_s20] sm:$0xff] %v3582_v13  ;;  %v3584_v58 = vmax.f32 %v3552_v2, 0.0  ;;  %v7612_v2 = vld [vmem:[#allocation30_spill] sm:$0xff] }
 0x4dc   : > { %3615 = vst [vmem:[%s6976_s20 + $0x8] sm:$0xff] %v3583_v20  ;;  %v3585_v40 = vmax.f32 %v3553_v50, 0.0 }
 0x4dd   : > { %3616 = vst [vmem:[%s6976_s20 + $0x10] sm:$0xff] %v3584_v58 }
 0x4de   : > { %3617 = vst [vmem:[%s6976_s20 + $0x18] sm:$0xff] %v3585_v40 }
 0x512   : > { %v3481_v34 = vpop.f32.mrb[36].mxu1 }
 0x513   : > { %v4183_v18 = vadd.f32 %v3481_v34, %v6961_v63  ;;  %v3483_v45 = vpop.f32.mrb[37].mxu1 }
 0x514   : > { %v4184_v31 = vadd.f32 %v3483_v45, %v6965_v4  ;;  %v3485_v21 = vpop.f32.mrb[38].mxu1 }
 0x515   : > { %v3554_v27 = vadd.f32 %v4183_v18, %v7601_v42  ;;  %v4185_v1 = vadd.f32 %v3485_v21, %v6961_v63  ;;  %v3487_v23 = vpop.f32.mrb[39].mxu1 }
 0x516   : > { %v3555_v38 = vadd.f32 %v4184_v31, %v7602_v24  ;;  %v4186_v12 = vadd.f32 %v3487_v23, %v6965_v4  ;;  %v7613_v31 = vld [vmem:[#allocation32_spill] sm:$0xff] }
 0x517   : > { %v3586_v22 = vmax.f32 %v3554_v27, 0.0  ;;  %v3556_v46 = vadd.f32 %v4185_v1, %v7603_v61  ;;  %v7614_v1 = vld [vmem:[#allocation34_spill] sm:$0xff] }
 0x518   : > { %v3587_v3 = vmax.f32 %v3555_v38, 0.0  ;;  %v3557_v60 = vadd.f32 %v4186_v12, %v7604_v47  ;;  %v7615_v12 = vld [vmem:[#allocation36_spill] sm:$0xff] }
 0x519   : > { %3618 = vst [vmem:[%s6976_s20 + $0x20] sm:$0xff] %v3586_v22  ;;  %v3588_v55 = vmax.f32 %v3556_v46, 0.0  ;;  %v7616_v46 = vld [vmem:[#allocation38_spill] sm:$0xff] }
 0x51a   : > { %3619 = vst [vmem:[%s6976_s20 + $0x28] sm:$0xff] %v3587_v3  ;;  %v3589_v5 = vmax.f32 %v3557_v60, 0.0  ;;  %v3491_v26 = vpop.f32.mrb[40].mxu1 }
 0x51b   : > { %3620 = vst [vmem:[%s6976_s20 + $0x30] sm:$0xff] %v3588_v55  ;;  %v4187_v48 = vadd.f32 %v3491_v26, %v6961_v63  ;;  %v3493_v15 = vpop.f32.mrb[41].mxu1 }
 0x51c   : > { %3621 = vst [vmem:[%s6976_s20 + $0x38] sm:$0xff] %v3589_v5  ;;  %v4188_v19 = vadd.f32 %v3493_v15, %v6965_v4  ;;  %v3495_v25 = vpop.f32.mrb[42].mxu1 }
 0x51d   : > { %v3558_v0 = vadd.f32 %v4187_v48, %v7605_v62  ;;  %v4189_v52 = vadd.f32 %v3495_v25, %v6961_v63  ;;  %v3497_v39 = vpop.f32.mrb[43].mxu1 }
 0x51e   : > { %v3559_v33 = vadd.f32 %v4188_v19, %v7606_v8  ;;  %v4190_v30 = vadd.f32 %v3497_v39, %v6965_v4  ;;  %v7617_v19 = vld [vmem:[#allocation40_spill] sm:$0xff] }
 0x51f   : > { %v3590_v35 = vmax.f32 %v3558_v0, 0.0  ;;  %v3560_v51 = vadd.f32 %v4189_v52, %v7607_v7  ;;  %v7618_v52 = vld [vmem:[#allocation42_spill] sm:$0xff] }
 0x520   : > { %v3591_v16 = vmax.f32 %v3559_v33, 0.0  ;;  %v3561_v29 = vadd.f32 %v4190_v30, %v7608_v9  ;;  %v7619_v30 = vld [vmem:[#allocation44_spill] sm:$0xff] }
 0x521   : > { %3622 = vst [vmem:[%s6976_s20 + $0x40] sm:$0xff] %v3590_v35  ;;  %v3592_v6 = vmax.f32 %v3560_v51, 0.0  ;;  %v7620_v51 = vld [vmem:[#allocation46_spill] sm:$0xff] }
 0x522   : > { %3623 = vst [vmem:[%s6976_s20 + $0x48] sm:$0xff] %v3591_v16  ;;  %v3593_v43 = vmax.f32 %v3561_v29, 0.0  ;;  %v3501_v59 = vpop.f32.mrb[44].mxu1 }
 0x523   : > { %3624 = vst [vmem:[%s6976_s20 + $0x50] sm:$0xff] %v3592_v6  ;;  %v4191_v11 = vadd.f32 %v3501_v59, %v6961_v63  ;;  %v3503_v36 = vpop.f32.mrb[45].mxu1 }
 0x524   : > { %3625 = vst [vmem:[%s6976_s20 + $0x58] sm:$0xff] %v3593_v43  ;;  %v4192_v37 = vadd.f32 %v3503_v36, %v6965_v4  ;;  %v3505_v53 = vpop.f32.mrb[46].mxu1 }
 0x525   : > { %v3562_v14 = vadd.f32 %v4191_v11, %v7609_v57  ;;  %v4193_v41 = vadd.f32 %v3505_v53, %v6961_v63  ;;  %v3507_v28 = vpop.f32.mrb[47].mxu1 }
 0x526   : > { %v3563_v56 = vadd.f32 %v4192_v37, %v7610_v49  ;;  %v4194_v54 = vadd.f32 %v3507_v28, %v6965_v4  ;;  %v7621_v37 = vld [vmem:[#allocation48_spill] sm:$0xff] }
 0x527   : > { %v3594_v10 = vmax.f32 %v3562_v14, 0.0  ;;  %v3564_v13 = vadd.f32 %v4193_v41, %v7611_v44  ;;  %v7622_v41 = vld [vmem:[#allocation50_spill] sm:$0xff] }
 0x528   : > { %v3595_v17 = vmax.f32 %v3563_v56, 0.0  ;;  %v3565_v20 = vadd.f32 %v4194_v54, %v7612_v2  ;;  %v7623_v54 = vld [vmem:[#allocation52_spill] sm:$0xff] }
 0x529   : > { %3626 = vst [vmem:[%s6976_s20 + $0x60] sm:$0xff] %v3594_v10  ;;  %v3596_v32 = vmax.f32 %v3564_v13, 0.0  ;;  %v7624_v13 = vld [vmem:[#allocation54_spill] sm:$0xff] }
 0x52a   : > { %3627 = vst [vmem:[%s6976_s20 + $0x68] sm:$0xff] %v3595_v17  ;;  %v3597_v50 = vmax.f32 %v3565_v20, 0.0  ;;  %v3511_v58 = vpop.f32.mrb[48].mxu1 }
 0x52b   : > { %3628 = vst [vmem:[%s6976_s20 + $0x70] sm:$0xff] %v3596_v32  ;;  %v4195_v40 = vadd.f32 %v3511_v58, %v6961_v63  ;;  %v3513_v34 = vpop.f32.mrb[49].mxu1 }
 0x52c   : > { %3629 = vst [vmem:[%s6976_s20 + $0x78] sm:$0xff] %v3597_v50  ;;  %v4196_v18 = vadd.f32 %v3513_v34, %v6965_v4  ;;  %v3515_v45 = vpop.f32.mrb[50].mxu1 }
 0x52d   : > { %v3566_v21 = vadd.f32 %v4195_v40, %v7613_v31  ;;  %v4197_v42 = vadd.f32 %v3515_v45, %v6961_v63  ;;  %v3517_v27 = vpop.f32.mrb[51].mxu1 }
 0x52e   : > { %v3567_v23 = vadd.f32 %v4196_v18, %v7614_v1  ;;  %v4198_v24 = vadd.f32 %v3517_v27, %v6965_v4  ;;  %v7625_v18 = vld [vmem:[#allocation56_spill] sm:$0xff] }
 0x52f   : > { %v3598_v38 = vmax.f32 %v3566_v21, 0.0  ;;  %v3568_v22 = vadd.f32 %v4197_v42, %v7615_v12  ;;  %v7626_v42 = vld [vmem:[#allocation58_spill] sm:$0xff] }
 0x530   : > { %v3599_v61 = vmax.f32 %v3567_v23, 0.0  ;;  %v3569_v3 = vadd.f32 %v4198_v24, %v7616_v46  ;;  %v7627_v24 = vld [vmem:[#allocation60_spill] sm:$0xff] }
 0x531   : > { %3630 = vst [vmem:[%s6976_s20 + $0x80] sm:$0xff] %v3598_v38  ;;  %v3600_v47 = vmax.f32 %v3568_v22, 0.0  ;;  %v7628_v22 = vld [vmem:[#allocation62_spill] sm:$0xff] }
 0x532   : > { %3631 = vst [vmem:[%s6976_s20 + $0x88] sm:$0xff] %v3599_v61  ;;  %v3601_v60 = vmax.f32 %v3569_v3, 0.0  ;;  %v3521_v55 = vpop.f32.mrb[52].mxu1 }
 0x533   : > { %3632 = vst [vmem:[%s6976_s20 + $0x90] sm:$0xff] %v3600_v47  ;;  %v4199_v5 = vadd.f32 %v3521_v55, %v6961_v63  ;;  %v3523_v26 = vpop.f32.mrb[53].mxu1 }
 0x534   : > { %3633 = vst [vmem:[%s6976_s20 + $0x98] sm:$0xff] %v3601_v60  ;;  %v4200_v48 = vadd.f32 %v3523_v26, %v6965_v4  ;;  %v3525_v15 = vpop.f32.mrb[54].mxu1 }
 0x535   : > { %v3570_v25 = vadd.f32 %v4199_v5, %v7617_v19  ;;  %v4201_v62 = vadd.f32 %v3525_v15, %v6961_v63  ;;  %v3527_v0 = vpop.f32.mrb[55].mxu1 }
 0x536   : > { %v3571_v39 = vadd.f32 %v4200_v48, %v7618_v52  ;;  %v4202_v8 = vadd.f32 %v3527_v0, %v6965_v4 }
 0x537   : > { %v3602_v33 = vmax.f32 %v3570_v25, 0.0  ;;  %v3572_v35 = vadd.f32 %v4201_v62, %v7619_v30 }
 0x538   : > { %v3603_v7 = vmax.f32 %v3571_v39, 0.0  ;;  %v3573_v16 = vadd.f32 %v4202_v8, %v7620_v51 }
 0x539   : > { %3634 = vst [vmem:[%s6976_s20 + $0xa0] sm:$0xff] %v3602_v33  ;;  %v3604_v9 = vmax.f32 %v3572_v35, 0.0 }
 0x53a   : > { %3635 = vst [vmem:[%s6976_s20 + $0xa8] sm:$0xff] %v3603_v7  ;;  %v3605_v29 = vmax.f32 %v3573_v16, 0.0  ;;  %v3531_v6 = vpop.f32.mrb[56].mxu1 }
 0x53b   : > { %3636 = vst [vmem:[%s6976_s20 + $0xb0] sm:$0xff] %v3604_v9  ;;  %v4203_v43 = vadd.f32 %v3531_v6, %v6961_v63  ;;  %v3533_v59 = vpop.f32.mrb[57].mxu1 }
 0x53c   : > { %3637 = vst [vmem:[%s6976_s20 + $0xb8] sm:$0xff] %v3605_v29  ;;  %v4204_v11 = vadd.f32 %v3533_v59, %v6965_v4  ;;  %v3535_v36 = vpop.f32.mrb[58].mxu1 }
 0x53d   : > { %v3574_v53 = vadd.f32 %v4203_v43, %v7621_v37  ;;  %v4205_v57 = vadd.f32 %v3535_v36, %v6961_v63  ;;  %v3537_v14 = vpop.f32.mrb[59].mxu1 }
 0x53e   : > { %v3575_v28 = vadd.f32 %v4204_v11, %v7622_v41  ;;  %v4206_v49 = vadd.f32 %v3537_v14, %v6965_v4 }
 0x53f   : > { %v3606_v56 = vmax.f32 %v3574_v53, 0.0  ;;  %v3576_v10 = vadd.f32 %v4205_v57, %v7623_v54 }
 0x540   : > { %v3607_v44 = vmax.f32 %v3575_v28, 0.0  ;;  %v3577_v17 = vadd.f32 %v4206_v49, %v7624_v13 }
 0x541   : > { %3638 = vst [vmem:[%s6976_s20 + $0xc0] sm:$0xff] %v3606_v56  ;;  %v3608_v2 = vmax.f32 %v3576_v10, 0.0 }
 0x542   : > { %3639 = vst [vmem:[%s6976_s20 + $0xc8] sm:$0xff] %v3607_v44  ;;  %v3609_v20 = vmax.f32 %v3577_v17, 0.0  ;;  %v3541_v32 = vpop.f32.mrb[60].mxu1 }
 0x543   : > { %3640 = vst [vmem:[%s6976_s20 + $0xd0] sm:$0xff] %v3608_v2  ;;  %v4207_v50 = vadd.f32 %v3541_v32, %v6961_v63  ;;  %v3543_v58 = vpop.f32.mrb[61].mxu1 }
 0x544   : > { %3641 = vst [vmem:[%s6976_s20 + $0xd8] sm:$0xff] %v3609_v20  ;;  %v4208_v40 = vadd.f32 %v3543_v58, %v6965_v4  ;;  %v3545_v34 = vpop.f32.mrb[62].mxu1 }
 0x545   : > { %v3578_v45 = vadd.f32 %v4207_v50, %v7625_v18  ;;  %v4209_v31 = vadd.f32 %v3545_v34, %v6961_v63  ;;  %v3547_v21 = vpop.f32.mrb[63].mxu1 }
 0x546   : > { %v3579_v27 = vadd.f32 %v4208_v40, %v7626_v42  ;;  %v4210_v1 = vadd.f32 %v3547_v21, %v6965_v4 }
 0x547   : > { %v3610_v23 = vmax.f32 %v3578_v45, 0.0  ;;  %v3580_v38 = vadd.f32 %v4209_v31, %v7627_v24 }
 0x548   : > { %v3611_v12 = vmax.f32 %v3579_v27, 0.0  ;;  %v3581_v61 = vadd.f32 %v4210_v1, %v7628_v22 }
 0x549   : > { %3642 = vst [vmem:[%s6976_s20 + $0xe0] sm:$0xff] %v3610_v23  ;;  %v3612_v46 = vmax.f32 %v3580_v38, 0.0 }
 0x54a   : > { %3643 = vst [vmem:[%s6976_s20 + $0xe8] sm:$0xff] %v3611_v12  ;;  %v3613_v3 = vmax.f32 %v3581_v61, 0.0 }
 0x54b   : > { %3644 = vst [vmem:[%s6976_s20 + $0xf0] sm:$0xff] %v3612_v46 }
 0x54c   : > { %3645 = vst [vmem:[%s6976_s20 + $0xf8] sm:$0xff] %v3613_v3 }
 0x54d PF: > { %s17_s24 = sadd.s32 1, %s4645_s24  }
 0x54e   : > { %p14_p4 = scmp.ge.s32.totalorder %s17_s24, 4  }
 0x550   :  { %16 = sbr.rel (!%p14_p4) target bundleno = 1 (0x1), region = 78 }

</bundles_post_ra>
